<compile_context>
chip_gen: v5e
topology: v5e:2x2
jax: 0.10.0
libtpu: 0.0.40
codegen_flags: <defaults>
</compile_context>

<pallas_src>
import functools

import jax
import jax.numpy as jnp
from jax.experimental import pallas as pl
from jax.experimental.pallas import tpu as pltpu


# --------------------------------------------------------------------------
# Pallas kernels
# --------------------------------------------------------------------------

def _phases_bn_kernel(act, nphase, p_ref, w_ref, b_ref, g_ref, be_ref, o_ref):
    """For each phase p: y_p = W_p @ patches_p + b; then BatchNorm over the
    union of all phases (training-mode batch stats), then activation."""
    ys = []
    for p in range(nphase):
        y = jnp.dot(w_ref[p], p_ref[p], preferred_element_type=jnp.float32)
        ys.append(y + b_ref[...])
    m_cols = ys[0].shape[1]
    cnt = float(nphase * m_cols)

    s = ys[0] * 0.0
    s = sum([jnp.sum(y, axis=1, keepdims=True) for y in ys])          # (Cout, 1)
    mean = s / cnt
    ss = sum([jnp.sum(jnp.square(y - mean), axis=1, keepdims=True) for y in ys])
    var = ss / cnt                                                    # biased (train mode)
    scale = jax.lax.rsqrt(var + 1e-5) * g_ref[...]
    shift = be_ref[...] - mean * scale

    for p in range(nphase):
        y = ys[p] * scale + shift
        if act == "relu":
            y = jnp.maximum(y, 0.0)
        elif act == "tanh":
            y = jnp.tanh(y)
        o_ref[p] = y


def _phase_nobn_kernel(act, p_ref, w_ref, b_ref, o_ref):
    """Single phase, no BN (used by the final ConvT+Tanh, grid-parallel)."""
    y = jnp.dot(w_ref[0], p_ref[0], preferred_element_type=jnp.float32) + b_ref[...]
    if act == "relu":
        y = jnp.maximum(y, 0.0)
    elif act == "tanh":
        y = jnp.tanh(y)
    o_ref[0] = y


def _enc_head_kernel(zdim, p_ref, w_ref, b_ref, g_ref, be_ref, eps_ref,
                     z_ref, kl_ref):
    """Last encoder conv + BN, then mu/logvar split, KL(N(mu,s)||N(0,1))
    .sum(channel).mean(), and the reparameterized sample."""
    y = jnp.dot(w_ref[...], p_ref[...], preferred_element_type=jnp.float32)
    y = y + b_ref[...]
    mean = jnp.mean(y, axis=1, keepdims=True)
    var = jnp.mean(jnp.square(y - mean), axis=1, keepdims=True)
    y = (y - mean) * jax.lax.rsqrt(var + 1e-5) * g_ref[...] + be_ref[...]

    mu = y[:zdim, :]
    logvar = y[zdim:, :]

    kl_el = 0.5 * (jnp.exp(logvar) + jnp.square(mu) - 1.0 - logvar)   # (zdim, M)
    m_cols = kl_el.shape[1]
    kl = jnp.sum(jnp.sum(kl_el, axis=1, keepdims=True), axis=0, keepdims=True) / m_cols
    kl_ref[...] = kl                                                  # (1, 1)

    z_ref[...] = mu + jnp.exp(0.5 * logvar) * eps_ref[...]


# --------------------------------------------------------------------------
# pallas_call wrappers
# --------------------------------------------------------------------------

def _call_phases(patches, wmats, b, g, be, act, use_bn):
    """patches: (P, Kf, M); wmats: (P, Cout, Kf); returns (P, Cout, M)."""
    P, Kf, M = patches.shape
    Cout = wmats.shape[1]
    if use_bn:
        kernel = functools.partial(_phases_bn_kernel, act, P)
        return pl.pallas_call(
            kernel,
            out_shape=jax.ShapeDtypeStruct((P, Cout, M), jnp.float32),
            grid=(1,),
            in_specs=[
                pl.BlockSpec((P, Kf, M), lambda i: (0, 0, 0)),
                pl.BlockSpec((P, Cout, Kf), lambda i: (0, 0, 0)),
                pl.BlockSpec((Cout, 1), lambda i: (0, 0)),
                pl.BlockSpec((Cout, 1), lambda i: (0, 0)),
                pl.BlockSpec((Cout, 1), lambda i: (0, 0)),
            ],
            out_specs=pl.BlockSpec((P, Cout, M), lambda i: (0, 0, 0)),
            compiler_params=pltpu.CompilerParams(
                dimension_semantics=("arbitrary",)),
        )(patches, wmats, b.reshape(-1, 1), g.reshape(-1, 1), be.reshape(-1, 1))
    else:
        kernel = functools.partial(_phase_nobn_kernel, act)
        return pl.pallas_call(
            kernel,
            out_shape=jax.ShapeDtypeStruct((P, Cout, M), jnp.float32),
            grid=(P,),
            in_specs=[
                pl.BlockSpec((1, Kf, M), lambda p: (p, 0, 0)),
                pl.BlockSpec((1, Cout, Kf), lambda p: (p, 0, 0)),
                pl.BlockSpec((Cout, 1), lambda p: (0, 0)),
            ],
            out_specs=pl.BlockSpec((1, Cout, M), lambda p: (p, 0, 0)),
            compiler_params=pltpu.CompilerParams(
                dimension_semantics=("parallel",)),          # both TCs on v7x
        )(patches, wmats, b.reshape(-1, 1))


# --------------------------------------------------------------------------
# Conv / ConvTranspose glue (im2col in CNHW layout; matmul+BN+act in Pallas)
# --------------------------------------------------------------------------

def _im2col_cnhw(xp, kh, kw, stride, ho, wo, oh0=0, ow0=0):
    """xp: (C, N, Hp, Wp) already padded -> patches (C*kh*kw, N*ho*wo),
    feature order (cin, tap) matching w.reshape(Cout, Cin*kh*kw)."""
    C, N = xp.shape[0], xp.shape[1]
    cols = []
    for i in range(kh):
        for j in range(kw):
            cols.append(xp[:, :,
                           oh0 + i: oh0 + i + stride * (ho - 1) + 1: stride,
                           ow0 + j: ow0 + j + stride * (wo - 1) + 1: stride])
    patches = jnp.stack(cols, axis=1)                 # (C, kh*kw, N, ho, wo)
    return patches.reshape(C * kh * kw, N * ho * wo)


def conv_bn_act(x, w, b, g, be, *, stride, pad, act="relu"):
    """x: (Cin, N, H, W) CNHW; w: (Cout, Cin, kh, kw).  Fused conv+BN+act."""
    Cin, N, H, W = x.shape
    Cout, _, kh, kw = w.shape
    Ho = (H + 2 * pad - kh) // stride + 1
    Wo = (W + 2 * pad - kw) // stride + 1
    xp = jnp.pad(x, ((0, 0), (0, 0), (pad, pad), (pad, pad)))
    patches = _im2col_cnhw(xp, kh, kw, stride, Ho, Wo)
    wmat = w.reshape(Cout, Cin * kh * kw)
    out = _call_phases(patches[None], wmat[None], b, g, be, act, True)
    return out[0].reshape(Cout, N, Ho, Wo)


def convT_s1_bn_act(x, w_T, b, g, be, *, pad_pt, act="relu"):
    """Stride-1 ConvTranspose2d == conv with flipped/transposed kernel,
    padding (k - 1 - pad).  w_T: (Cin, Cout, kh, kw) (PyTorch layout)."""
    kh = w_T.shape[2]
    w_conv = jnp.transpose(w_T[:, :, ::-1, ::-1], (1, 0, 2, 3))  # (Cout, Cin, kh, kw)
    return conv_bn_act(x, w_conv, b, g, be, stride=1, pad=kh - 1 - pad_pt, act=act)


def convT_s2_k4_p1(x, w_T, b, g, be, *, act, use_bn):
    """ConvTranspose2d(k=4, s=2, p=1) via 4 stride-phase 2x2 sub-convolutions.
    x: (Cin, N, H, W) -> (Cout, N, 2H, 2W)."""
    Cin, N, H, W = x.shape
    Cout = w_T.shape[1]
    xp = jnp.pad(x, ((0, 0), (0, 0), (1, 1), (1, 1)))
    TH = ((3, 1), (2, 0))    # phase r/c -> ordered kernel taps of the 2-tap conv

    patch_list, w_list = [], []
    for r in range(2):
        for c in range(2):
            patch_list.append(_im2col_cnhw(xp, 2, 2, 1, H, W, oh0=r, ow0=c))
            w_sub = jnp.stack(
                [jnp.stack([w_T[:, :, TH[r][a], TH[c][bb]] for bb in range(2)],
                           axis=-1) for a in range(2)],
                axis=-2)                                     # (Cin, Cout, 2, 2)
            w_list.append(jnp.transpose(w_sub, (1, 0, 2, 3)).reshape(Cout, Cin * 4))

    patches = jnp.stack(patch_list, axis=0)                  # (4, Cin*4, N*H*W)
    wmats = jnp.stack(w_list, axis=0)                        # (4, Cout, Cin*4)
    out = _call_phases(patches, wmats, b, g, be, act, use_bn)  # (4, Cout, N*H*W)

    out = out.reshape(2, 2, Cout, N, H, W)                   # (r, c, Cout, N, H, W)
    out = jnp.transpose(out, (2, 3, 4, 0, 5, 1)).reshape(Cout, N, 2 * H, 2 * W)
    return out


def encoder_head(x, w, b, g, be, eps, z_dim):
    """Last encoder conv (3x3, valid) + BN + chunk + KL + rsample, one kernel."""
    Cin, N, H, W = x.shape
    Cout, _, kh, kw = w.shape                                # Cout == 2 * z_dim
    Ho, Wo = H - kh + 1, W - kw + 1
    M = N * Ho * Wo
    patches = _im2col_cnhw(x, kh, kw, 1, Ho, Wo)
    wmat = w.reshape(Cout, Cin * kh * kw)
    Kf = Cin * kh * kw

    z, kl = pl.pallas_call(
        functools.partial(_enc_head_kernel, z_dim),
        out_shape=(jax.ShapeDtypeStruct((z_dim, M), jnp.float32),
                   jax.ShapeDtypeStruct((1, 1), jnp.float32)),
        grid=(1,),
        in_specs=[
            pl.BlockSpec((Kf, M), lambda i: (0, 0)),
            pl.BlockSpec((Cout, Kf), lambda i: (0, 0)),
            pl.BlockSpec((Cout, 1), lambda i: (0, 0)),
            pl.BlockSpec((Cout, 1), lambda i: (0, 0)),
            pl.BlockSpec((Cout, 1), lambda i: (0, 0)),
            pl.BlockSpec((z_dim, M), lambda i: (0, 0)),
        ],
        out_specs=(pl.BlockSpec((z_dim, M), lambda i: (0, 0)),
                   pl.BlockSpec((1, 1), lambda i: (0, 0))),
        compiler_params=pltpu.CompilerParams(dimension_semantics=("arbitrary",)),
    )(patches, wmat, b.reshape(-1, 1), g.reshape(-1, 1), be.reshape(-1, 1), eps)

    return z.reshape(z_dim, N, Ho, Wo), kl[0, 0]


# --------------------------------------------------------------------------
# VAE forward
# --------------------------------------------------------------------------

def vae_forward(params, x_nchw, eps):
    p = params
    x = jnp.transpose(x_nchw, (1, 0, 2, 3)).astype(jnp.float32)     # CNHW

    # ---- encoder ----
    h = conv_bn_act(x, p["e1_w"], p["e1_b"], p["e1_g"], p["e1_be"], stride=2, pad=1)
    h = conv_bn_act(h, p["e2_w"], p["e2_b"], p["e2_g"], p["e2_be"], stride=2, pad=1)
    h = conv_bn_act(h, p["e3_w"], p["e3_b"], p["e3_g"], p["e3_be"], stride=1, pad=0)
    z_dim = p["e4_w"].shape[0] // 2
    z, kl_div = encoder_head(h, p["e4_w"], p["e4_b"], p["e4_g"], p["e4_be"], eps, z_dim)

    # ---- decoder ----
    g = convT_s1_bn_act(z, p["d1_w"], p["d1_b"], p["d1_g"], p["d1_be"], pad_pt=0)
    g = convT_s1_bn_act(g, p["d2_w"], p["d2_b"], p["d2_g"], p["d2_be"], pad_pt=0)
    g = convT_s2_k4_p1(g, p["d3_w"], p["d3_b"], p["d3_g"], p["d3_be"],
                       act="relu", use_bn=True)
    g = convT_s2_k4_p1(g, p["d4_w"], p["d4_b"], None, None,
                       act="tanh", use_bn=False)

    x_tilde = jnp.transpose(g, (1, 0, 2, 3))                        # NCHW
    return x_tilde, kl_div


# --------------------------------------------------------------------------
# Deterministic parameter initialization (mirrors weights_init / defaults)
# --------------------------------------------------------------------------

def init_params(key, input_dim, dim, z_dim):
    ks = iter(jax.random.split(key, 8))

    def xavier(k, shape, fan_in, fan_out):
        bound = (6.0 / (fan_in + fan_out)) ** 0.5
        return jax.random.uniform(k, shape, jnp.float32, -bound, bound)

    def conv_w(k, cout, cin, ksz):          # Conv2d weight layout (Cout, Cin, k, k)
        return xavier(k, (cout, cin, ksz, ksz), cin * ksz * ksz, cout * ksz * ksz)

    def convT_w(k, cin, cout, ksz):         # ConvTranspose2d layout (Cin, Cout, k, k)
        return xavier(k, (cin, cout, ksz, ksz), cout * ksz * ksz, cin * ksz * ksz)

    def bn(c):
        return jnp.ones((c,), jnp.float32), jnp.zeros((c,), jnp.float32)

    p = {}
    p["e1_w"] = conv_w(next(ks), dim, input_dim, 4); p["e1_b"] = jnp.zeros((dim,), jnp.float32)
    p["e1_g"], p["e1_be"] = bn(dim)
    p["e2_w"] = conv_w(next(ks), dim, dim, 4); p["e2_b"] = jnp.zeros((dim,), jnp.float32)
    p["e2_g"], p["e2_be"] = bn(dim)
    p["e3_w"] = conv_w(next(ks), dim, dim, 5); p["e3_b"] = jnp.zeros((dim,), jnp.float32)
    p["e3_g"], p["e3_be"] = bn(dim)
    p["e4_w"] = conv_w(next(ks), 2 * z_dim, dim, 3); p["e4_b"] = jnp.zeros((2 * z_dim,), jnp.float32)
    p["e4_g"], p["e4_be"] = bn(2 * z_dim)

    p["d1_w"] = convT_w(next(ks), z_dim, dim, 3); p["d1_b"] = jnp.zeros((dim,), jnp.float32)
    p["d1_g"], p["d1_be"] = bn(dim)
    p["d2_w"] = convT_w(next(ks), dim, dim, 5); p["d2_b"] = jnp.zeros((dim,), jnp.float32)
    p["d2_g"], p["d2_be"] = bn(dim)
    p["d3_w"] = convT_w(next(ks), dim, dim, 4); p["d3_b"] = jnp.zeros((dim,), jnp.float32)
    p["d3_g"], p["d3_be"] = bn(dim)
    p["d4_w"] = convT_w(next(ks), dim, input_dim, 4); p["d4_b"] = jnp.zeros((input_dim,), jnp.float32)
    return p


if __name__ == "__main__":
    # Architecture requires spatial >= 28 (two stride-2 convs then 5x5 and 3x3
    # valid convs); use 32x32 -> latent spatial 2x2.
    INPUT_DIM, DIM, Z_DIM = 3, 16, 8
    N, H, W = 2, 32, 32
    HL = H // 4 - 6   # 2
    WL = W // 4 - 6   # 2

    root = jax.random.PRNGKey(0)
    k_params, k_x, k_eps = jax.random.split(root, 3)
    params = init_params(k_params, INPUT_DIM, DIM, Z_DIM)
    x = jax.random.normal(k_x, (N, INPUT_DIM, H, W), jnp.float32)
    eps = jax.random.normal(k_eps, (Z_DIM, N * HL * WL), jnp.float32)   # rsample noise

    fwd = jax.jit(vae_forward)
    x_tilde, kl_div = fwd(params, x, eps)
    jax.block_until_ready((x_tilde, kl_div))

    assert x_tilde.shape == (N, INPUT_DIM, H, W)
    assert kl_div.shape == ()
    assert bool(jnp.all(jnp.isfinite(x_tilde)))
    assert bool(jnp.isfinite(kl_div))
    print("KERNEL_OK")
</pallas_src>

<mosaic_0001>
module attributes {stable_mosaic.version = 11 : i64} {
  func.func @_phases_bn_kernel(%arg0: i32, %arg1: memref<1x48x512xf32, #tpu.memory_space<vmem>>, %arg2: memref<1x16x48xf32, #tpu.memory_space<vmem>>, %arg3: memref<16x1xf32, #tpu.memory_space<vmem>>, %arg4: memref<16x1xf32, #tpu.memory_space<vmem>>, %arg5: memref<16x1xf32, #tpu.memory_space<vmem>>, %arg6: memref<1x16x512xf32, #tpu.memory_space<vmem>>) attributes {dimension_semantics = [#tpu.dimension_semantics<arbitrary>], iteration_bounds = array<i64: 1>, scalar_prefetch = 0 : i64, scratch_operands = 0 : i64, tpu.core_type = #tpu.core_type<tc>, window_params = [{pipeline_mode = #tpu.pipeline_mode<synchronous>, transform_indices = @transform_0, window_bounds = array<i64: 1, 48, 512>}, {pipeline_mode = #tpu.pipeline_mode<synchronous>, transform_indices = @transform_1, window_bounds = array<i64: 1, 16, 48>}, {pipeline_mode = #tpu.pipeline_mode<synchronous>, transform_indices = @transform_2, window_bounds = array<i64: 16, 1>}, {pipeline_mode = #tpu.pipeline_mode<synchronous>, transform_indices = @transform_3, window_bounds = array<i64: 16, 1>}, {pipeline_mode = #tpu.pipeline_mode<synchronous>, transform_indices = @transform_4, window_bounds = array<i64: 16, 1>}, {pipeline_mode = #tpu.pipeline_mode<synchronous>, transform_indices = @transform_5, window_bounds = array<i64: 1, 16, 512>}]} {
    %c0 = arith.constant 0 : index
    %c0_0 = arith.constant 0 : index
    %c0_1 = arith.constant 0 : index
    %0 = vector.load %arg2[%c0, %c0_0, %c0_1] : memref<1x16x48xf32, #tpu.memory_space<vmem>>, vector<1x16x48xf32>
    %1 = vector.shape_cast %0 : vector<1x16x48xf32> to vector<16x48xf32>
    %c0_2 = arith.constant 0 : index
    %c0_3 = arith.constant 0 : index
    %c0_4 = arith.constant 0 : index
    %2 = vector.load %arg1[%c0_2, %c0_3, %c0_4] : memref<1x48x512xf32, #tpu.memory_space<vmem>>, vector<1x48x512xf32>
    %3 = vector.shape_cast %2 : vector<1x48x512xf32> to vector<48x512xf32>
    %cst = arith.constant dense<0.000000e+00> : vector<16x512xf32>
    %4 = tpu.matmul %1, %3, %cst {dimension_numbers = #tpu.dot_dimension_numbers<[1], [0], [0], [1], [0, 0, 1, 1], [], []>} : vector<16x48xf32>, vector<48x512xf32>, vector<16x512xf32> -> vector<16x512xf32>
    %c0_5 = arith.constant 0 : index
    %c0_6 = arith.constant 0 : index
    %5 = vector.load %arg3[%c0_5, %c0_6] : memref<16x1xf32, #tpu.memory_space<vmem>>, vector<16x1xf32>
    %6 = vector.broadcast %5 : vector<16x1xf32> to vector<16x512xf32>
    %7 = arith.addf %4, %6 : vector<16x512xf32>
    %cst_7 = arith.constant dense<0.000000e+00> : vector<16xf32>
    %8 = vector.multi_reduction <add>, %7, %cst_7 [1] : vector<16x512xf32> to vector<16xf32>
    %9 = vector.shape_cast %8 : vector<16xf32> to vector<16x1xf32>
    %cst_8 = arith.constant 0.000000e+00 : f32
    %10 = vector.broadcast %cst_8 : f32 to vector<16x1xf32>
    %11 = arith.addf %10, %9 : vector<16x1xf32>
    %cst_9 = arith.constant 5.120000e+02 : f32
    %12 = vector.broadcast %cst_9 : f32 to vector<16x1xf32>
    %13 = arith.divf %11, %12 : vector<16x1xf32>
    %14 = vector.broadcast %13 : vector<16x1xf32> to vector<16x512xf32>
    %15 = arith.subf %7, %14 : vector<16x512xf32>
    %16 = arith.mulf %15, %15 : vector<16x512xf32>
    %cst_10 = arith.constant dense<0.000000e+00> : vector<16xf32>
    %17 = vector.multi_reduction <add>, %16, %cst_10 [1] : vector<16x512xf32> to vector<16xf32>
    %18 = vector.shape_cast %17 : vector<16xf32> to vector<16x1xf32>
    %cst_11 = arith.constant 0.000000e+00 : f32
    %19 = vector.broadcast %cst_11 : f32 to vector<16x1xf32>
    %20 = arith.addf %19, %18 : vector<16x1xf32>
    %cst_12 = arith.constant 5.120000e+02 : f32
    %21 = vector.broadcast %cst_12 : f32 to vector<16x1xf32>
    %22 = arith.divf %20, %21 : vector<16x1xf32>
    %cst_13 = arith.constant 9.99999974E-6 : f32
    %23 = vector.broadcast %cst_13 : f32 to vector<16x1xf32>
    %24 = arith.addf %22, %23 : vector<16x1xf32>
    %25 = math.rsqrt %24 : vector<16x1xf32>
    %c0_14 = arith.constant 0 : index
    %c0_15 = arith.constant 0 : index
    %26 = vector.load %arg4[%c0_14, %c0_15] : memref<16x1xf32, #tpu.memory_space<vmem>>, vector<16x1xf32>
    %27 = arith.mulf %25, %26 : vector<16x1xf32>
    %c0_16 = arith.constant 0 : index
    %c0_17 = arith.constant 0 : index
    %28 = vector.load %arg5[%c0_16, %c0_17] : memref<16x1xf32, #tpu.memory_space<vmem>>, vector<16x1xf32>
    %29 = arith.mulf %13, %27 : vector<16x1xf32>
    %30 = arith.subf %28, %29 : vector<16x1xf32>
    %31 = vector.broadcast %27 : vector<16x1xf32> to vector<16x512xf32>
    %32 = arith.mulf %7, %31 : vector<16x512xf32>
    %33 = vector.broadcast %30 : vector<16x1xf32> to vector<16x512xf32>
    %34 = arith.addf %32, %33 : vector<16x512xf32>
    %cst_18 = arith.constant 0.000000e+00 : f32
    %35 = vector.broadcast %cst_18 : f32 to vector<16x512xf32>
    %36 = arith.maximumf %34, %35 : vector<16x512xf32>
    %c0_19 = arith.constant 0 : index
    %c0_20 = arith.constant 0 : index
    %c0_21 = arith.constant 0 : index
    %37 = vector.load %arg6[%c0_19, %c0_20, %c0_21] : memref<1x16x512xf32, #tpu.memory_space<vmem>>, vector<1x16x512xf32>
    %38 = vector.shape_cast %37 : vector<1x16x512xf32> to vector<16x512xf32>
    %39 = vector.shape_cast %36 : vector<16x512xf32> to vector<1x16x512xf32>
    tpu.vector_store %arg6[%c0_19, %c0_20, %c0_21], %39 {strides = array<i32>} : memref<1x16x512xf32, #tpu.memory_space<vmem>>, vector<1x16x512xf32>,
    return
  }
  func.func @transform_0(%arg0: i32) -> (i32, i32, i32) {
    %c0_i32 = arith.constant 0 : i32
    %c0_i32_0 = arith.constant 0 : i32
    %c0_i32_1 = arith.constant 0 : i32
    %c0_i32_2 = arith.constant 0 : i32
    return %c0_i32, %c0_i32_0, %c0_i32_1 : i32, i32, i32
  }
  func.func @transform_1(%arg0: i32) -> (i32, i32, i32) {
    %c0_i32 = arith.constant 0 : i32
    %c0_i32_0 = arith.constant 0 : i32
    %c0_i32_1 = arith.constant 0 : i32
    %c0_i32_2 = arith.constant 0 : i32
    return %c0_i32, %c0_i32_0, %c0_i32_1 : i32, i32, i32
  }
  func.func @transform_2(%arg0: i32) -> (i32, i32) {
    %c0_i32 = arith.constant 0 : i32
    %c0_i32_0 = arith.constant 0 : i32
    %c0_i32_1 = arith.constant 0 : i32
    return %c0_i32, %c0_i32_0 : i32, i32
  }
  func.func @transform_3(%arg0: i32) -> (i32, i32) {
    %c0_i32 = arith.constant 0 : i32
    %c0_i32_0 = arith.constant 0 : i32
    %c0_i32_1 = arith.constant 0 : i32
    return %c0_i32, %c0_i32_0 : i32, i32
  }
  func.func @transform_4(%arg0: i32) -> (i32, i32) {
    %c0_i32 = arith.constant 0 : i32
    %c0_i32_0 = arith.constant 0 : i32
    %c0_i32_1 = arith.constant 0 : i32
    return %c0_i32, %c0_i32_0 : i32, i32
  }
  func.func @transform_5(%arg0: i32) -> (i32, i32, i32) {
    %c0_i32 = arith.constant 0 : i32
    %c0_i32_0 = arith.constant 0 : i32
    %c0_i32_1 = arith.constant 0 : i32
    %c0_i32_2 = arith.constant 0 : i32
    return %c0_i32, %c0_i32_0, %c0_i32_1 : i32, i32, i32
  }
}

module attributes {stable_mosaic.version = 11 : i64} {
  func.func @_phases_bn_kernel(%arg0: i32, %arg1: memref<1x256x128xf32, #tpu.memory_space<vmem>>, %arg2: memref<1x16x256xf32, #tpu.memory_space<vmem>>, %arg3: memref<16x1xf32, #tpu.memory_space<vmem>>, %arg4: memref<16x1xf32, #tpu.memory_space<vmem>>, %arg5: memref<16x1xf32, #tpu.memory_space<vmem>>, %arg6: memref<1x16x128xf32, #tpu.memory_space<vmem>>) attributes {dimension_semantics = [#tpu.dimension_semantics<arbitrary>], iteration_bounds = array<i64: 1>, scalar_prefetch = 0 : i64, scratch_operands = 0 : i64, tpu.core_type = #tpu.core_type<tc>, window_params = [{pipeline_mode = #tpu.pipeline_mode<synchronous>, transform_indices = @transform_0, window_bounds = array<i64: 1, 256, 128>}, {pipeline_mode = #tpu.pipeline_mode<synchronous>, transform_indices = @transform_1, window_bounds = array<i64: 1, 16, 256>}, {pipeline_mode = #tpu.pipeline_mode<synchronous>, transform_indices = @transform_2, window_bounds = array<i64: 16, 1>}, {pipeline_mode = #tpu.pipeline_mode<synchronous>, transform_indices = @transform_3, window_bounds = array<i64: 16, 1>}, {pipeline_mode = #tpu.pipeline_mode<synchronous>, transform_indices = @transform_4, window_bounds = array<i64: 16, 1>}, {pipeline_mode = #tpu.pipeline_mode<synchronous>, transform_indices = @transform_5, window_bounds = array<i64: 1, 16, 128>}]} {
    %c0 = arith.constant 0 : index
    %c0_0 = arith.constant 0 : index
    %c0_1 = arith.constant 0 : index
    %0 = vector.load %arg2[%c0, %c0_0, %c0_1] : memref<1x16x256xf32, #tpu.memory_space<vmem>>, vector<1x16x256xf32>
    %1 = vector.shape_cast %0 : vector<1x16x256xf32> to vector<16x256xf32>
    %c0_2 = arith.constant 0 : index
    %c0_3 = arith.constant 0 : index
    %c0_4 = arith.constant 0 : index
    %2 = vector.load %arg1[%c0_2, %c0_3, %c0_4] : memref<1x256x128xf32, #tpu.memory_space<vmem>>, vector<1x256x128xf32>
    %3 = vector.shape_cast %2 : vector<1x256x128xf32> to vector<256x128xf32>
    %cst = arith.constant dense<0.000000e+00> : vector<16x128xf32>
    %4 = tpu.matmul %1, %3, %cst {dimension_numbers = #tpu.dot_dimension_numbers<[1], [0], [0], [1], [0, 0, 1, 1], [], []>} : vector<16x256xf32>, vector<256x128xf32>, vector<16x128xf32> -> vector<16x128xf32>
    %c0_5 = arith.constant 0 : index
    %c0_6 = arith.constant 0 : index
    %5 = vector.load %arg3[%c0_5, %c0_6] : memref<16x1xf32, #tpu.memory_space<vmem>>, vector<16x1xf32>
    %6 = vector.broadcast %5 : vector<16x1xf32> to vector<16x128xf32>
    %7 = arith.addf %4, %6 : vector<16x128xf32>
    %cst_7 = arith.constant dense<0.000000e+00> : vector<16xf32>
    %8 = vector.multi_reduction <add>, %7, %cst_7 [1] : vector<16x128xf32> to vector<16xf32>
    %9 = vector.shape_cast %8 : vector<16xf32> to vector<16x1xf32>
    %cst_8 = arith.constant 0.000000e+00 : f32
    %10 = vector.broadcast %cst_8 : f32 to vector<16x1xf32>
    %11 = arith.addf %10, %9 : vector<16x1xf32>
    %cst_9 = arith.constant 1.280000e+02 : f32
    %12 = vector.broadcast %cst_9 : f32 to vector<16x1xf32>
    %13 = arith.divf %11, %12 : vector<16x1xf32>
    %14 = vector.broadcast %13 : vector<16x1xf32> to vector<16x128xf32>
    %15 = arith.subf %7, %14 : vector<16x128xf32>
    %16 = arith.mulf %15, %15 : vector<16x128xf32>
    %cst_10 = arith.constant dense<0.000000e+00> : vector<16xf32>
    %17 = vector.multi_reduction <add>, %16, %cst_10 [1] : vector<16x128xf32> to vector<16xf32>
    %18 = vector.shape_cast %17 : vector<16xf32> to vector<16x1xf32>
    %cst_11 = arith.constant 0.000000e+00 : f32
    %19 = vector.broadcast %cst_11 : f32 to vector<16x1xf32>
    %20 = arith.addf %19, %18 : vector<16x1xf32>
    %cst_12 = arith.constant 1.280000e+02 : f32
    %21 = vector.broadcast %cst_12 : f32 to vector<16x1xf32>
    %22 = arith.divf %20, %21 : vector<16x1xf32>
    %cst_13 = arith.constant 9.99999974E-6 : f32
    %23 = vector.broadcast %cst_13 : f32 to vector<16x1xf32>
    %24 = arith.addf %22, %23 : vector<16x1xf32>
    %25 = math.rsqrt %24 : vector<16x1xf32>
    %c0_14 = arith.constant 0 : index
    %c0_15 = arith.constant 0 : index
    %26 = vector.load %arg4[%c0_14, %c0_15] : memref<16x1xf32, #tpu.memory_space<vmem>>, vector<16x1xf32>
    %27 = arith.mulf %25, %26 : vector<16x1xf32>
    %c0_16 = arith.constant 0 : index
    %c0_17 = arith.constant 0 : index
    %28 = vector.load %arg5[%c0_16, %c0_17] : memref<16x1xf32, #tpu.memory_space<vmem>>, vector<16x1xf32>
    %29 = arith.mulf %13, %27 : vector<16x1xf32>
    %30 = arith.subf %28, %29 : vector<16x1xf32>
    %31 = vector.broadcast %27 : vector<16x1xf32> to vector<16x128xf32>
    %32 = arith.mulf %7, %31 : vector<16x128xf32>
    %33 = vector.broadcast %30 : vector<16x1xf32> to vector<16x128xf32>
    %34 = arith.addf %32, %33 : vector<16x128xf32>
    %cst_18 = arith.constant 0.000000e+00 : f32
    %35 = vector.broadcast %cst_18 : f32 to vector<16x128xf32>
    %36 = arith.maximumf %34, %35 : vector<16x128xf32>
    %c0_19 = arith.constant 0 : index
    %c0_20 = arith.constant 0 : index
    %c0_21 = arith.constant 0 : index
    %37 = vector.load %arg6[%c0_19, %c0_20, %c0_21] : memref<1x16x128xf32, #tpu.memory_space<vmem>>, vector<1x16x128xf32>
    %38 = vector.shape_cast %37 : vector<1x16x128xf32> to vector<16x128xf32>
    %39 = vector.shape_cast %36 : vector<16x128xf32> to vector<1x16x128xf32>
    tpu.vector_store %arg6[%c0_19, %c0_20, %c0_21], %39 {strides = array<i32>} : memref<1x16x128xf32, #tpu.memory_space<vmem>>, vector<1x16x128xf32>,
    return
  }
  func.func @transform_0(%arg0: i32) -> (i32, i32, i32) {
    %c0_i32 = arith.constant 0 : i32
    %c0_i32_0 = arith.constant 0 : i32
    %c0_i32_1 = arith.constant 0 : i32
    %c0_i32_2 = arith.constant 0 : i32
    return %c0_i32, %c0_i32_0, %c0_i32_1 : i32, i32, i32
  }
  func.func @transform_1(%arg0: i32) -> (i32, i32, i32) {
    %c0_i32 = arith.constant 0 : i32
    %c0_i32_0 = arith.constant 0 : i32
    %c0_i32_1 = arith.constant 0 : i32
    %c0_i32_2 = arith.constant 0 : i32
    return %c0_i32, %c0_i32_0, %c0_i32_1 : i32, i32, i32
  }
  func.func @transform_2(%arg0: i32) -> (i32, i32) {
    %c0_i32 = arith.constant 0 : i32
    %c0_i32_0 = arith.constant 0 : i32
    %c0_i32_1 = arith.constant 0 : i32
    return %c0_i32, %c0_i32_0 : i32, i32
  }
  func.func @transform_3(%arg0: i32) -> (i32, i32) {
    %c0_i32 = arith.constant 0 : i32
    %c0_i32_0 = arith.constant 0 : i32
    %c0_i32_1 = arith.constant 0 : i32
    return %c0_i32, %c0_i32_0 : i32, i32
  }
  func.func @transform_4(%arg0: i32) -> (i32, i32) {
    %c0_i32 = arith.constant 0 : i32
    %c0_i32_0 = arith.constant 0 : i32
    %c0_i32_1 = arith.constant 0 : i32
    return %c0_i32, %c0_i32_0 : i32, i32
  }
  func.func @transform_5(%arg0: i32) -> (i32, i32, i32) {
    %c0_i32 = arith.constant 0 : i32
    %c0_i32_0 = arith.constant 0 : i32
    %c0_i32_1 = arith.constant 0 : i32
    %c0_i32_2 = arith.constant 0 : i32
    return %c0_i32, %c0_i32_0, %c0_i32_1 : i32, i32, i32
  }
}

module attributes {stable_mosaic.version = 11 : i64} {
  func.func @_phases_bn_kernel(%arg0: i32, %arg1: memref<1x400x32xf32, #tpu.memory_space<vmem>>, %arg2: memref<1x16x400xf32, #tpu.memory_space<vmem>>, %arg3: memref<16x1xf32, #tpu.memory_space<vmem>>, %arg4: memref<16x1xf32, #tpu.memory_space<vmem>>, %arg5: memref<16x1xf32, #tpu.memory_space<vmem>>, %arg6: memref<1x16x32xf32, #tpu.memory_space<vmem>>) attributes {dimension_semantics = [#tpu.dimension_semantics<arbitrary>], iteration_bounds = array<i64: 1>, scalar_prefetch = 0 : i64, scratch_operands = 0 : i64, tpu.core_type = #tpu.core_type<tc>, window_params = [{pipeline_mode = #tpu.pipeline_mode<synchronous>, transform_indices = @transform_0, window_bounds = array<i64: 1, 400, 32>}, {pipeline_mode = #tpu.pipeline_mode<synchronous>, transform_indices = @transform_1, window_bounds = array<i64: 1, 16, 400>}, {pipeline_mode = #tpu.pipeline_mode<synchronous>, transform_indices = @transform_2, window_bounds = array<i64: 16, 1>}, {pipeline_mode = #tpu.pipeline_mode<synchronous>, transform_indices = @transform_3, window_bounds = array<i64: 16, 1>}, {pipeline_mode = #tpu.pipeline_mode<synchronous>, transform_indices = @transform_4, window_bounds = array<i64: 16, 1>}, {pipeline_mode = #tpu.pipeline_mode<synchronous>, transform_indices = @transform_5, window_bounds = array<i64: 1, 16, 32>}]} {
    %c0 = arith.constant 0 : index
    %c0_0 = arith.constant 0 : index
    %c0_1 = arith.constant 0 : index
    %0 = vector.load %arg2[%c0, %c0_0, %c0_1] : memref<1x16x400xf32, #tpu.memory_space<vmem>>, vector<1x16x400xf32>
    %1 = vector.shape_cast %0 : vector<1x16x400xf32> to vector<16x400xf32>
    %c0_2 = arith.constant 0 : index
    %c0_3 = arith.constant 0 : index
    %c0_4 = arith.constant 0 : index
    %2 = vector.load %arg1[%c0_2, %c0_3, %c0_4] : memref<1x400x32xf32, #tpu.memory_space<vmem>>, vector<1x400x32xf32>
    %3 = vector.shape_cast %2 : vector<1x400x32xf32> to vector<400x32xf32>
    %cst = arith.constant dense<0.000000e+00> : vector<16x32xf32>
    %4 = tpu.matmul %1, %3, %cst {dimension_numbers = #tpu.dot_dimension_numbers<[1], [0], [0], [1], [0, 0, 1, 1], [], []>} : vector<16x400xf32>, vector<400x32xf32>, vector<16x32xf32> -> vector<16x32xf32>
    %c0_5 = arith.constant 0 : index
    %c0_6 = arith.constant 0 : index
    %5 = vector.load %arg3[%c0_5, %c0_6] : memref<16x1xf32, #tpu.memory_space<vmem>>, vector<16x1xf32>
    %6 = vector.broadcast %5 : vector<16x1xf32> to vector<16x32xf32>
    %7 = arith.addf %4, %6 : vector<16x32xf32>
    %cst_7 = arith.constant dense<0.000000e+00> : vector<16xf32>
    %8 = vector.multi_reduction <add>, %7, %cst_7 [1] : vector<16x32xf32> to vector<16xf32>
    %9 = vector.shape_cast %8 : vector<16xf32> to vector<16x1xf32>
    %cst_8 = arith.constant 0.000000e+00 : f32
    %10 = vector.broadcast %cst_8 : f32 to vector<16x1xf32>
    %11 = arith.addf %10, %9 : vector<16x1xf32>
    %cst_9 = arith.constant 3.200000e+01 : f32
    %12 = vector.broadcast %cst_9 : f32 to vector<16x1xf32>
    %13 = arith.divf %11, %12 : vector<16x1xf32>
    %14 = vector.broadcast %13 : vector<16x1xf32> to vector<16x32xf32>
    %15 = arith.subf %7, %14 : vector<16x32xf32>
    %16 = arith.mulf %15, %15 : vector<16x32xf32>
    %cst_10 = arith.constant dense<0.000000e+00> : vector<16xf32>
    %17 = vector.multi_reduction <add>, %16, %cst_10 [1] : vector<16x32xf32> to vector<16xf32>
    %18 = vector.shape_cast %17 : vector<16xf32> to vector<16x1xf32>
    %cst_11 = arith.constant 0.000000e+00 : f32
    %19 = vector.broadcast %cst_11 : f32 to vector<16x1xf32>
    %20 = arith.addf %19, %18 : vector<16x1xf32>
    %cst_12 = arith.constant 3.200000e+01 : f32
    %21 = vector.broadcast %cst_12 : f32 to vector<16x1xf32>
    %22 = arith.divf %20, %21 : vector<16x1xf32>
    %cst_13 = arith.constant 9.99999974E-6 : f32
    %23 = vector.broadcast %cst_13 : f32 to vector<16x1xf32>
    %24 = arith.addf %22, %23 : vector<16x1xf32>
    %25 = math.rsqrt %24 : vector<16x1xf32>
    %c0_14 = arith.constant 0 : index
    %c0_15 = arith.constant 0 : index
    %26 = vector.load %arg4[%c0_14, %c0_15] : memref<16x1xf32, #tpu.memory_space<vmem>>, vector<16x1xf32>
    %27 = arith.mulf %25, %26 : vector<16x1xf32>
    %c0_16 = arith.constant 0 : index
    %c0_17 = arith.constant 0 : index
    %28 = vector.load %arg5[%c0_16, %c0_17] : memref<16x1xf32, #tpu.memory_space<vmem>>, vector<16x1xf32>
    %29 = arith.mulf %13, %27 : vector<16x1xf32>
    %30 = arith.subf %28, %29 : vector<16x1xf32>
    %31 = vector.broadcast %27 : vector<16x1xf32> to vector<16x32xf32>
    %32 = arith.mulf %7, %31 : vector<16x32xf32>
    %33 = vector.broadcast %30 : vector<16x1xf32> to vector<16x32xf32>
    %34 = arith.addf %32, %33 : vector<16x32xf32>
    %cst_18 = arith.constant 0.000000e+00 : f32
    %35 = vector.broadcast %cst_18 : f32 to vector<16x32xf32>
    %36 = arith.maximumf %34, %35 : vector<16x32xf32>
    %c0_19 = arith.constant 0 : index
    %c0_20 = arith.constant 0 : index
    %c0_21 = arith.constant 0 : index
    %37 = vector.load %arg6[%c0_19, %c0_20, %c0_21] : memref<1x16x32xf32, #tpu.memory_space<vmem>>, vector<1x16x32xf32>
    %38 = vector.shape_cast %37 : vector<1x16x32xf32> to vector<16x32xf32>
    %39 = vector.shape_cast %36 : vector<16x32xf32> to vector<1x16x32xf32>
    tpu.vector_store %arg6[%c0_19, %c0_20, %c0_21], %39 {strides = array<i32>} : memref<1x16x32xf32, #tpu.memory_space<vmem>>, vector<1x16x32xf32>,
    return
  }
  func.func @transform_0(%arg0: i32) -> (i32, i32, i32) {
    %c0_i32 = arith.constant 0 : i32
    %c0_i32_0 = arith.constant 0 : i32
    %c0_i32_1 = arith.constant 0 : i32
    %c0_i32_2 = arith.constant 0 : i32
    return %c0_i32, %c0_i32_0, %c0_i32_1 : i32, i32, i32
  }
  func.func @transform_1(%arg0: i32) -> (i32, i32, i32) {
    %c0_i32 = arith.constant 0 : i32
    %c0_i32_0 = arith.constant 0 : i32
    %c0_i32_1 = arith.constant 0 : i32
    %c0_i32_2 = arith.constant 0 : i32
    return %c0_i32, %c0_i32_0, %c0_i32_1 : i32, i32, i32
  }
  func.func @transform_2(%arg0: i32) -> (i32, i32) {
    %c0_i32 = arith.constant 0 : i32
    %c0_i32_0 = arith.constant 0 : i32
    %c0_i32_1 = arith.constant 0 : i32
    return %c0_i32, %c0_i32_0 : i32, i32
  }
  func.func @transform_3(%arg0: i32) -> (i32, i32) {
    %c0_i32 = arith.constant 0 : i32
    %c0_i32_0 = arith.constant 0 : i32
    %c0_i32_1 = arith.constant 0 : i32
    return %c0_i32, %c0_i32_0 : i32, i32
  }
  func.func @transform_4(%arg0: i32) -> (i32, i32) {
    %c0_i32 = arith.constant 0 : i32
    %c0_i32_0 = arith.constant 0 : i32
    %c0_i32_1 = arith.constant 0 : i32
    return %c0_i32, %c0_i32_0 : i32, i32
  }
  func.func @transform_5(%arg0: i32) -> (i32, i32, i32) {
    %c0_i32 = arith.constant 0 : i32
    %c0_i32_0 = arith.constant 0 : i32
    %c0_i32_1 = arith.constant 0 : i32
    %c0_i32_2 = arith.constant 0 : i32
    return %c0_i32, %c0_i32_0, %c0_i32_1 : i32, i32, i32
  }
}

module attributes {stable_mosaic.version = 11 : i64} {
  func.func @_enc_head_kernel(%arg0: i32, %arg1: memref<144x8xf32, #tpu.memory_space<vmem>>, %arg2: memref<16x144xf32, #tpu.memory_space<vmem>>, %arg3: memref<16x1xf32, #tpu.memory_space<vmem>>, %arg4: memref<16x1xf32, #tpu.memory_space<vmem>>, %arg5: memref<16x1xf32, #tpu.memory_space<vmem>>, %arg6: memref<8x8xf32, #tpu.memory_space<vmem>>, %arg7: memref<8x8xf32, #tpu.memory_space<vmem>>, %arg8: memref<1x1xf32, #tpu.memory_space<vmem>>) attributes {dimension_semantics = [#tpu.dimension_semantics<arbitrary>], iteration_bounds = array<i64: 1>, scalar_prefetch = 0 : i64, scratch_operands = 0 : i64, tpu.core_type = #tpu.core_type<tc>, window_params = [{pipeline_mode = #tpu.pipeline_mode<synchronous>, transform_indices = @transform_0, window_bounds = array<i64: 144, 8>}, {pipeline_mode = #tpu.pipeline_mode<synchronous>, transform_indices = @transform_1, window_bounds = array<i64: 16, 144>}, {pipeline_mode = #tpu.pipeline_mode<synchronous>, transform_indices = @transform_2, window_bounds = array<i64: 16, 1>}, {pipeline_mode = #tpu.pipeline_mode<synchronous>, transform_indices = @transform_3, window_bounds = array<i64: 16, 1>}, {pipeline_mode = #tpu.pipeline_mode<synchronous>, transform_indices = @transform_4, window_bounds = array<i64: 16, 1>}, {pipeline_mode = #tpu.pipeline_mode<synchronous>, transform_indices = @transform_5, window_bounds = array<i64: 8, 8>}, {pipeline_mode = #tpu.pipeline_mode<synchronous>, transform_indices = @transform_6, window_bounds = array<i64: 8, 8>}, {pipeline_mode = #tpu.pipeline_mode<synchronous>, transform_indices = @transform_7, window_bounds = array<i64: 1, 1>}]} {
    %c0 = arith.constant 0 : index
    %c0_0 = arith.constant 0 : index
    %0 = vector.load %arg2[%c0, %c0_0] : memref<16x144xf32, #tpu.memory_space<vmem>>, vector<16x144xf32>
    %c0_1 = arith.constant 0 : index
    %c0_2 = arith.constant 0 : index
    %1 = vector.load %arg1[%c0_1, %c0_2] : memref<144x8xf32, #tpu.memory_space<vmem>>, vector<144x8xf32>
    %cst = arith.constant dense<0.000000e+00> : vector<16x8xf32>
    %2 = tpu.matmul %0, %1, %cst {dimension_numbers = #tpu.dot_dimension_numbers<[1], [0], [0], [1], [0, 0, 1, 1], [], []>} : vector<16x144xf32>, vector<144x8xf32>, vector<16x8xf32> -> vector<16x8xf32>
    %c0_3 = arith.constant 0 : index
    %c0_4 = arith.constant 0 : index
    %3 = vector.load %arg3[%c0_3, %c0_4] : memref<16x1xf32, #tpu.memory_space<vmem>>, vector<16x1xf32>
    %4 = vector.broadcast %3 : vector<16x1xf32> to vector<16x8xf32>
    %5 = arith.addf %2, %4 : vector<16x8xf32>
    %cst_5 = arith.constant dense<0.000000e+00> : vector<16xf32>
    %6 = vector.multi_reduction <add>, %5, %cst_5 [1] : vector<16x8xf32> to vector<16xf32>
    %7 = vector.shape_cast %6 : vector<16xf32> to vector<16x1xf32>
    %cst_6 = arith.constant 8.000000e+00 : f32
    %8 = vector.broadcast %cst_6 : f32 to vector<16x1xf32>
    %9 = arith.divf %7, %8 : vector<16x1xf32>
    %10 = vector.broadcast %9 : vector<16x1xf32> to vector<16x8xf32>
    %11 = arith.subf %5, %10 : vector<16x8xf32>
    %12 = arith.mulf %11, %11 : vector<16x8xf32>
    %cst_7 = arith.constant dense<0.000000e+00> : vector<16xf32>
    %13 = vector.multi_reduction <add>, %12, %cst_7 [1] : vector<16x8xf32> to vector<16xf32>
    %14 = vector.shape_cast %13 : vector<16xf32> to vector<16x1xf32>
    %cst_8 = arith.constant 8.000000e+00 : f32
    %15 = vector.broadcast %cst_8 : f32 to vector<16x1xf32>
    %16 = arith.divf %14, %15 : vector<16x1xf32>
    %17 = vector.broadcast %9 : vector<16x1xf32> to vector<16x8xf32>
    %18 = arith.subf %5, %17 : vector<16x8xf32>
    %cst_9 = arith.constant 9.99999974E-6 : f32
    %19 = vector.broadcast %cst_9 : f32 to vector<16x1xf32>
    %20 = arith.addf %16, %19 : vector<16x1xf32>
    %21 = math.rsqrt %20 : vector<16x1xf32>
    %22 = vector.broadcast %21 : vector<16x1xf32> to vector<16x8xf32>
    %23 = arith.mulf %18, %22 : vector<16x8xf32>
    %c0_10 = arith.constant 0 : index
    %c0_11 = arith.constant 0 : index
    %24 = vector.load %arg4[%c0_10, %c0_11] : memref<16x1xf32, #tpu.memory_space<vmem>>, vector<16x1xf32>
    %25 = vector.broadcast %24 : vector<16x1xf32> to vector<16x8xf32>
    %26 = arith.mulf %23, %25 : vector<16x8xf32>
    %c0_12 = arith.constant 0 : index
    %c0_13 = arith.constant 0 : index
    %27 = vector.load %arg5[%c0_12, %c0_13] : memref<16x1xf32, #tpu.memory_space<vmem>>, vector<16x1xf32>
    %28 = vector.broadcast %27 : vector<16x1xf32> to vector<16x8xf32>
    %29 = arith.addf %26, %28 : vector<16x8xf32>
    %30 = vector.extract_strided_slice %29 {offsets = [0, 0], sizes = [8, 8], strides = [1, 1]} : vector<16x8xf32> to vector<8x8xf32>
    %31 = vector.extract_strided_slice %29 {offsets = [8, 0], sizes = [8, 8], strides = [1, 1]} : vector<16x8xf32> to vector<8x8xf32>
    %32 = math.exp %31 : vector<8x8xf32>
    %33 = arith.mulf %30, %30 : vector<8x8xf32>
    %34 = arith.addf %32, %33 : vector<8x8xf32>
    %cst_14 = arith.constant 1.000000e+00 : f32
    %35 = vector.broadcast %cst_14 : f32 to vector<8x8xf32>
    %36 = arith.subf %34, %35 : vector<8x8xf32>
    %37 = arith.subf %36, %31 : vector<8x8xf32>
    %cst_15 = arith.constant 5.000000e-01 : f32
    %38 = vector.broadcast %cst_15 : f32 to vector<8x8xf32>
    %39 = arith.mulf %38, %37 : vector<8x8xf32>
    %cst_16 = arith.constant dense<0.000000e+00> : vector<8xf32>
    %40 = vector.multi_reduction <add>, %39, %cst_16 [1] : vector<8x8xf32> to vector<8xf32>
    %41 = vector.shape_cast %40 : vector<8xf32> to vector<8x1xf32>
    %cst_17 = arith.constant dense<0.000000e+00> : vector<1xf32>
    %42 = vector.multi_reduction <add>, %41, %cst_17 [0] : vector<8x1xf32> to vector<1xf32>
    %43 = vector.shape_cast %42 : vector<1xf32> to vector<1x1xf32>
    %cst_18 = arith.constant 8.000000e+00 : f32
    %44 = vector.broadcast %cst_18 : f32 to vector<1x1xf32>
    %45 = arith.divf %43, %44 : vector<1x1xf32>
    %c0_19 = arith.constant 0 : index
    %c0_20 = arith.constant 0 : index
    %46 = vector.load %arg8[%c0_19, %c0_20] : memref<1x1xf32, #tpu.memory_space<vmem>>, vector<1x1xf32>
    tpu.vector_store %arg8[%c0_19, %c0_20], %45 {strides = array<i32>} : memref<1x1xf32, #tpu.memory_space<vmem>>, vector<1x1xf32>,
    %cst_21 = arith.constant 5.000000e-01 : f32
    %47 = vector.broadcast %cst_21 : f32 to vector<8x8xf32>
    %48 = arith.mulf %47, %31 : vector<8x8xf32>
    %49 = math.exp %48 : vector<8x8xf32>
    %c0_22 = arith.constant 0 : index
    %c0_23 = arith.constant 0 : index
    %50 = vector.load %arg6[%c0_22, %c0_23] : memref<8x8xf32, #tpu.memory_space<vmem>>, vector<8x8xf32>
    %51 = arith.mulf %49, %50 : vector<8x8xf32>
    %52 = arith.addf %30, %51 : vector<8x8xf32>
    %c0_24 = arith.constant 0 : index
    %c0_25 = arith.constant 0 : index
    %53 = vector.load %arg7[%c0_24, %c0_25] : memref<8x8xf32, #tpu.memory_space<vmem>>, vector<8x8xf32>
    tpu.vector_store %arg7[%c0_24, %c0_25], %52 {strides = array<i32>} : memref<8x8xf32, #tpu.memory_space<vmem>>, vector<8x8xf32>,
    return
  }
  func.func @transform_0(%arg0: i32) -> (i32, i32) {
    %c0_i32 = arith.constant 0 : i32
    %c0_i32_0 = arith.constant 0 : i32
    %c0_i32_1 = arith.constant 0 : i32
    return %c0_i32, %c0_i32_0 : i32, i32
  }
  func.func @transform_1(%arg0: i32) -> (i32, i32) {
    %c0_i32 = arith.constant 0 : i32
    %c0_i32_0 = arith.constant 0 : i32
    %c0_i32_1 = arith.constant 0 : i32
    return %c0_i32, %c0_i32_0 : i32, i32
  }
  func.func @transform_2(%arg0: i32) -> (i32, i32) {
    %c0_i32 = arith.constant 0 : i32
    %c0_i32_0 = arith.constant 0 : i32
    %c0_i32_1 = arith.constant 0 : i32
    return %c0_i32, %c0_i32_0 : i32, i32
  }
  func.func @transform_3(%arg0: i32) -> (i32, i32) {
    %c0_i32 = arith.constant 0 : i32
    %c0_i32_0 = arith.constant 0 : i32
    %c0_i32_1 = arith.constant 0 : i32
    return %c0_i32, %c0_i32_0 : i32, i32
  }
  func.func @transform_4(%arg0: i32) -> (i32, i32) {
    %c0_i32 = arith.constant 0 : i32
    %c0_i32_0 = arith.constant 0 : i32
    %c0_i32_1 = arith.constant 0 : i32
    return %c0_i32, %c0_i32_0 : i32, i32
  }
  func.func @transform_5(%arg0: i32) -> (i32, i32) {
    %c0_i32 = arith.constant 0 : i32
    %c0_i32_0 = arith.constant 0 : i32
    %c0_i32_1 = arith.constant 0 : i32
    return %c0_i32, %c0_i32_0 : i32, i32
  }
  func.func @transform_6(%arg0: i32) -> (i32, i32) {
    %c0_i32 = arith.constant 0 : i32
    %c0_i32_0 = arith.constant 0 : i32
    %c0_i32_1 = arith.constant 0 : i32
    return %c0_i32, %c0_i32_0 : i32, i32
  }
  func.func @transform_7(%arg0: i32) -> (i32, i32) {
    %c0_i32 = arith.constant 0 : i32
    %c0_i32_0 = arith.constant 0 : i32
    %c0_i32_1 = arith.constant 0 : i32
    return %c0_i32, %c0_i32_0 : i32, i32
  }
}

module attributes {stable_mosaic.version = 11 : i64} {
  func.func @_phases_bn_kernel(%arg0: i32, %arg1: memref<1x72x32xf32, #tpu.memory_space<vmem>>, %arg2: memref<1x16x72xf32, #tpu.memory_space<vmem>>, %arg3: memref<16x1xf32, #tpu.memory_space<vmem>>, %arg4: memref<16x1xf32, #tpu.memory_space<vmem>>, %arg5: memref<16x1xf32, #tpu.memory_space<vmem>>, %arg6: memref<1x16x32xf32, #tpu.memory_space<vmem>>) attributes {dimension_semantics = [#tpu.dimension_semantics<arbitrary>], iteration_bounds = array<i64: 1>, scalar_prefetch = 0 : i64, scratch_operands = 0 : i64, tpu.core_type = #tpu.core_type<tc>, window_params = [{pipeline_mode = #tpu.pipeline_mode<synchronous>, transform_indices = @transform_0, window_bounds = array<i64: 1, 72, 32>}, {pipeline_mode = #tpu.pipeline_mode<synchronous>, transform_indices = @transform_1, window_bounds = array<i64: 1, 16, 72>}, {pipeline_mode = #tpu.pipeline_mode<synchronous>, transform_indices = @transform_2, window_bounds = array<i64: 16, 1>}, {pipeline_mode = #tpu.pipeline_mode<synchronous>, transform_indices = @transform_3, window_bounds = array<i64: 16, 1>}, {pipeline_mode = #tpu.pipeline_mode<synchronous>, transform_indices = @transform_4, window_bounds = array<i64: 16, 1>}, {pipeline_mode = #tpu.pipeline_mode<synchronous>, transform_indices = @transform_5, window_bounds = array<i64: 1, 16, 32>}]} {
    %c0 = arith.constant 0 : index
    %c0_0 = arith.constant 0 : index
    %c0_1 = arith.constant 0 : index
    %0 = vector.load %arg2[%c0, %c0_0, %c0_1] : memref<1x16x72xf32, #tpu.memory_space<vmem>>, vector<1x16x72xf32>
    %1 = vector.shape_cast %0 : vector<1x16x72xf32> to vector<16x72xf32>
    %c0_2 = arith.constant 0 : index
    %c0_3 = arith.constant 0 : index
    %c0_4 = arith.constant 0 : index
    %2 = vector.load %arg1[%c0_2, %c0_3, %c0_4] : memref<1x72x32xf32, #tpu.memory_space<vmem>>, vector<1x72x32xf32>
    %3 = vector.shape_cast %2 : vector<1x72x32xf32> to vector<72x32xf32>
    %cst = arith.constant dense<0.000000e+00> : vector<16x32xf32>
    %4 = tpu.matmul %1, %3, %cst {dimension_numbers = #tpu.dot_dimension_numbers<[1], [0], [0], [1], [0, 0, 1, 1], [], []>} : vector<16x72xf32>, vector<72x32xf32>, vector<16x32xf32> -> vector<16x32xf32>
    %c0_5 = arith.constant 0 : index
    %c0_6 = arith.constant 0 : index
    %5 = vector.load %arg3[%c0_5, %c0_6] : memref<16x1xf32, #tpu.memory_space<vmem>>, vector<16x1xf32>
    %6 = vector.broadcast %5 : vector<16x1xf32> to vector<16x32xf32>
    %7 = arith.addf %4, %6 : vector<16x32xf32>
    %cst_7 = arith.constant dense<0.000000e+00> : vector<16xf32>
    %8 = vector.multi_reduction <add>, %7, %cst_7 [1] : vector<16x32xf32> to vector<16xf32>
    %9 = vector.shape_cast %8 : vector<16xf32> to vector<16x1xf32>
    %cst_8 = arith.constant 0.000000e+00 : f32
    %10 = vector.broadcast %cst_8 : f32 to vector<16x1xf32>
    %11 = arith.addf %10, %9 : vector<16x1xf32>
    %cst_9 = arith.constant 3.200000e+01 : f32
    %12 = vector.broadcast %cst_9 : f32 to vector<16x1xf32>
    %13 = arith.divf %11, %12 : vector<16x1xf32>
    %14 = vector.broadcast %13 : vector<16x1xf32> to vector<16x32xf32>
    %15 = arith.subf %7, %14 : vector<16x32xf32>
    %16 = arith.mulf %15, %15 : vector<16x32xf32>
    %cst_10 = arith.constant dense<0.000000e+00> : vector<16xf32>
    %17 = vector.multi_reduction <add>, %16, %cst_10 [1] : vector<16x32xf32> to vector<16xf32>
    %18 = vector.shape_cast %17 : vector<16xf32> to vector<16x1xf32>
    %cst_11 = arith.constant 0.000000e+00 : f32
    %19 = vector.broadcast %cst_11 : f32 to vector<16x1xf32>
    %20 = arith.addf %19, %18 : vector<16x1xf32>
    %cst_12 = arith.constant 3.200000e+01 : f32
    %21 = vector.broadcast %cst_12 : f32 to vector<16x1xf32>
    %22 = arith.divf %20, %21 : vector<16x1xf32>
    %cst_13 = arith.constant 9.99999974E-6 : f32
    %23 = vector.broadcast %cst_13 : f32 to vector<16x1xf32>
    %24 = arith.addf %22, %23 : vector<16x1xf32>
    %25 = math.rsqrt %24 : vector<16x1xf32>
    %c0_14 = arith.constant 0 : index
    %c0_15 = arith.constant 0 : index
    %26 = vector.load %arg4[%c0_14, %c0_15] : memref<16x1xf32, #tpu.memory_space<vmem>>, vector<16x1xf32>
    %27 = arith.mulf %25, %26 : vector<16x1xf32>
    %c0_16 = arith.constant 0 : index
    %c0_17 = arith.constant 0 : index
    %28 = vector.load %arg5[%c0_16, %c0_17] : memref<16x1xf32, #tpu.memory_space<vmem>>, vector<16x1xf32>
    %29 = arith.mulf %13, %27 : vector<16x1xf32>
    %30 = arith.subf %28, %29 : vector<16x1xf32>
    %31 = vector.broadcast %27 : vector<16x1xf32> to vector<16x32xf32>
    %32 = arith.mulf %7, %31 : vector<16x32xf32>
    %33 = vector.broadcast %30 : vector<16x1xf32> to vector<16x32xf32>
    %34 = arith.addf %32, %33 : vector<16x32xf32>
    %cst_18 = arith.constant 0.000000e+00 : f32
    %35 = vector.broadcast %cst_18 : f32 to vector<16x32xf32>
    %36 = arith.maximumf %34, %35 : vector<16x32xf32>
    %c0_19 = arith.constant 0 : index
    %c0_20 = arith.constant 0 : index
    %c0_21 = arith.constant 0 : index
    %37 = vector.load %arg6[%c0_19, %c0_20, %c0_21] : memref<1x16x32xf32, #tpu.memory_space<vmem>>, vector<1x16x32xf32>
    %38 = vector.shape_cast %37 : vector<1x16x32xf32> to vector<16x32xf32>
    %39 = vector.shape_cast %36 : vector<16x32xf32> to vector<1x16x32xf32>
    tpu.vector_store %arg6[%c0_19, %c0_20, %c0_21], %39 {strides = array<i32>} : memref<1x16x32xf32, #tpu.memory_space<vmem>>, vector<1x16x32xf32>,
    return
  }
  func.func @transform_0(%arg0: i32) -> (i32, i32, i32) {
    %c0_i32 = arith.constant 0 : i32
    %c0_i32_0 = arith.constant 0 : i32
    %c0_i32_1 = arith.constant 0 : i32
    %c0_i32_2 = arith.constant 0 : i32
    return %c0_i32, %c0_i32_0, %c0_i32_1 : i32, i32, i32
  }
  func.func @transform_1(%arg0: i32) -> (i32, i32, i32) {
    %c0_i32 = arith.constant 0 : i32
    %c0_i32_0 = arith.constant 0 : i32
    %c0_i32_1 = arith.constant 0 : i32
    %c0_i32_2 = arith.constant 0 : i32
    return %c0_i32, %c0_i32_0, %c0_i32_1 : i32, i32, i32
  }
  func.func @transform_2(%arg0: i32) -> (i32, i32) {
    %c0_i32 = arith.constant 0 : i32
    %c0_i32_0 = arith.constant 0 : i32
    %c0_i32_1 = arith.constant 0 : i32
    return %c0_i32, %c0_i32_0 : i32, i32
  }
  func.func @transform_3(%arg0: i32) -> (i32, i32) {
    %c0_i32 = arith.constant 0 : i32
    %c0_i32_0 = arith.constant 0 : i32
    %c0_i32_1 = arith.constant 0 : i32
    return %c0_i32, %c0_i32_0 : i32, i32
  }
  func.func @transform_4(%arg0: i32) -> (i32, i32) {
    %c0_i32 = arith.constant 0 : i32
    %c0_i32_0 = arith.constant 0 : i32
    %c0_i32_1 = arith.constant 0 : i32
    return %c0_i32, %c0_i32_0 : i32, i32
  }
  func.func @transform_5(%arg0: i32) -> (i32, i32, i32) {
    %c0_i32 = arith.constant 0 : i32
    %c0_i32_0 = arith.constant 0 : i32
    %c0_i32_1 = arith.constant 0 : i32
    %c0_i32_2 = arith.constant 0 : i32
    return %c0_i32, %c0_i32_0, %c0_i32_1 : i32, i32, i32
  }
}

module attributes {stable_mosaic.version = 11 : i64} {
  func.func @_phases_bn_kernel(%arg0: i32, %arg1: memref<1x400x128xf32, #tpu.memory_space<vmem>>, %arg2: memref<1x16x400xf32, #tpu.memory_space<vmem>>, %arg3: memref<16x1xf32, #tpu.memory_space<vmem>>, %arg4: memref<16x1xf32, #tpu.memory_space<vmem>>, %arg5: memref<16x1xf32, #tpu.memory_space<vmem>>, %arg6: memref<1x16x128xf32, #tpu.memory_space<vmem>>) attributes {dimension_semantics = [#tpu.dimension_semantics<arbitrary>], iteration_bounds = array<i64: 1>, scalar_prefetch = 0 : i64, scratch_operands = 0 : i64, tpu.core_type = #tpu.core_type<tc>, window_params = [{pipeline_mode = #tpu.pipeline_mode<synchronous>, transform_indices = @transform_0, window_bounds = array<i64: 1, 400, 128>}, {pipeline_mode = #tpu.pipeline_mode<synchronous>, transform_indices = @transform_1, window_bounds = array<i64: 1, 16, 400>}, {pipeline_mode = #tpu.pipeline_mode<synchronous>, transform_indices = @transform_2, window_bounds = array<i64: 16, 1>}, {pipeline_mode = #tpu.pipeline_mode<synchronous>, transform_indices = @transform_3, window_bounds = array<i64: 16, 1>}, {pipeline_mode = #tpu.pipeline_mode<synchronous>, transform_indices = @transform_4, window_bounds = array<i64: 16, 1>}, {pipeline_mode = #tpu.pipeline_mode<synchronous>, transform_indices = @transform_5, window_bounds = array<i64: 1, 16, 128>}]} {
    %c0 = arith.constant 0 : index
    %c0_0 = arith.constant 0 : index
    %c0_1 = arith.constant 0 : index
    %0 = vector.load %arg2[%c0, %c0_0, %c0_1] : memref<1x16x400xf32, #tpu.memory_space<vmem>>, vector<1x16x400xf32>
    %1 = vector.shape_cast %0 : vector<1x16x400xf32> to vector<16x400xf32>
    %c0_2 = arith.constant 0 : index
    %c0_3 = arith.constant 0 : index
    %c0_4 = arith.constant 0 : index
    %2 = vector.load %arg1[%c0_2, %c0_3, %c0_4] : memref<1x400x128xf32, #tpu.memory_space<vmem>>, vector<1x400x128xf32>
    %3 = vector.shape_cast %2 : vector<1x400x128xf32> to vector<400x128xf32>
    %cst = arith.constant dense<0.000000e+00> : vector<16x128xf32>
    %4 = tpu.matmul %1, %3, %cst {dimension_numbers = #tpu.dot_dimension_numbers<[1], [0], [0], [1], [0, 0, 1, 1], [], []>} : vector<16x400xf32>, vector<400x128xf32>, vector<16x128xf32> -> vector<16x128xf32>
    %c0_5 = arith.constant 0 : index
    %c0_6 = arith.constant 0 : index
    %5 = vector.load %arg3[%c0_5, %c0_6] : memref<16x1xf32, #tpu.memory_space<vmem>>, vector<16x1xf32>
    %6 = vector.broadcast %5 : vector<16x1xf32> to vector<16x128xf32>
    %7 = arith.addf %4, %6 : vector<16x128xf32>
    %cst_7 = arith.constant dense<0.000000e+00> : vector<16xf32>
    %8 = vector.multi_reduction <add>, %7, %cst_7 [1] : vector<16x128xf32> to vector<16xf32>
    %9 = vector.shape_cast %8 : vector<16xf32> to vector<16x1xf32>
    %cst_8 = arith.constant 0.000000e+00 : f32
    %10 = vector.broadcast %cst_8 : f32 to vector<16x1xf32>
    %11 = arith.addf %10, %9 : vector<16x1xf32>
    %cst_9 = arith.constant 1.280000e+02 : f32
    %12 = vector.broadcast %cst_9 : f32 to vector<16x1xf32>
    %13 = arith.divf %11, %12 : vector<16x1xf32>
    %14 = vector.broadcast %13 : vector<16x1xf32> to vector<16x128xf32>
    %15 = arith.subf %7, %14 : vector<16x128xf32>
    %16 = arith.mulf %15, %15 : vector<16x128xf32>
    %cst_10 = arith.constant dense<0.000000e+00> : vector<16xf32>
    %17 = vector.multi_reduction <add>, %16, %cst_10 [1] : vector<16x128xf32> to vector<16xf32>
    %18 = vector.shape_cast %17 : vector<16xf32> to vector<16x1xf32>
    %cst_11 = arith.constant 0.000000e+00 : f32
    %19 = vector.broadcast %cst_11 : f32 to vector<16x1xf32>
    %20 = arith.addf %19, %18 : vector<16x1xf32>
    %cst_12 = arith.constant 1.280000e+02 : f32
    %21 = vector.broadcast %cst_12 : f32 to vector<16x1xf32>
    %22 = arith.divf %20, %21 : vector<16x1xf32>
    %cst_13 = arith.constant 9.99999974E-6 : f32
    %23 = vector.broadcast %cst_13 : f32 to vector<16x1xf32>
    %24 = arith.addf %22, %23 : vector<16x1xf32>
    %25 = math.rsqrt %24 : vector<16x1xf32>
    %c0_14 = arith.constant 0 : index
    %c0_15 = arith.constant 0 : index
    %26 = vector.load %arg4[%c0_14, %c0_15] : memref<16x1xf32, #tpu.memory_space<vmem>>, vector<16x1xf32>
    %27 = arith.mulf %25, %26 : vector<16x1xf32>
    %c0_16 = arith.constant 0 : index
    %c0_17 = arith.constant 0 : index
    %28 = vector.load %arg5[%c0_16, %c0_17] : memref<16x1xf32, #tpu.memory_space<vmem>>, vector<16x1xf32>
    %29 = arith.mulf %13, %27 : vector<16x1xf32>
    %30 = arith.subf %28, %29 : vector<16x1xf32>
    %31 = vector.broadcast %27 : vector<16x1xf32> to vector<16x128xf32>
    %32 = arith.mulf %7, %31 : vector<16x128xf32>
    %33 = vector.broadcast %30 : vector<16x1xf32> to vector<16x128xf32>
    %34 = arith.addf %32, %33 : vector<16x128xf32>
    %cst_18 = arith.constant 0.000000e+00 : f32
    %35 = vector.broadcast %cst_18 : f32 to vector<16x128xf32>
    %36 = arith.maximumf %34, %35 : vector<16x128xf32>
    %c0_19 = arith.constant 0 : index
    %c0_20 = arith.constant 0 : index
    %c0_21 = arith.constant 0 : index
    %37 = vector.load %arg6[%c0_19, %c0_20, %c0_21] : memref<1x16x128xf32, #tpu.memory_space<vmem>>, vector<1x16x128xf32>
    %38 = vector.shape_cast %37 : vector<1x16x128xf32> to vector<16x128xf32>
    %39 = vector.shape_cast %36 : vector<16x128xf32> to vector<1x16x128xf32>
    tpu.vector_store %arg6[%c0_19, %c0_20, %c0_21], %39 {strides = array<i32>} : memref<1x16x128xf32, #tpu.memory_space<vmem>>, vector<1x16x128xf32>,
    return
  }
  func.func @transform_0(%arg0: i32) -> (i32, i32, i32) {
    %c0_i32 = arith.constant 0 : i32
    %c0_i32_0 = arith.constant 0 : i32
    %c0_i32_1 = arith.constant 0 : i32
    %c0_i32_2 = arith.constant 0 : i32
    return %c0_i32, %c0_i32_0, %c0_i32_1 : i32, i32, i32
  }
  func.func @transform_1(%arg0: i32) -> (i32, i32, i32) {
    %c0_i32 = arith.constant 0 : i32
    %c0_i32_0 = arith.constant 0 : i32
    %c0_i32_1 = arith.constant 0 : i32
    %c0_i32_2 = arith.constant 0 : i32
    return %c0_i32, %c0_i32_0, %c0_i32_1 : i32, i32, i32
  }
  func.func @transform_2(%arg0: i32) -> (i32, i32) {
    %c0_i32 = arith.constant 0 : i32
    %c0_i32_0 = arith.constant 0 : i32
    %c0_i32_1 = arith.constant 0 : i32
    return %c0_i32, %c0_i32_0 : i32, i32
  }
  func.func @transform_3(%arg0: i32) -> (i32, i32) {
    %c0_i32 = arith.constant 0 : i32
    %c0_i32_0 = arith.constant 0 : i32
    %c0_i32_1 = arith.constant 0 : i32
    return %c0_i32, %c0_i32_0 : i32, i32
  }
  func.func @transform_4(%arg0: i32) -> (i32, i32) {
    %c0_i32 = arith.constant 0 : i32
    %c0_i32_0 = arith.constant 0 : i32
    %c0_i32_1 = arith.constant 0 : i32
    return %c0_i32, %c0_i32_0 : i32, i32
  }
  func.func @transform_5(%arg0: i32) -> (i32, i32, i32) {
    %c0_i32 = arith.constant 0 : i32
    %c0_i32_0 = arith.constant 0 : i32
    %c0_i32_1 = arith.constant 0 : i32
    %c0_i32_2 = arith.constant 0 : i32
    return %c0_i32, %c0_i32_0, %c0_i32_1 : i32, i32, i32
  }
}

module attributes {stable_mosaic.version = 11 : i64} {
  func.func @_phases_bn_kernel(%arg0: i32, %arg1: memref<4x64x128xf32, #tpu.memory_space<vmem>>, %arg2: memref<4x16x64xf32, #tpu.memory_space<vmem>>, %arg3: memref<16x1xf32, #tpu.memory_space<vmem>>, %arg4: memref<16x1xf32, #tpu.memory_space<vmem>>, %arg5: memref<16x1xf32, #tpu.memory_space<vmem>>, %arg6: memref<4x16x128xf32, #tpu.memory_space<vmem>>) attributes {dimension_semantics = [#tpu.dimension_semantics<arbitrary>], iteration_bounds = array<i64: 1>, scalar_prefetch = 0 : i64, scratch_operands = 0 : i64, tpu.core_type = #tpu.core_type<tc>, window_params = [{pipeline_mode = #tpu.pipeline_mode<synchronous>, transform_indices = @transform_0, window_bounds = array<i64: 4, 64, 128>}, {pipeline_mode = #tpu.pipeline_mode<synchronous>, transform_indices = @transform_1, window_bounds = array<i64: 4, 16, 64>}, {pipeline_mode = #tpu.pipeline_mode<synchronous>, transform_indices = @transform_2, window_bounds = array<i64: 16, 1>}, {pipeline_mode = #tpu.pipeline_mode<synchronous>, transform_indices = @transform_3, window_bounds = array<i64: 16, 1>}, {pipeline_mode = #tpu.pipeline_mode<synchronous>, transform_indices = @transform_4, window_bounds = array<i64: 16, 1>}, {pipeline_mode = #tpu.pipeline_mode<synchronous>, transform_indices = @transform_5, window_bounds = array<i64: 4, 16, 128>}]} {
    %c0 = arith.constant 0 : index
    %c0_0 = arith.constant 0 : index
    %c0_1 = arith.constant 0 : index
    %0 = vector.load %arg2[%c0, %c0_0, %c0_1] : memref<4x16x64xf32, #tpu.memory_space<vmem>>, vector<1x16x64xf32>
    %1 = vector.shape_cast %0 : vector<1x16x64xf32> to vector<16x64xf32>
    %c0_2 = arith.constant 0 : index
    %c0_3 = arith.constant 0 : index
    %c0_4 = arith.constant 0 : index
    %2 = vector.load %arg1[%c0_2, %c0_3, %c0_4] : memref<4x64x128xf32, #tpu.memory_space<vmem>>, vector<1x64x128xf32>
    %3 = vector.shape_cast %2 : vector<1x64x128xf32> to vector<64x128xf32>
    %cst = arith.constant dense<0.000000e+00> : vector<16x128xf32>
    %4 = tpu.matmul %1, %3, %cst {dimension_numbers = #tpu.dot_dimension_numbers<[1], [0], [0], [1], [0, 0, 1, 1], [], []>} : vector<16x64xf32>, vector<64x128xf32>, vector<16x128xf32> -> vector<16x128xf32>
    %c0_5 = arith.constant 0 : index
    %c0_6 = arith.constant 0 : index
    %5 = vector.load %arg3[%c0_5, %c0_6] : memref<16x1xf32, #tpu.memory_space<vmem>>, vector<16x1xf32>
    %6 = vector.broadcast %5 : vector<16x1xf32> to vector<16x128xf32>
    %7 = arith.addf %4, %6 : vector<16x128xf32>
    %c1 = arith.constant 1 : index
    %c0_7 = arith.constant 0 : index
    %c0_8 = arith.constant 0 : index
    %8 = vector.load %arg2[%c1, %c0_7, %c0_8] : memref<4x16x64xf32, #tpu.memory_space<vmem>>, vector<1x16x64xf32>
    %9 = vector.shape_cast %8 : vector<1x16x64xf32> to vector<16x64xf32>
    %c1_9 = arith.constant 1 : index
    %c0_10 = arith.constant 0 : index
    %c0_11 = arith.constant 0 : index
    %10 = vector.load %arg1[%c1_9, %c0_10, %c0_11] : memref<4x64x128xf32, #tpu.memory_space<vmem>>, vector<1x64x128xf32>
    %11 = vector.shape_cast %10 : vector<1x64x128xf32> to vector<64x128xf32>
    %cst_12 = arith.constant dense<0.000000e+00> : vector<16x128xf32>
    %12 = tpu.matmul %9, %11, %cst_12 {dimension_numbers = #tpu.dot_dimension_numbers<[1], [0], [0], [1], [0, 0, 1, 1], [], []>} : vector<16x64xf32>, vector<64x128xf32>, vector<16x128xf32> -> vector<16x128xf32>
    %c0_13 = arith.constant 0 : index
    %c0_14 = arith.constant 0 : index
    %13 = vector.load %arg3[%c0_13, %c0_14] : memref<16x1xf32, #tpu.memory_space<vmem>>, vector<16x1xf32>
    %14 = vector.broadcast %13 : vector<16x1xf32> to vector<16x128xf32>
    %15 = arith.addf %12, %14 : vector<16x128xf32>
    %c2 = arith.constant 2 : index
    %c0_15 = arith.constant 0 : index
    %c0_16 = arith.constant 0 : index
    %16 = vector.load %arg2[%c2, %c0_15, %c0_16] : memref<4x16x64xf32, #tpu.memory_space<vmem>>, vector<1x16x64xf32>
    %17 = vector.shape_cast %16 : vector<1x16x64xf32> to vector<16x64xf32>
    %c2_17 = arith.constant 2 : index
    %c0_18 = arith.constant 0 : index
    %c0_19 = arith.constant 0 : index
    %18 = vector.load %arg1[%c2_17, %c0_18, %c0_19] : memref<4x64x128xf32, #tpu.memory_space<vmem>>, vector<1x64x128xf32>
    %19 = vector.shape_cast %18 : vector<1x64x128xf32> to vector<64x128xf32>
    %cst_20 = arith.constant dense<0.000000e+00> : vector<16x128xf32>
    %20 = tpu.matmul %17, %19, %cst_20 {dimension_numbers = #tpu.dot_dimension_numbers<[1], [0], [0], [1], [0, 0, 1, 1], [], []>} : vector<16x64xf32>, vector<64x128xf32>, vector<16x128xf32> -> vector<16x128xf32>
    %c0_21 = arith.constant 0 : index
    %c0_22 = arith.constant 0 : index
    %21 = vector.load %arg3[%c0_21, %c0_22] : memref<16x1xf32, #tpu.memory_space<vmem>>, vector<16x1xf32>
    %22 = vector.broadcast %21 : vector<16x1xf32> to vector<16x128xf32>
    %23 = arith.addf %20, %22 : vector<16x128xf32>
    %c3 = arith.constant 3 : index
    %c0_23 = arith.constant 0 : index
    %c0_24 = arith.constant 0 : index
    %24 = vector.load %arg2[%c3, %c0_23, %c0_24] : memref<4x16x64xf32, #tpu.memory_space<vmem>>, vector<1x16x64xf32>
    %25 = vector.shape_cast %24 : vector<1x16x64xf32> to vector<16x64xf32>
    %c3_25 = arith.constant 3 : index
    %c0_26 = arith.constant 0 : index
    %c0_27 = arith.constant 0 : index
    %26 = vector.load %arg1[%c3_25, %c0_26, %c0_27] : memref<4x64x128xf32, #tpu.memory_space<vmem>>, vector<1x64x128xf32>
    %27 = vector.shape_cast %26 : vector<1x64x128xf32> to vector<64x128xf32>
    %cst_28 = arith.constant dense<0.000000e+00> : vector<16x128xf32>
    %28 = tpu.matmul %25, %27, %cst_28 {dimension_numbers = #tpu.dot_dimension_numbers<[1], [0], [0], [1], [0, 0, 1, 1], [], []>} : vector<16x64xf32>, vector<64x128xf32>, vector<16x128xf32> -> vector<16x128xf32>
    %c0_29 = arith.constant 0 : index
    %c0_30 = arith.constant 0 : index
    %29 = vector.load %arg3[%c0_29, %c0_30] : memref<16x1xf32, #tpu.memory_space<vmem>>, vector<16x1xf32>
    %30 = vector.broadcast %29 : vector<16x1xf32> to vector<16x128xf32>
    %31 = arith.addf %28, %30 : vector<16x128xf32>
    %cst_31 = arith.constant dense<0.000000e+00> : vector<16xf32>
    %32 = vector.multi_reduction <add>, %7, %cst_31 [1] : vector<16x128xf32> to vector<16xf32>
    %33 = vector.shape_cast %32 : vector<16xf32> to vector<16x1xf32>
    %cst_32 = arith.constant dense<0.000000e+00> : vector<16xf32>
    %34 = vector.multi_reduction <add>, %15, %cst_32 [1] : vector<16x128xf32> to vector<16xf32>
    %35 = vector.shape_cast %34 : vector<16xf32> to vector<16x1xf32>
    %cst_33 = arith.constant dense<0.000000e+00> : vector<16xf32>
    %36 = vector.multi_reduction <add>, %23, %cst_33 [1] : vector<16x128xf32> to vector<16xf32>
    %37 = vector.shape_cast %36 : vector<16xf32> to vector<16x1xf32>
    %cst_34 = arith.constant dense<0.000000e+00> : vector<16xf32>
    %38 = vector.multi_reduction <add>, %31, %cst_34 [1] : vector<16x128xf32> to vector<16xf32>
    %39 = vector.shape_cast %38 : vector<16xf32> to vector<16x1xf32>
    %cst_35 = arith.constant 0.000000e+00 : f32
    %40 = vector.broadcast %cst_35 : f32 to vector<16x1xf32>
    %41 = arith.addf %40, %33 : vector<16x1xf32>
    %42 = arith.addf %41, %35 : vector<16x1xf32>
    %43 = arith.addf %42, %37 : vector<16x1xf32>
    %44 = arith.addf %43, %39 : vector<16x1xf32>
    %cst_36 = arith.constant 5.120000e+02 : f32
    %45 = vector.broadcast %cst_36 : f32 to vector<16x1xf32>
    %46 = arith.divf %44, %45 : vector<16x1xf32>
    %47 = vector.broadcast %46 : vector<16x1xf32> to vector<16x128xf32>
    %48 = arith.subf %7, %47 : vector<16x128xf32>
    %49 = arith.mulf %48, %48 : vector<16x128xf32>
    %cst_37 = arith.constant dense<0.000000e+00> : vector<16xf32>
    %50 = vector.multi_reduction <add>, %49, %cst_37 [1] : vector<16x128xf32> to vector<16xf32>
    %51 = vector.shape_cast %50 : vector<16xf32> to vector<16x1xf32>
    %52 = vector.broadcast %46 : vector<16x1xf32> to vector<16x128xf32>
    %53 = arith.subf %15, %52 : vector<16x128xf32>
    %54 = arith.mulf %53, %53 : vector<16x128xf32>
    %cst_38 = arith.constant dense<0.000000e+00> : vector<16xf32>
    %55 = vector.multi_reduction <add>, %54, %cst_38 [1] : vector<16x128xf32> to vector<16xf32>
    %56 = vector.shape_cast %55 : vector<16xf32> to vector<16x1xf32>
    %57 = vector.broadcast %46 : vector<16x1xf32> to vector<16x128xf32>
    %58 = arith.subf %23, %57 : vector<16x128xf32>
    %59 = arith.mulf %58, %58 : vector<16x128xf32>
    %cst_39 = arith.constant dense<0.000000e+00> : vector<16xf32>
    %60 = vector.multi_reduction <add>, %59, %cst_39 [1] : vector<16x128xf32> to vector<16xf32>
    %61 = vector.shape_cast %60 : vector<16xf32> to vector<16x1xf32>
    %62 = vector.broadcast %46 : vector<16x1xf32> to vector<16x128xf32>
    %63 = arith.subf %31, %62 : vector<16x128xf32>
    %64 = arith.mulf %63, %63 : vector<16x128xf32>
    %cst_40 = arith.constant dense<0.000000e+00> : vector<16xf32>
    %65 = vector.multi_reduction <add>, %64, %cst_40 [1] : vector<16x128xf32> to vector<16xf32>
    %66 = vector.shape_cast %65 : vector<16xf32> to vector<16x1xf32>
    %cst_41 = arith.constant 0.000000e+00 : f32
    %67 = vector.broadcast %cst_41 : f32 to vector<16x1xf32>
    %68 = arith.addf %67, %51 : vector<16x1xf32>
    %69 = arith.addf %68, %56 : vector<16x1xf32>
    %70 = arith.addf %69, %61 : vector<16x1xf32>
    %71 = arith.addf %70, %66 : vector<16x1xf32>
    %cst_42 = arith.constant 5.120000e+02 : f32
    %72 = vector.broadcast %cst_42 : f32 to vector<16x1xf32>
    %73 = arith.divf %71, %72 : vector<16x1xf32>
    %cst_43 = arith.constant 9.99999974E-6 : f32
    %74 = vector.broadcast %cst_43 : f32 to vector<16x1xf32>
    %75 = arith.addf %73, %74 : vector<16x1xf32>
    %76 = math.rsqrt %75 : vector<16x1xf32>
    %c0_44 = arith.constant 0 : index
    %c0_45 = arith.constant 0 : index
    %77 = vector.load %arg4[%c0_44, %c0_45] : memref<16x1xf32, #tpu.memory_space<vmem>>, vector<16x1xf32>
    %78 = arith.mulf %76, %77 : vector<16x1xf32>
    %c0_46 = arith.constant 0 : index
    %c0_47 = arith.constant 0 : index
    %79 = vector.load %arg5[%c0_46, %c0_47] : memref<16x1xf32, #tpu.memory_space<vmem>>, vector<16x1xf32>
    %80 = arith.mulf %46, %78 : vector<16x1xf32>
    %81 = arith.subf %79, %80 : vector<16x1xf32>
    %82 = vector.broadcast %78 : vector<16x1xf32> to vector<16x128xf32>
    %83 = arith.mulf %7, %82 : vector<16x128xf32>
    %84 = vector.broadcast %81 : vector<16x1xf32> to vector<16x128xf32>
    %85 = arith.addf %83, %84 : vector<16x128xf32>
    %cst_48 = arith.constant 0.000000e+00 : f32
    %86 = vector.broadcast %cst_48 : f32 to vector<16x128xf32>
    %87 = arith.maximumf %85, %86 : vector<16x128xf32>
    %c0_49 = arith.constant 0 : index
    %c0_50 = arith.constant 0 : index
    %c0_51 = arith.constant 0 : index
    %88 = vector.load %arg6[%c0_49, %c0_50, %c0_51] : memref<4x16x128xf32, #tpu.memory_space<vmem>>, vector<1x16x128xf32>
    %89 = vector.shape_cast %88 : vector<1x16x128xf32> to vector<16x128xf32>
    %90 = vector.shape_cast %87 : vector<16x128xf32> to vector<1x16x128xf32>
    tpu.vector_store %arg6[%c0_49, %c0_50, %c0_51], %90 {strides = array<i32>} : memref<4x16x128xf32, #tpu.memory_space<vmem>>, vector<1x16x128xf32>,
    %91 = vector.broadcast %78 : vector<16x1xf32> to vector<16x128xf32>
    %92 = arith.mulf %15, %91 : vector<16x128xf32>
    %93 = vector.broadcast %81 : vector<16x1xf32> to vector<16x128xf32>
    %94 = arith.addf %92, %93 : vector<16x128xf32>
    %cst_52 = arith.constant 0.000000e+00 : f32
    %95 = vector.broadcast %cst_52 : f32 to vector<16x128xf32>
    %96 = arith.maximumf %94, %95 : vector<16x128xf32>
    %c1_53 = arith.constant 1 : index
    %c0_54 = arith.constant 0 : index
    %c0_55 = arith.constant 0 : index
    %97 = vector.load %arg6[%c1_53, %c0_54, %c0_55] : memref<4x16x128xf32, #tpu.memory_space<vmem>>, vector<1x16x128xf32>
    %98 = vector.shape_cast %97 : vector<1x16x128xf32> to vector<16x128xf32>
    %99 = vector.shape_cast %96 : vector<16x128xf32> to vector<1x16x128xf32>
    tpu.vector_store %arg6[%c1_53, %c0_54, %c0_55], %99 {strides = array<i32>} : memref<4x16x128xf32, #tpu.memory_space<vmem>>, vector<1x16x128xf32>,
    %100 = vector.broadcast %78 : vector<16x1xf32> to vector<16x128xf32>
    %101 = arith.mulf %23, %100 : vector<16x128xf32>
    %102 = vector.broadcast %81 : vector<16x1xf32> to vector<16x128xf32>
    %103 = arith.addf %101, %102 : vector<16x128xf32>
    %cst_56 = arith.constant 0.000000e+00 : f32
    %104 = vector.broadcast %cst_56 : f32 to vector<16x128xf32>
    %105 = arith.maximumf %103, %104 : vector<16x128xf32>
    %c2_57 = arith.constant 2 : index
    %c0_58 = arith.constant 0 : index
    %c0_59 = arith.constant 0 : index
    %106 = vector.load %arg6[%c2_57, %c0_58, %c0_59] : memref<4x16x128xf32, #tpu.memory_space<vmem>>, vector<1x16x128xf32>
    %107 = vector.shape_cast %106 : vector<1x16x128xf32> to vector<16x128xf32>
    %108 = vector.shape_cast %105 : vector<16x128xf32> to vector<1x16x128xf32>
    tpu.vector_store %arg6[%c2_57, %c0_58, %c0_59], %108 {strides = array<i32>} : memref<4x16x128xf32, #tpu.memory_space<vmem>>, vector<1x16x128xf32>,
    %109 = vector.broadcast %78 : vector<16x1xf32> to vector<16x128xf32>
    %110 = arith.mulf %31, %109 : vector<16x128xf32>
    %111 = vector.broadcast %81 : vector<16x1xf32> to vector<16x128xf32>
    %112 = arith.addf %110, %111 : vector<16x128xf32>
    %cst_60 = arith.constant 0.000000e+00 : f32
    %113 = vector.broadcast %cst_60 : f32 to vector<16x128xf32>
    %114 = arith.maximumf %112, %113 : vector<16x128xf32>
    %c3_61 = arith.constant 3 : index
    %c0_62 = arith.constant 0 : index
    %c0_63 = arith.constant 0 : index
    %115 = vector.load %arg6[%c3_61, %c0_62, %c0_63] : memref<4x16x128xf32, #tpu.memory_space<vmem>>, vector<1x16x128xf32>
    %116 = vector.shape_cast %115 : vector<1x16x128xf32> to vector<16x128xf32>
    %117 = vector.shape_cast %114 : vector<16x128xf32> to vector<1x16x128xf32>
    tpu.vector_store %arg6[%c3_61, %c0_62, %c0_63], %117 {strides = array<i32>} : memref<4x16x128xf32, #tpu.memory_space<vmem>>, vector<1x16x128xf32>,
    return
  }
  func.func @transform_0(%arg0: i32) -> (i32, i32, i32) {
    %c0_i32 = arith.constant 0 : i32
    %c0_i32_0 = arith.constant 0 : i32
    %c0_i32_1 = arith.constant 0 : i32
    %c0_i32_2 = arith.constant 0 : i32
    return %c0_i32, %c0_i32_0, %c0_i32_1 : i32, i32, i32
  }
  func.func @transform_1(%arg0: i32) -> (i32, i32, i32) {
    %c0_i32 = arith.constant 0 : i32
    %c0_i32_0 = arith.constant 0 : i32
    %c0_i32_1 = arith.constant 0 : i32
    %c0_i32_2 = arith.constant 0 : i32
    return %c0_i32, %c0_i32_0, %c0_i32_1 : i32, i32, i32
  }
  func.func @transform_2(%arg0: i32) -> (i32, i32) {
    %c0_i32 = arith.constant 0 : i32
    %c0_i32_0 = arith.constant 0 : i32
    %c0_i32_1 = arith.constant 0 : i32
    return %c0_i32, %c0_i32_0 : i32, i32
  }
  func.func @transform_3(%arg0: i32) -> (i32, i32) {
    %c0_i32 = arith.constant 0 : i32
    %c0_i32_0 = arith.constant 0 : i32
    %c0_i32_1 = arith.constant 0 : i32
    return %c0_i32, %c0_i32_0 : i32, i32
  }
  func.func @transform_4(%arg0: i32) -> (i32, i32) {
    %c0_i32 = arith.constant 0 : i32
    %c0_i32_0 = arith.constant 0 : i32
    %c0_i32_1 = arith.constant 0 : i32
    return %c0_i32, %c0_i32_0 : i32, i32
  }
  func.func @transform_5(%arg0: i32) -> (i32, i32, i32) {
    %c0_i32 = arith.constant 0 : i32
    %c0_i32_0 = arith.constant 0 : i32
    %c0_i32_1 = arith.constant 0 : i32
    %c0_i32_2 = arith.constant 0 : i32
    return %c0_i32, %c0_i32_0, %c0_i32_1 : i32, i32, i32
  }
}

module attributes {stable_mosaic.version = 11 : i64} {
  func.func @_phase_nobn_kernel(%arg0: i32, %arg1: memref<1x64x512xf32, #tpu.memory_space<vmem>>, %arg2: memref<1x3x64xf32, #tpu.memory_space<vmem>>, %arg3: memref<3x1xf32, #tpu.memory_space<vmem>>, %arg4: memref<1x3x512xf32, #tpu.memory_space<vmem>>) attributes {dimension_semantics = [#tpu.dimension_semantics<parallel>], iteration_bounds = array<i64: 4>, scalar_prefetch = 0 : i64, scratch_operands = 0 : i64, tpu.core_type = #tpu.core_type<tc>, window_params = [{transform_indices = @transform_0, window_bounds = array<i64: 1, 64, 512>}, {transform_indices = @transform_1, window_bounds = array<i64: 1, 3, 64>}, {pipeline_mode = #tpu.pipeline_mode<synchronous>, transform_indices = @transform_2, window_bounds = array<i64: 3, 1>}, {transform_indices = @transform_3, window_bounds = array<i64: 1, 3, 512>}]} {
    %c0 = arith.constant 0 : index
    %c0_0 = arith.constant 0 : index
    %c0_1 = arith.constant 0 : index
    %0 = vector.load %arg2[%c0, %c0_0, %c0_1] : memref<1x3x64xf32, #tpu.memory_space<vmem>>, vector<1x3x64xf32>
    %1 = vector.shape_cast %0 : vector<1x3x64xf32> to vector<3x64xf32>
    %c0_2 = arith.constant 0 : index
    %c0_3 = arith.constant 0 : index
    %c0_4 = arith.constant 0 : index
    %2 = vector.load %arg1[%c0_2, %c0_3, %c0_4] : memref<1x64x512xf32, #tpu.memory_space<vmem>>, vector<1x64x512xf32>
    %3 = vector.shape_cast %2 : vector<1x64x512xf32> to vector<64x512xf32>
    %cst = arith.constant dense<0.000000e+00> : vector<3x512xf32>
    %4 = tpu.matmul %1, %3, %cst {dimension_numbers = #tpu.dot_dimension_numbers<[1], [0], [0], [1], [0, 0, 1, 1], [], []>} : vector<3x64xf32>, vector<64x512xf32>, vector<3x512xf32> -> vector<3x512xf32>
    %c0_5 = arith.constant 0 : index
    %c0_6 = arith.constant 0 : index
    %5 = vector.load %arg3[%c0_5, %c0_6] : memref<3x1xf32, #tpu.memory_space<vmem>>, vector<3x1xf32>
    %6 = vector.broadcast %5 : vector<3x1xf32> to vector<3x512xf32>
    %7 = arith.addf %4, %6 : vector<3x512xf32>
    %8 = math.tanh %7 : vector<3x512xf32>
    %c0_7 = arith.constant 0 : index
    %c0_8 = arith.constant 0 : index
    %c0_9 = arith.constant 0 : index
    %9 = vector.load %arg4[%c0_7, %c0_8, %c0_9] : memref<1x3x512xf32, #tpu.memory_space<vmem>>, vector<1x3x512xf32>
    %10 = vector.shape_cast %9 : vector<1x3x512xf32> to vector<3x512xf32>
    %11 = vector.shape_cast %8 : vector<3x512xf32> to vector<1x3x512xf32>
    tpu.vector_store %arg4[%c0_7, %c0_8, %c0_9], %11 {strides = array<i32>} : memref<1x3x512xf32, #tpu.memory_space<vmem>>, vector<1x3x512xf32>,
    return
  }
  func.func @transform_0(%arg0: i32) -> (i32, i32, i32) {
    %c0_i32 = arith.constant 0 : i32
    %c0_i32_0 = arith.constant 0 : i32
    %c0_i32_1 = arith.constant 0 : i32
    return %arg0, %c0_i32, %c0_i32_0 : i32, i32, i32
  }
  func.func @transform_1(%arg0: i32) -> (i32, i32, i32) {
    %c0_i32 = arith.constant 0 : i32
    %c0_i32_0 = arith.constant 0 : i32
    %c0_i32_1 = arith.constant 0 : i32
    return %arg0, %c0_i32, %c0_i32_0 : i32, i32, i32
  }
  func.func @transform_2(%arg0: i32) -> (i32, i32) {
    %c0_i32 = arith.constant 0 : i32
    %c0_i32_0 = arith.constant 0 : i32
    %c0_i32_1 = arith.constant 0 : i32
    return %c0_i32, %c0_i32_0 : i32, i32
  }
  func.func @transform_3(%arg0: i32) -> (i32, i32, i32) {
    %c0_i32 = arith.constant 0 : i32
    %c0_i32_0 = arith.constant 0 : i32
    %c0_i32_1 = arith.constant 0 : i32
    return %arg0, %c0_i32, %c0_i32_0 : i32, i32, i32
  }
}

</mosaic_0001>

<bundles_post_ra>
// kernel: vae_forward.8
= control target key start
LH: loop header
LB: loop body
LE: loop exit
PB: predicated region body
PF: predicated region fallthrough
CT: control target
= control target key end

     0   :  { %v315_v3 = vmov 0   ;;  %vm58_vm0 = vcmask 392192   ;;  %v316_v53 = vmov 512.0   ;;  %s515_s0 = inlined_call_operand.vmem [shape: f32[1,48,512], index: 0, kind: input, shape index: {}]   ;;  %s516_s1 = inlined_call_operand.vmem [shape: f32[1,16,48], index: 1, kind: input, shape index: {}]   ;;  %s517_s2 = inlined_call_operand.vmem [shape: f32[16,1], index: 2, kind: input, shape index: {}]   ;;  %s518_s3 = inlined_call_operand.vmem [shape: f32[16,1], index: 3, kind: input, shape index: {}]   ;;  %s519_s4 = inlined_call_operand.vmem [shape: f32[16,1], index: 4, kind: input, shape index: {}]   ;;  %s520_s5 = inlined_call_operand.vmem [shape: f32[1,16,512], index: 5, kind: output, shape index: {}]  }
   0x1   :  { %v42_v0 = vld [vmem:[%s515_s0 + $0xa0] sm:$0xff]  ;;  %v43_v1 = vld [vmem:[%s515_s0 + $0xa8] sm:$0xff]  ;;  %v44_v2 = vld [vmem:[%s515_s0 + $0xb0] sm:$0xff]  ;;  %306 = vset.pattern.permute.xlu0 %v315_v3  ;;  %308 = vset.pattern.permute.xlu2 %v315_v3  ;;  %309 = vrcp.f32 %v316_v53 }
   0x2   :  { %75 = vmatpush.msra.mxu0 %v42_v0  ;;  %98 = vmatpush.msra.mxu1 %v43_v1  ;;  %v45_v4 = vld [vmem:[%s515_s0 + $0xb8] sm:$0xff]  ;;  %v38_v5 = vld [vmem:[%s515_s0 + $0x80] sm:$0xff]  ;;  %v39_v6 = vld [vmem:[%s515_s0 + $0x88] sm:$0xff] }
   0x3   :  { %121 = vmatpush.msra.mxu2 %v44_v2  ;;  %144 = vmatpush.msra.mxu3 %v45_v4  ;;  %v40_v7 = vld [vmem:[%s515_s0 + $0x90] sm:$0xff]  ;;  %v41_v8 = vld [vmem:[%s515_s0 + $0x98] sm:$0xff]  ;;  %v34_v9 = vld [vmem:[%s515_s0 + $0x60] sm:$0xff] }
   0x4   :  { %76 = vmatpush.msra.mxu0 %v38_v5  ;;  %99 = vmatpush.msra.mxu1 %v39_v6  ;;  %v35_v10 = vld [vmem:[%s515_s0 + $0x68] sm:$0xff]  ;;  %v36_v11 = vld [vmem:[%s515_s0 + $0x70] sm:$0xff]  ;;  %v37_v12 = vld [vmem:[%s515_s0 + $0x78] sm:$0xff] }
   0x5   :  { %122 = vmatpush.msra.mxu2 %v40_v7  ;;  %145 = vmatpush.msra.mxu3 %v41_v8  ;;  %v30_v13 = vld [vmem:[%s515_s0 + $0x40] sm:$0xff]  ;;  %v31_v14 = vld [vmem:[%s515_s0 + $0x48] sm:$0xff]  ;;  %v32_v15 = vld [vmem:[%s515_s0 + $0x50] sm:$0xff] }
   0x6   :  { %77 = vmatpush.msra.mxu0 %v34_v9  ;;  %100 = vmatpush.msra.mxu1 %v35_v10  ;;  %v33_v16 = vld [vmem:[%s515_s0 + $0x58] sm:$0xff]  ;;  %v26_v17 = vld [vmem:[%s515_s0 + $0x20] sm:$0xff]  ;;  %v27_v18 = vld [vmem:[%s515_s0 + $0x28] sm:$0xff] }
   0x7   :  { %123 = vmatpush.msra.mxu2 %v36_v11  ;;  %146 = vmatpush.msra.mxu3 %v37_v12  ;;  %v28_v19 = vld [vmem:[%s515_s0 + $0x30] sm:$0xff]  ;;  %v29_v20 = vld [vmem:[%s515_s0 + $0x38] sm:$0xff]  ;;  %v22_v21 = vld [vmem:[%s515_s0] sm:$0xff]  ;;  %v310_v54 = vpop.eup %309 }
   0x8   :  { %78 = vmatpush.msra.mxu0 %v30_v13  ;;  %101 = vmatpush.msra.mxu1 %v31_v14  ;;  %v23_v22 = vld [vmem:[%s515_s0 + $0x8] sm:$0xff]  ;;  %v24_v23 = vld [vmem:[%s515_s0 + $0x10] sm:$0xff]  ;;  %v25_v24 = vld [vmem:[%s515_s0 + $0x18] sm:$0xff]  ;;  %v170_v55 = vmul.f32 512.0, %v310_v54  ;;  %vm174_vm1 = vweird.f32 %v310_v54 }
   0x9   :  { %124 = vmatpush.msra.mxu2 %v32_v15  ;;  %147 = vmatpush.msra.mxu3 %v33_v16  ;;  %v20_v25 = vld [vmem:[%s516_s1] sm:$0xff]  ;;  %v21_v27 = vld [vmem:[%s516_s1 + $0x8] sm:$0xff] }
   0xa   :  { %79 = vmatpush.msra.mxu0 %v26_v17  ;;  %102 = vmatpush.msra.mxu1 %v27_v18  ;;  %v46_v26 = vld [vmem:[%s517_s2] sm:$0xff]  ;;  %v47_v28 = vld [vmem:[%s517_s2 + $0x8] sm:$0xff]  ;;  %v171_v56 = vsub.f32 1.0, %v170_v55 }
   0xb   :  { %125 = vmatpush.msra.mxu2 %v28_v19  ;;  %148 = vmatpush.msra.mxu3 %v29_v20 }
   0xc   :  { %80 = vmatpush.msra.mxu0 %v22_v21  ;;  %103 = vmatpush.msra.mxu1 %v23_v22  ;;  %v172_v57 = vmul.f32 %v310_v54, %v171_v56 }
   0xd   :  { %126 = vmatpush.msra.mxu2 %v24_v23  ;;  %149 = vmatpush.msra.mxu3 %v25_v24 }
   0xe   :  { %296 = vmatmul.msk.f32.vlgmr.msra.gmra.mxu0 %vm58_vm0, %v20_v25  ;;  %298 = vmatmul.msk.f32.vlgmr.msra.gmra.mxu1 %vm58_vm0, %v20_v25  ;;  %v173_v58 = vadd.f32 %v310_v54, %v172_v57  ;;  %v235_v57 = vld [vmem:[%s519_s4 + $0x8] sm:$0xff] }
   0xf   :  { %300 = vmatmul.msk.f32.vlgmr.msra.gmra.mxu2 %vm58_vm0, %v20_v25  ;;  %302 = vmatmul.msk.f32.vlgmr.msra.gmra.mxu3 %vm58_vm0, %v20_v25 }
  0x10   :  { %50 = vperm.xlu0 %306, %v46_v26   ;;  %307 = vset.pattern.permute.xlu1 %v315_v3  ;;  %v175_v59 = vsel %vm174_vm1, %v310_v54, %v173_v58  ;;  %v231_v54 = vld [vmem:[%s518_s3 + $0x8] sm:$0xff] }
  0x16   :  { %297 = vmatmul.msk.f32.gmra.mxu0 %vm58_vm0, %v21_v27  ;;  %299 = vmatmul.msk.f32.gmra.mxu1 %vm58_vm0, %v21_v27 }
  0x17   :  { %301 = vmatmul.msk.f32.gmra.mxu2 %vm58_vm0, %v21_v27  ;;  %303 = vmatmul.msk.f32.gmra.mxu3 %vm58_vm0, %v21_v27 }
  0x18   :  { %55 = vperm.xlu0 %306, %v47_v28  }
  0x82   :  { %v51_v31 = vpop.permute.xlu0 %50 }
  0x8a   :  { %v56_v42 = vpop.permute.xlu0 %55 }
  0x8b   :  { %v82_v29 = vpop.f32.mrf.mxu0  ;;  %v105_v30 = vpop.f32.mrf.mxu1 }
  0x8c   :  { %v439_v32 = vadd.f32 %v82_v29, %v51_v31  ;;  %v441_v33 = vadd.f32 %v105_v30, %v51_v31 }
  0x8e   :  { %v157_v34 = vadd.f32 %v441_v33, %v439_v32 }
  0x92   :  { %v128_v35 = vpop.f32.mrf.mxu2  ;;  %v151_v36 = vpop.f32.mrf.mxu3 }
  0x93   :  { %v445_v37 = vadd.f32 %v128_v35, %v51_v31  ;;  %v85_v38 = vpop.f32.mrf.mxu0  ;;  %v108_v39 = vpop.f32.mrf.mxu1  ;;  %v447_v40 = vadd.f32 %v151_v36, %v51_v31 }
  0x94   :  { %v450_v43 = vadd.f32 %v85_v38, %v56_v42  ;;  %v452_v44 = vadd.f32 %v108_v39, %v56_v42  ;;  %v230_v39 = vld [vmem:[%s518_s3] sm:$0xff] }
  0x95   :  { %v158_v41 = vadd.f32 %v157_v34, %v445_v37 }
  0x96   :  { %v162_v48 = vadd.f32 %v452_v44, %v450_v43 }
  0x97   :  { %v159_v45 = vadd.f32 %v158_v41, %v447_v40 }
  0x99   :  { %160 = vadd.xlane.f32.xlu1 %v159_v45 }
  0x9a   :  { %v131_v46 = vpop.f32.mrf.mxu2  ;;  %v154_v47 = vpop.f32.mrf.mxu3 }
  0x9b   :  { %v457_v49 = vadd.f32 %v131_v46, %v56_v42  ;;  %v459_v50 = vadd.f32 %v154_v47, %v56_v42  ;;  %v234_v47 = vld [vmem:[%s519_s4] sm:$0xff] }
  0x9d   :  { %v163_v51 = vadd.f32 %v162_v48, %v457_v49 }
  0x9f   :  { %v164_v52 = vadd.f32 %v163_v51, %v459_v50 }
  0xa1   :  { %165 = vadd.xlane.f32.xlu1 %v164_v52 }
 0x10c   :  { %v161_v60 = vpop.xlane.xlu1 %160 }
 0x10d   :  { %v176_v61 = vmul.f32 %v175_v59, %v161_v60 }
 0x10f   :  { %v178_v62 = vsub.f32 %v439_v32, %v176_v61  ;;  %v179_v63 = vsub.f32 %v441_v33, %v176_v61  ;;  %v180_v0 = vsub.f32 %v445_v37, %v176_v61  ;;  %v181_v1 = vsub.f32 %v447_v40, %v176_v61 }
 0x111   :  { %v186_v2 = vmul.f32 %v178_v62, %v178_v62  ;;  %v187_v3 = vmul.f32 %v179_v63, %v179_v63  ;;  %v188_v4 = vmul.f32 %v180_v0, %v180_v0  ;;  %v189_v8 = vmul.f32 %v181_v1, %v181_v1 }
 0x113   :  { %v194_v5 = vadd.f32 %v187_v3, %v186_v2 }
 0x114   :  { %v166_v6 = vpop.xlane.xlu1 %165 }
 0x115   :  { %v177_v7 = vmul.f32 %v175_v59, %v166_v6  ;;  %v195_v9 = vadd.f32 %v194_v5, %v188_v4 }
 0x117   :  { %v196_v10 = vadd.f32 %v195_v9, %v189_v8  ;;  %v182_v11 = vsub.f32 %v450_v43, %v177_v7  ;;  %v183_v12 = vsub.f32 %v452_v44, %v177_v7  ;;  %v184_v13 = vsub.f32 %v457_v49, %v177_v7 }
 0x118   :  { %v185_v14 = vsub.f32 %v459_v50, %v177_v7 }
 0x119   :  { %197 = vadd.xlane.f32.xlu2 %v196_v10  ;;  %v190_v15 = vmul.f32 %v182_v11, %v182_v11  ;;  %v191_v16 = vmul.f32 %v183_v12, %v183_v12  ;;  %v192_v17 = vmul.f32 %v184_v13, %v184_v13 }
 0x11a   :  { %v193_v19 = vmul.f32 %v185_v14, %v185_v14 }
 0x11b   :  { %v199_v18 = vadd.f32 %v191_v16, %v190_v15 }
 0x11d   :  { %v200_v20 = vadd.f32 %v199_v18, %v192_v17 }
 0x11f   :  { %v201_v21 = vadd.f32 %v200_v20, %v193_v19 }
 0x121   :  { %202 = vadd.xlane.f32.xlu2 %v201_v21 }
 0x18c   :  { %v198_v22 = vpop.xlane.xlu2 %197 }
 0x18d   :  { %v206_v23 = vmul.f32 %v198_v22, %v175_v59 }
 0x18f   :  { %v208_v24 = vadd.f32 1e-05, %v206_v23 }
 0x191   :  { %311 = vrsqrt.f32 %v208_v24  ;;  %vm216_vm3 = vweird.f32 %v208_v24 }
 0x194   :  { %v203_v25 = vpop.xlane.xlu2 %202 }
 0x195   :  { %v207_v26 = vmul.f32 %v203_v25, %v175_v59 }
 0x197   :  { %v312_v27 = vpop.eup %311  ;;  %v209_v28 = vadd.f32 1e-05, %v207_v26 }
 0x198   :  { %v211_v29 = vmul.f32 %v312_v27, %v208_v24  ;;  %vm217_vm2 = vweird.f32 %v312_v27 }
 0x199   :  { %313 = vrsqrt.f32 %v209_v28  ;;  %vm218_vm4 = vmor %vm216_vm3, %vm217_vm2  ;;  %vm226_vm6 = vweird.f32 %v209_v28 }
 0x19a   :  { %v212_v30 = vmul.f32 %v312_v27, %v211_v29 }
 0x19c   :  { %v213_v31 = vmul.f32 0.5, %v212_v30 }
 0x19e   :  { %v214_v34 = vsub.f32 1.5, %v213_v31 }
 0x19f   :  { %v314_v35 = vpop.eup %313 }
 0x1a0   :  { %v221_v36 = vmul.f32 %v314_v35, %v209_v28  ;;  %v215_v38 = vmul.f32 %v312_v27, %v214_v34  ;;  %vm227_vm5 = vweird.f32 %v314_v35 }
 0x1a1   :  { %vm228_vm7 = vmor %vm226_vm6, %vm227_vm5 }
 0x1a2   :  { %v222_v41 = vmul.f32 %v314_v35, %v221_v36  ;;  %v219_v42 = vsel %vm218_vm4, %v312_v27, %v215_v38 }
 0x1a3   :  { %v232_v45 = vmul.f32 %v230_v39, %v219_v42 }
 0x1a4   :  { %v223_v46 = vmul.f32 0.5, %v222_v41 }
 0x1a5   :  { %242 = vperm.xlu0 %306, %v232_v45   ;;  %v236_v48 = vmul.f32 %v232_v45, %v176_v61 }
 0x1a6   :  { %v224_v51 = vsub.f32 1.5, %v223_v46 }
 0x1a7   :  { %v238_v52 = vsub.f32 %v234_v47, %v236_v48 }
 0x1a8   :  { %v225_v53 = vmul.f32 %v314_v35, %v224_v51 }
 0x1a9   :  { %260 = vperm.xlu2 %308, %v238_v52  }
 0x1aa   :  { %v229_v55 = vsel %vm228_vm7, %v314_v35, %v225_v53 }
 0x1ab   :  { %v233_v56 = vmul.f32 %v231_v54, %v229_v55 }
 0x1ad   :  { %247 = vperm.xlu1 %307, %v233_v56   ;;  %v237_v58 = vmul.f32 %v233_v56, %v177_v7 }
 0x1af   :  { %v239_v59 = vsub.f32 %v235_v57, %v237_v58 }
 0x1b1   :  { %265 = vperm.xlu0 %306, %v239_v59  }
 0x203   :  { %v261_v1 = vpop.permute.xlu2 %260 }
 0x217   :  { %v243_v60 = vpop.permute.xlu0 %242 }
 0x218   :  { %v250_v61 = vmul.f32 %v243_v60, %v439_v32  ;;  %v251_v62 = vmul.f32 %v243_v60, %v441_v33  ;;  %v252_v63 = vmul.f32 %v243_v60, %v445_v37  ;;  %v253_v0 = vmul.f32 %v243_v60, %v447_v40 }
 0x21a   :  { %v268_v2 = vadd.f32 %v261_v1, %v250_v61  ;;  %v269_v3 = vadd.f32 %v261_v1, %v251_v62  ;;  %v270_v4 = vadd.f32 %v261_v1, %v252_v63  ;;  %v271_v5 = vadd.f32 %v261_v1, %v253_v0 }
 0x21c   :  { %v276_v6 = vmax.f32 %v268_v2, 0.0  ;;  %v277_v8 = vmax.f32 %v269_v3, 0.0  ;;  %v278_v9 = vmax.f32 %v270_v4, 0.0  ;;  %v279_v7 = vmax.f32 %v271_v5, 0.0 }
 0x21e   :  { %284 = vst [vmem:[%s520_s5] sm:$0xff] %v276_v6 }
 0x21f   :  { %285 = vst [vmem:[%s520_s5 + $0x8] sm:$0xff] %v277_v8  ;;  %v248_v32 = vpop.permute.xlu1 %247 }
 0x220   :  { %286 = vst [vmem:[%s520_s5 + $0x10] sm:$0xff] %v278_v9  ;;  %v254_v33 = vmul.f32 %v248_v32, %v450_v43  ;;  %v255_v37 = vmul.f32 %v248_v32, %v452_v44  ;;  %v256_v40 = vmul.f32 %v248_v32, %v457_v49  ;;  %v257_v10 = vmul.f32 %v248_v32, %v459_v50 }
 0x221   :  { %287 = vst [vmem:[%s520_s5 + $0x18] sm:$0xff] %v279_v7 }
 0x223   :  { %v266_v11 = vpop.permute.xlu0 %265 }
 0x224   :  { %v272_v12 = vadd.f32 %v266_v11, %v254_v33  ;;  %v273_v13 = vadd.f32 %v266_v11, %v255_v37  ;;  %v274_v14 = vadd.f32 %v266_v11, %v256_v40  ;;  %v275_v15 = vadd.f32 %v266_v11, %v257_v10 }
 0x226   :  { %v280_v16 = vmax.f32 %v272_v12, 0.0  ;;  %v281_v17 = vmax.f32 %v273_v13, 0.0  ;;  %v282_v18 = vmax.f32 %v274_v14, 0.0  ;;  %v283_v19 = vmax.f32 %v275_v15, 0.0 }
 0x228   :  { %288 = vst [vmem:[%s520_s5 + $0x20] sm:$0xff] %v280_v16 }
 0x229   :  { %289 = vst [vmem:[%s520_s5 + $0x28] sm:$0xff] %v281_v17 }
 0x22a   :  { %290 = vst [vmem:[%s520_s5 + $0x30] sm:$0xff] %v282_v18 }
 0x22b   :  { %291 = vst [vmem:[%s520_s5 + $0x38] sm:$0xff] %v283_v19 }

// kernel: vae_forward.9
= control target key start
LH: loop header
LB: loop body
LE: loop exit
PB: predicated region body
PF: predicated region fallthrough
CT: control target
= control target key end

     0   :  { %v248_v37 = vmov 0   ;;  %v249_v49 = vmov 128.0   ;;  %s422_s0 = inlined_call_operand.vmem [shape: f32[1,256,128], index: 0, kind: input, shape index: {}]   ;;  %s423_s1 = inlined_call_operand.vmem [shape: f32[1,16,256], index: 1, kind: input, shape index: {}]   ;;  %s424_s2 = inlined_call_operand.vmem [shape: f32[16,1], index: 2, kind: input, shape index: {}]   ;;  %s425_s3 = inlined_call_operand.vmem [shape: f32[16,1], index: 3, kind: input, shape index: {}]   ;;  %s426_s4 = inlined_call_operand.vmem [shape: f32[16,1], index: 4, kind: input, shape index: {}]   ;;  %s427_s5 = inlined_call_operand.vmem [shape: f32[1,16,128], index: 5, kind: output, shape index: {}]  }
   0x1   :  { %v39_v0 = vld [vmem:[%s422_s0 + $0x78] sm:$0xff]  ;;  %v38_v1 = vld [vmem:[%s422_s0 + $0x70] sm:$0xff]  ;;  %v37_v4 = vld [vmem:[%s422_s0 + $0x68] sm:$0xff]  ;;  %239 = vset.pattern.permute.xlu0 %v248_v37  ;;  %241 = vset.pattern.permute.xlu2 %v248_v37  ;;  %242 = vrcp.f32 %v249_v49 }
   0x2   :  { %v55_v2 = vld [vmem:[%s422_s0 + $0xf8] sm:$0xff]  ;;  %68 = vmatpush.msra.mxu0 %v39_v0  ;;  %205 = vmatpush.msra.mxu2 %v39_v0  ;;  %v54_v3 = vld [vmem:[%s422_s0 + $0xf0] sm:$0xff]  ;;  %v53_v5 = vld [vmem:[%s422_s0 + $0xe8] sm:$0xff] }
   0x3   :  { %91 = vmatpush.msra.mxu1 %v55_v2  ;;  %221 = vmatpush.msra.mxu3 %v55_v2  ;;  %v36_v6 = vld [vmem:[%s422_s0 + $0x60] sm:$0xff]  ;;  %v35_v8 = vld [vmem:[%s422_s0 + $0x58] sm:$0xff]  ;;  %v34_v10 = vld [vmem:[%s422_s0 + $0x50] sm:$0xff] }
   0x4   :  { %69 = vmatpush.msra.mxu0 %v38_v1  ;;  %206 = vmatpush.msra.mxu2 %v38_v1  ;;  %v52_v7 = vld [vmem:[%s422_s0 + $0xe0] sm:$0xff]  ;;  %v51_v9 = vld [vmem:[%s422_s0 + $0xd8] sm:$0xff]  ;;  %v50_v11 = vld [vmem:[%s422_s0 + $0xd0] sm:$0xff] }
   0x5   :  { %92 = vmatpush.msra.mxu1 %v54_v3  ;;  %222 = vmatpush.msra.mxu3 %v54_v3  ;;  %v33_v12 = vld [vmem:[%s422_s0 + $0x48] sm:$0xff]  ;;  %v32_v14 = vld [vmem:[%s422_s0 + $0x40] sm:$0xff]  ;;  %v31_v16 = vld [vmem:[%s422_s0 + $0x38] sm:$0xff] }
   0x6   :  { %70 = vmatpush.msra.mxu0 %v37_v4  ;;  %207 = vmatpush.msra.mxu2 %v37_v4  ;;  %v49_v13 = vld [vmem:[%s422_s0 + $0xc8] sm:$0xff]  ;;  %v48_v15 = vld [vmem:[%s422_s0 + $0xc0] sm:$0xff]  ;;  %v47_v17 = vld [vmem:[%s422_s0 + $0xb8] sm:$0xff] }
   0x7   :  { %93 = vmatpush.msra.mxu1 %v53_v5  ;;  %223 = vmatpush.msra.mxu3 %v53_v5  ;;  %v30_v18 = vld [vmem:[%s422_s0 + $0x30] sm:$0xff]  ;;  %v29_v20 = vld [vmem:[%s422_s0 + $0x28] sm:$0xff]  ;;  %v28_v22 = vld [vmem:[%s422_s0 + $0x20] sm:$0xff]  ;;  %v243_v50 = vpop.eup %242 }
   0x8   :  { %71 = vmatpush.msra.mxu0 %v36_v6  ;;  %208 = vmatpush.msra.mxu2 %v36_v6  ;;  %v46_v19 = vld [vmem:[%s422_s0 + $0xb0] sm:$0xff]  ;;  %v45_v21 = vld [vmem:[%s422_s0 + $0xa8] sm:$0xff]  ;;  %v44_v23 = vld [vmem:[%s422_s0 + $0xa0] sm:$0xff]  ;;  %v121_v51 = vmul.f32 128.0, %v243_v50  ;;  %vm125_vm0 = vweird.f32 %v243_v50 }
   0x9   :  { %94 = vmatpush.msra.mxu1 %v52_v7  ;;  %224 = vmatpush.msra.mxu3 %v52_v7  ;;  %v27_v24 = vld [vmem:[%s422_s0 + $0x18] sm:$0xff]  ;;  %v26_v26 = vld [vmem:[%s422_s0 + $0x10] sm:$0xff]  ;;  %v25_v28 = vld [vmem:[%s422_s0 + $0x8] sm:$0xff] }
   0xa   :  { %72 = vmatpush.msra.mxu0 %v35_v8  ;;  %209 = vmatpush.msra.mxu2 %v35_v8  ;;  %v43_v25 = vld [vmem:[%s422_s0 + $0x98] sm:$0xff]  ;;  %v42_v27 = vld [vmem:[%s422_s0 + $0x90] sm:$0xff]  ;;  %v41_v29 = vld [vmem:[%s422_s0 + $0x88] sm:$0xff]  ;;  %v122_v52 = vsub.f32 1.0, %v121_v51 }
   0xb   :  { %95 = vmatpush.msra.mxu1 %v51_v9  ;;  %225 = vmatpush.msra.mxu3 %v51_v9  ;;  %v24_v30 = vld [vmem:[%s422_s0] sm:$0xff]  ;;  %v22_v32 = vld [vmem:[%s423_s1 + $0x10] sm:$0xff]  ;;  %v21_v34 = vld [vmem:[%s423_s1 + $0x8] sm:$0xff] }
   0xc   :  { %73 = vmatpush.msra.mxu0 %v34_v10  ;;  %210 = vmatpush.msra.mxu2 %v34_v10  ;;  %v20_v31 = vld [vmem:[%s423_s1] sm:$0xff]  ;;  %v23_v35 = vld [vmem:[%s423_s1 + $0x18] sm:$0xff]  ;;  %v57_v38 = vld [vmem:[%s424_s2 + $0x8] sm:$0xff]  ;;  %v123_v53 = vmul.f32 %v243_v50, %v122_v52 }
   0xd   :  { %96 = vmatpush.msra.mxu1 %v50_v11  ;;  %226 = vmatpush.msra.mxu3 %v50_v11  ;;  %v40_v33 = vld [vmem:[%s422_s0 + $0x80] sm:$0xff] }
   0xe   :  { %74 = vmatpush.msra.mxu0 %v33_v12  ;;  %211 = vmatpush.msra.mxu2 %v33_v12  ;;  %v56_v36 = vld [vmem:[%s424_s2] sm:$0xff]  ;;  %v124_v54 = vadd.f32 %v243_v50, %v123_v53 }
   0xf   :  { %97 = vmatpush.msra.mxu1 %v49_v13  ;;  %227 = vmatpush.msra.mxu3 %v49_v13 }
  0x10   :  { %75 = vmatpush.msra.mxu0 %v32_v14  ;;  %212 = vmatpush.msra.mxu2 %v32_v14  ;;  %v126_v55 = vsel %vm125_vm0, %v243_v50, %v124_v54  ;;  %v163_v14 = vld [vmem:[%s425_s3] sm:$0xff] }
  0x11   :  { %98 = vmatpush.msra.mxu1 %v48_v15  ;;  %228 = vmatpush.msra.mxu3 %v48_v15 }
  0x12   :  { %76 = vmatpush.msra.mxu0 %v31_v16  ;;  %213 = vmatpush.msra.mxu2 %v31_v16 }
  0x13   :  { %99 = vmatpush.msra.mxu1 %v47_v17  ;;  %229 = vmatpush.msra.mxu3 %v47_v17 }
  0x14   :  { %77 = vmatpush.msra.mxu0 %v30_v18  ;;  %214 = vmatpush.msra.mxu2 %v30_v18 }
  0x15   :  { %100 = vmatpush.msra.mxu1 %v46_v19  ;;  %230 = vmatpush.msra.mxu3 %v46_v19  ;;  %v167_v19 = vld [vmem:[%s426_s4] sm:$0xff] }
  0x16   :  { %78 = vmatpush.msra.mxu0 %v29_v20  ;;  %215 = vmatpush.msra.mxu2 %v29_v20 }
  0x17   :  { %101 = vmatpush.msra.mxu1 %v45_v21  ;;  %231 = vmatpush.msra.mxu3 %v45_v21 }
  0x18   :  { %79 = vmatpush.msra.mxu0 %v28_v22  ;;  %216 = vmatpush.msra.mxu2 %v28_v22 }
  0x19   :  { %102 = vmatpush.msra.mxu1 %v44_v23  ;;  %232 = vmatpush.msra.mxu3 %v44_v23 }
  0x1a   :  { %80 = vmatpush.msra.mxu0 %v27_v24  ;;  %217 = vmatpush.msra.mxu2 %v27_v24  ;;  %v164_v24 = vld [vmem:[%s425_s3 + $0x8] sm:$0xff] }
  0x1b   :  { %103 = vmatpush.msra.mxu1 %v43_v25  ;;  %233 = vmatpush.msra.mxu3 %v43_v25 }
  0x1c   :  { %81 = vmatpush.msra.mxu0 %v26_v26  ;;  %218 = vmatpush.msra.mxu2 %v26_v26 }
  0x1d   :  { %104 = vmatpush.msra.mxu1 %v42_v27  ;;  %234 = vmatpush.msra.mxu3 %v42_v27  ;;  %v168_v27 = vld [vmem:[%s426_s4 + $0x8] sm:$0xff] }
  0x1e   :  { %82 = vmatpush.msra.mxu0 %v25_v28  ;;  %219 = vmatpush.msra.mxu2 %v25_v28 }
  0x1f   :  { %105 = vmatpush.msra.mxu1 %v41_v29  ;;  %235 = vmatpush.msra.mxu3 %v41_v29 }
  0x20   :  { %83 = vmatpush.msra.mxu0 %v24_v30  ;;  %220 = vmatpush.msra.mxu2 %v24_v30 }
  0x21   :  { %84 = vmatmul.f32.vlgmr.msra.gmra.mxu0 %v20_v31  ;;  %87 = vmatmul.f32.vlgmr.msra.gmra.mxu2 %v22_v32 }
  0x22   :  { %106 = vmatpush.msra.mxu1 %v40_v33  ;;  %236 = vmatpush.msra.mxu3 %v40_v33 }
  0x23   :  { %107 = vmatmul.f32.vlgmr.msra.gmra.mxu1 %v21_v34  ;;  %110 = vmatmul.f32.vlgmr.msra.gmra.mxu3 %v23_v35 }
  0x24   :  { %60 = vperm.xlu0 %239, %v56_v36   ;;  %240 = vset.pattern.permute.xlu1 %v248_v37 }
  0x2c   :  { %65 = vperm.xlu0 %239, %v57_v38  }
  0x96   :  { %v61_v39 = vpop.permute.xlu0 %60 }
  0x9e   :  { %v85_v40 = vpop.f32.mrf.mxu0  ;;  %v66_v44 = vpop.permute.xlu0 %65 }
  0x9f   :  { %v86_v41 = vadd.f32 %v85_v40, %v61_v39 }
  0xa0   :  { %v108_v42 = vpop.f32.mrf.mxu1 }
  0xa1   :  { %v394_v43 = vadd.f32 %v108_v42, %v86_v41 }
  0xa3   :  { %114 = vadd.xlane.f32.xlu1 %v394_v43 }
  0xa4   :  { %v88_v45 = vpop.f32.mrf.mxu2 }
  0xa5   :  { %v89_v46 = vadd.f32 %v88_v45, %v66_v44 }
  0xa6   :  { %v111_v47 = vpop.f32.mrf.mxu3 }
  0xa7   :  { %v397_v48 = vadd.f32 %v111_v47, %v89_v46 }
  0xab   :  { %116 = vadd.xlane.f32.xlu1 %v397_v48 }
 0x116   :  { %v115_v56 = vpop.xlane.xlu1 %114 }
 0x117   :  { %v127_v57 = vmul.f32 %v126_v55, %v115_v56 }
 0x119   :  { %v129_v58 = vsub.f32 %v394_v43, %v127_v57 }
 0x11b   :  { %v131_v59 = vmul.f32 %v129_v58, %v129_v58 }
 0x11d   :  { %133 = vadd.xlane.f32.xlu2 %v131_v59 }
 0x11e   :  { %v117_v60 = vpop.xlane.xlu1 %116 }
 0x11f   :  { %v128_v61 = vmul.f32 %v126_v55, %v117_v60 }
 0x121   :  { %v130_v62 = vsub.f32 %v397_v48, %v128_v61 }
 0x123   :  { %v132_v63 = vmul.f32 %v130_v62, %v130_v62 }
 0x125   :  { %135 = vadd.xlane.f32.xlu2 %v132_v63 }
 0x190   :  { %v134_v0 = vpop.xlane.xlu2 %133 }
 0x191   :  { %v139_v1 = vmul.f32 %v134_v0, %v126_v55 }
 0x193   :  { %v141_v2 = vadd.f32 1e-05, %v139_v1 }
 0x195   :  { %244 = vrsqrt.f32 %v141_v2  ;;  %vm149_vm2 = vweird.f32 %v141_v2 }
 0x198   :  { %v136_v3 = vpop.xlane.xlu2 %135 }
 0x199   :  { %v140_v4 = vmul.f32 %v136_v3, %v126_v55 }
 0x19b   :  { %v245_v5 = vpop.eup %244  ;;  %v142_v6 = vadd.f32 1e-05, %v140_v4 }
 0x19c   :  { %v144_v7 = vmul.f32 %v245_v5, %v141_v2  ;;  %vm150_vm1 = vweird.f32 %v245_v5 }
 0x19d   :  { %246 = vrsqrt.f32 %v142_v6  ;;  %vm151_vm3 = vmor %vm149_vm2, %vm150_vm1  ;;  %vm159_vm5 = vweird.f32 %v142_v6 }
 0x19e   :  { %v145_v8 = vmul.f32 %v245_v5, %v144_v7 }
 0x1a0   :  { %v146_v9 = vmul.f32 0.5, %v145_v8 }
 0x1a2   :  { %v147_v10 = vsub.f32 1.5, %v146_v9 }
 0x1a3   :  { %v247_v11 = vpop.eup %246 }
 0x1a4   :  { %v154_v12 = vmul.f32 %v247_v11, %v142_v6  ;;  %v148_v13 = vmul.f32 %v245_v5, %v147_v10  ;;  %vm160_vm4 = vweird.f32 %v247_v11 }
 0x1a5   :  { %vm161_vm6 = vmor %vm159_vm5, %vm160_vm4 }
 0x1a6   :  { %v155_v15 = vmul.f32 %v247_v11, %v154_v12  ;;  %v152_v16 = vsel %vm151_vm3, %v245_v5, %v148_v13 }
 0x1a7   :  { %v165_v17 = vmul.f32 %v163_v14, %v152_v16 }
 0x1a8   :  { %v156_v18 = vmul.f32 0.5, %v155_v15 }
 0x1a9   :  { %175 = vperm.xlu0 %239, %v165_v17   ;;  %v169_v20 = vmul.f32 %v165_v17, %v127_v57 }
 0x1aa   :  { %v157_v21 = vsub.f32 1.5, %v156_v18 }
 0x1ab   :  { %v171_v22 = vsub.f32 %v167_v19, %v169_v20 }
 0x1ac   :  { %v158_v23 = vmul.f32 %v247_v11, %v157_v21 }
 0x1ad   :  { %187 = vperm.xlu2 %241, %v171_v22  }
 0x1ae   :  { %v162_v25 = vsel %vm161_vm6, %v247_v11, %v158_v23 }
 0x1af   :  { %v166_v26 = vmul.f32 %v164_v24, %v162_v25 }
 0x1b1   :  { %180 = vperm.xlu1 %240, %v166_v26   ;;  %v170_v28 = vmul.f32 %v166_v26, %v128_v61 }
 0x1b3   :  { %v172_v29 = vsub.f32 %v168_v27, %v170_v28 }
 0x1b5   :  { %192 = vperm.xlu0 %239, %v172_v29  }
 0x207   :  { %v188_v32 = vpop.permute.xlu2 %187 }
 0x21b   :  { %v176_v30 = vpop.permute.xlu0 %175 }
 0x21c   :  { %v183_v31 = vmul.f32 %v176_v30, %v394_v43 }
 0x21e   :  { %v195_v33 = vadd.f32 %v188_v32, %v183_v31 }
 0x220   :  { %v197_v34 = vmax.f32 %v195_v33, 0.0 }
 0x222   :  { %199 = vst [vmem:[%s427_s5] sm:$0xff] %v197_v34 }
 0x223   :  { %v181_v35 = vpop.permute.xlu1 %180 }
 0x224   :  { %v184_v36 = vmul.f32 %v181_v35, %v397_v48 }
 0x227   :  { %v193_v37 = vpop.permute.xlu0 %192 }
 0x228   :  { %v196_v38 = vadd.f32 %v193_v37, %v184_v36 }
 0x22a   :  { %v198_v39 = vmax.f32 %v196_v38, 0.0 }
 0x22c   :  { %200 = vst [vmem:[%s427_s5 + $0x8] sm:$0xff] %v198_v39 }

// kernel: vae_forward.10
= control target key start
LH: loop header
LB: loop body
LE: loop exit
PB: predicated region body
PF: predicated region fallthrough
CT: control target
= control target key end

     0   :  { %v298_v11 = vmov 0   ;;  %vm90_vm0 = vcmask 130048   ;;  %vm189_vm1 = vcmask 261120   ;;  %s546_s0 = inlined_call_operand.vmem [shape: f32[1,400,32], index: 0, kind: input, shape index: {}]   ;;  %s547_s1 = inlined_call_operand.vmem [shape: f32[1,16,400], index: 1, kind: input, shape index: {}]   ;;  %s548_s2 = inlined_call_operand.vmem [shape: f32[16,1], index: 2, kind: input, shape index: {}]   ;;  %s549_s3 = inlined_call_operand.vmem [shape: f32[16,1], index: 3, kind: input, shape index: {}]   ;;  %s550_s4 = inlined_call_operand.vmem [shape: f32[16,1], index: 4, kind: input, shape index: {}]   ;;  %s551_s5 = inlined_call_operand.vmem [shape: f32[1,16,32], index: 5, kind: output, shape index: {}]  }
   0x1   :  { %v43_v0 = vld [vmem:[%s546_s0 + $0x78] sm:$0xff]  ;;  %v42_v2 = vld [vmem:[%s546_s0 + $0x70] sm:$0xff]  ;;  %v41_v5 = vld [vmem:[%s546_s0 + $0x68] sm:$0xff]  ;;  %289 = vset.pattern.permute.xlu0 %v298_v11  ;;  %291 = vset.pattern.permute.xlu2 %v298_v11 }
   0x2   :  { %v75_v1 = vld [vmem:[%s546_s0 + $0x178] sm:$0xff]  ;;  %97 = vmatpush.msra.mxu0 %v43_v0  ;;  %v74_v4 = vld [vmem:[%s546_s0 + $0x170] sm:$0xff]  ;;  %v73_v7 = vld [vmem:[%s546_s0 + $0x168] sm:$0xff]  ;;  %290 = vset.pattern.permute.xlu1 %v298_v11 }
   0x3   :  { %143 = vmatpush.msra.mxu2 %v75_v1  ;;  %v59_v3 = vld [vmem:[%s546_s0 + $0xf8] sm:$0xff]  ;;  %v58_v6 = vld [vmem:[%s546_s0 + $0xf0] sm:$0xff]  ;;  %v57_v8 = vld [vmem:[%s546_s0 + $0xe8] sm:$0xff] }
   0x4   :  { %120 = vmatpush.msra.mxu1 %v59_v3  ;;  %98 = vmatpush.msra.mxu0 %v42_v2  ;;  %v40_v9 = vld [vmem:[%s546_s0 + $0x60] sm:$0xff]  ;;  %v39_v13 = vld [vmem:[%s546_s0 + $0x58] sm:$0xff]  ;;  %v38_v16 = vld [vmem:[%s546_s0 + $0x50] sm:$0xff] }
   0x5   :  { %144 = vmatpush.msra.mxu2 %v74_v4  ;;  %v72_v10 = vld [vmem:[%s546_s0 + $0x160] sm:$0xff]  ;;  %v71_v14 = vld [vmem:[%s546_s0 + $0x158] sm:$0xff]  ;;  %v70_v17 = vld [vmem:[%s546_s0 + $0x150] sm:$0xff] }
   0x6   :  { %121 = vmatpush.msra.mxu1 %v58_v6  ;;  %99 = vmatpush.msra.mxu0 %v41_v5  ;;  %v56_v12 = vld [vmem:[%s546_s0 + $0xe0] sm:$0xff]  ;;  %v55_v15 = vld [vmem:[%s546_s0 + $0xd8] sm:$0xff]  ;;  %v54_v18 = vld [vmem:[%s546_s0 + $0xd0] sm:$0xff] }
   0x7   :  { %145 = vmatpush.msra.mxu2 %v73_v7  ;;  %v37_v19 = vld [vmem:[%s546_s0 + $0x48] sm:$0xff]  ;;  %v36_v22 = vld [vmem:[%s546_s0 + $0x40] sm:$0xff]  ;;  %v35_v25 = vld [vmem:[%s546_s0 + $0x38] sm:$0xff] }
   0x8   :  { %122 = vmatpush.msra.mxu1 %v57_v8  ;;  %100 = vmatpush.msra.mxu0 %v40_v9  ;;  %v69_v20 = vld [vmem:[%s546_s0 + $0x148] sm:$0xff]  ;;  %v68_v23 = vld [vmem:[%s546_s0 + $0x140] sm:$0xff]  ;;  %v67_v26 = vld [vmem:[%s546_s0 + $0x138] sm:$0xff] }
   0x9   :  { %146 = vmatpush.msra.mxu2 %v72_v10  ;;  %v53_v21 = vld [vmem:[%s546_s0 + $0xc8] sm:$0xff]  ;;  %v52_v24 = vld [vmem:[%s546_s0 + $0xc0] sm:$0xff]  ;;  %v51_v27 = vld [vmem:[%s546_s0 + $0xb8] sm:$0xff] }
   0xa   :  { %123 = vmatpush.msra.mxu1 %v56_v12  ;;  %101 = vmatpush.msra.mxu0 %v39_v13  ;;  %v77_v28 = vld [vmem:[%s546_s0 + $0x188] sm:$0xff]  ;;  %v34_v29 = vld [vmem:[%s546_s0 + $0x30] sm:$0xff]  ;;  %v76_v32 = vld [vmem:[%s546_s0 + $0x180] sm:$0xff] }
   0xb   :  { %147 = vmatpush.msra.mxu2 %v71_v14  ;;  %v66_v30 = vld [vmem:[%s546_s0 + $0x130] sm:$0xff]  ;;  %180 = vmatpush.msra.mxu3 %v77_v28  ;;  %v23_v33 = vld [vmem:[%s547_s1 + $0x18] sm:$0xff]  ;;  %v33_v34 = vld [vmem:[%s546_s0 + $0x28] sm:$0xff] }
   0xc   :  { %124 = vmatpush.msra.mxu1 %v55_v15  ;;  %102 = vmatpush.msra.mxu0 %v38_v16  ;;  %v50_v31 = vld [vmem:[%s546_s0 + $0xb0] sm:$0xff]  ;;  %v65_v35 = vld [vmem:[%s546_s0 + $0x128] sm:$0xff]  ;;  %v78_v37 = vld [vmem:[%s548_s2] sm:$0xff] }
   0xd   :  { %148 = vmatpush.msra.mxu2 %v70_v17  ;;  %181 = vmatpush.msra.mxu3 %v76_v32  ;;  %v49_v36 = vld [vmem:[%s546_s0 + $0xa8] sm:$0xff]  ;;  %v32_v38 = vld [vmem:[%s546_s0 + $0x20] sm:$0xff]  ;;  %v31_v41 = vld [vmem:[%s546_s0 + $0x18] sm:$0xff]  ;;  %v299_v17 = vmov 32.0  }
   0xe   :  { %125 = vmatpush.msra.mxu1 %v54_v18  ;;  %103 = vmatpush.msra.mxu0 %v37_v19  ;;  %v64_v39 = vld [vmem:[%s546_s0 + $0x120] sm:$0xff]  ;;  %v63_v42 = vld [vmem:[%s546_s0 + $0x118] sm:$0xff]  ;;  %v30_v44 = vld [vmem:[%s546_s0 + $0x10] sm:$0xff]  ;;  %292 = vrcp.f32 %v299_v17 }
   0xf   :  { %149 = vmatpush.msra.mxu2 %v69_v20  ;;  %285 = vmatmul.msk.f32.vlgmr.msra.gmra.mxu3 %vm90_vm0, %v23_v33  ;;  %v48_v40 = vld [vmem:[%s546_s0 + $0xa0] sm:$0xff]  ;;  %v47_v43 = vld [vmem:[%s546_s0 + $0x98] sm:$0xff]  ;;  %v62_v45 = vld [vmem:[%s546_s0 + $0x110] sm:$0xff] }
  0x10   :  { %126 = vmatpush.msra.mxu1 %v53_v21  ;;  %104 = vmatpush.msra.mxu0 %v36_v22  ;;  %v46_v46 = vld [vmem:[%s546_s0 + $0x90] sm:$0xff]  ;;  %v27_v47 = vld [vmem:[%s547_s1 + $0x38] sm:$0xff]  ;;  %v29_v48 = vld [vmem:[%s546_s0 + $0x8] sm:$0xff] }
  0x11   :  { %150 = vmatpush.msra.mxu2 %v68_v23  ;;  %82 = vperm.xlu0 %289, %v78_v37   ;;  %v61_v49 = vld [vmem:[%s546_s0 + $0x108] sm:$0xff]  ;;  %v28_v52 = vld [vmem:[%s546_s0] sm:$0xff]  ;;  %v22_v55 = vld [vmem:[%s547_s1 + $0x10] sm:$0xff] }
  0x12   :  { %127 = vmatpush.msra.mxu1 %v52_v24  ;;  %105 = vmatpush.msra.mxu0 %v35_v25  ;;  %v45_v50 = vld [vmem:[%s546_s0 + $0x88] sm:$0xff]  ;;  %v60_v53 = vld [vmem:[%s546_s0 + $0x100] sm:$0xff]  ;;  %v26_v59 = vld [vmem:[%s547_s1 + $0x30] sm:$0xff] }
  0x13   :  { %151 = vmatpush.msra.mxu2 %v67_v26  ;;  %v79_v51 = vld [vmem:[%s548_s2 + $0x8] sm:$0xff]  ;;  %v20_v54 = vld [vmem:[%s547_s1] sm:$0xff] }
  0x14   :  { %128 = vmatpush.msra.mxu1 %v51_v27  ;;  %106 = vmatpush.msra.mxu0 %v34_v29  ;;  %v44_v56 = vld [vmem:[%s546_s0 + $0x80] sm:$0xff]  ;;  %v21_v57 = vld [vmem:[%s547_s1 + $0x8] sm:$0xff]  ;;  %v293_v18 = vpop.eup %292 }
  0x15   :  { %152 = vmatpush.msra.mxu2 %v66_v30  ;;  %v24_v58 = vld [vmem:[%s547_s1 + $0x20] sm:$0xff]  ;;  %v25_v60 = vld [vmem:[%s547_s1 + $0x28] sm:$0xff]  ;;  %v199_v19 = vmul.f32 32.0, %v293_v18  ;;  %vm203_vm2 = vweird.f32 %v293_v18 }
  0x16   :  { %129 = vmatpush.msra.mxu1 %v50_v31  ;;  %107 = vmatpush.msra.mxu0 %v33_v34 }
  0x17   :  { %153 = vmatpush.msra.mxu2 %v65_v35  ;;  %286 = vmatmul.msk.f32.gmra.mxu3 %vm90_vm0, %v27_v47  ;;  %v200_v20 = vsub.f32 1.0, %v199_v19 }
  0x18   :  { %130 = vmatpush.msra.mxu1 %v49_v36  ;;  %108 = vmatpush.msra.mxu0 %v32_v38 }
  0x19   :  { %154 = vmatpush.msra.mxu2 %v64_v39  ;;  %87 = vperm.xlu0 %289, %v79_v51   ;;  %v201_v21 = vmul.f32 %v293_v18, %v200_v20 }
  0x1a   :  { %131 = vmatpush.msra.mxu1 %v48_v40  ;;  %109 = vmatpush.msra.mxu0 %v31_v41 }
  0x1b   :  { %155 = vmatpush.msra.mxu2 %v63_v42  ;;  %v202_v22 = vadd.f32 %v293_v18, %v201_v21 }
  0x1c   :  { %132 = vmatpush.msra.mxu1 %v47_v43  ;;  %110 = vmatpush.msra.mxu0 %v30_v44 }
  0x1d   :  { %156 = vmatpush.msra.mxu2 %v62_v45  ;;  %v204_v23 = vsel %vm203_vm2, %v293_v18, %v202_v22 }
  0x1e   :  { %133 = vmatpush.msra.mxu1 %v46_v46  ;;  %111 = vmatpush.msra.mxu0 %v29_v48  ;;  %v243_v48 = vld [vmem:[%s549_s3] sm:$0xff] }
  0x1f   :  { %157 = vmatpush.msra.mxu2 %v61_v49 }
  0x20   :  { %134 = vmatpush.msra.mxu1 %v45_v50  ;;  %112 = vmatpush.msra.mxu0 %v28_v52 }
  0x21   :  { %158 = vmatpush.msra.mxu2 %v60_v53  ;;  %113 = vmatmul.f32.vlgmr.msra.gmra.mxu0 %v20_v54  ;;  %v247_v53 = vld [vmem:[%s550_s4] sm:$0xff] }
  0x22   :  { %159 = vmatmul.f32.vlgmr.msra.gmra.mxu2 %v22_v55  ;;  %135 = vmatpush.msra.mxu1 %v44_v56 }
  0x23   :  { %136 = vmatmul.f32.vlgmr.msra.gmra.mxu1 %v21_v57 }
  0x29   :  { %116 = vmatmul.f32.gmra.mxu0 %v24_v58  ;;  %v244_v58 = vld [vmem:[%s549_s3 + $0x8] sm:$0xff] }
  0x2a   :  { %162 = vmatmul.f32.gmra.mxu2 %v26_v59 }
  0x2b   :  { %139 = vmatmul.f32.gmra.mxu1 %v25_v60 }
  0x83   :  { %v83_v61 = vpop.permute.xlu0 %82 }
  0x8b   :  { %v88_v5 = vpop.permute.xlu0 %87 }
  0x92   :  { %v183_v2 = vpop.f32.mrf.mxu3 }
  0x9a   :  { %v186_v13 = vpop.f32.mrf.mxu3 }
  0x9e   :  { %v114_v62 = vpop.f32.mrf.mxu0 }
  0x9f   :  { %v115_v63 = vadd.f32 %v114_v62, %v83_v61  ;;  %v248_v61 = vld [vmem:[%s550_s4 + $0x8] sm:$0xff] }
  0xa0   :  { %v137_v0 = vpop.f32.mrf.mxu1 }
  0xa1   :  { %v138_v1 = vadd.f32 %v137_v0, %v115_v63 }
  0xa5   :  { %v160_v3 = vpop.f32.mrf.mxu2 }
  0xa6   :  { %v161_v4 = vadd.f32 %v160_v3, %v138_v1  ;;  %v117_v6 = vpop.f32.mrf.mxu0 }
  0xa7   :  { %v118_v7 = vadd.f32 %v117_v6, %v88_v5 }
  0xa8   :  { %v512_v8 = vadd.f32 %v183_v2, %v161_v4  ;;  %v140_v9 = vpop.f32.mrf.mxu1 }
  0xa9   :  { %v141_v11 = vadd.f32 %v140_v9, %v118_v7 }
  0xaa   :  { %v190_v10 = vsel %vm189_vm1, %v512_v8, 0.0 }
  0xab   :  { %191 = vadd.xlane.f32.xlu1 %v190_v10 }
  0xad   :  { %v163_v12 = vpop.f32.mrf.mxu2 }
  0xae   :  { %v164_v14 = vadd.f32 %v163_v12, %v141_v11 }
  0xb0   :  { %v516_v15 = vadd.f32 %v186_v13, %v164_v14 }
  0xb2   :  { %v193_v16 = vsel %vm189_vm1, %v516_v15, 0.0 }
  0xb3   :  { %194 = vadd.xlane.f32.xlu1 %v193_v16 }
 0x11e   :  { %v192_v24 = vpop.xlane.xlu1 %191 }
 0x11f   :  { %v205_v25 = vmul.f32 %v204_v23, %v192_v24 }
 0x121   :  { %v207_v26 = vsub.f32 %v512_v8, %v205_v25 }
 0x123   :  { %v209_v27 = vmul.f32 %v207_v26, %v207_v26 }
 0x125   :  { %v211_v28 = vsel %vm189_vm1, %v209_v27, 0.0 }
 0x126   :  { %212 = vadd.xlane.f32.xlu2 %v211_v28  ;;  %v195_v29 = vpop.xlane.xlu1 %194 }
 0x127   :  { %v206_v30 = vmul.f32 %v204_v23, %v195_v29 }
 0x129   :  { %v208_v31 = vsub.f32 %v516_v15, %v206_v30 }
 0x12b   :  { %v210_v32 = vmul.f32 %v208_v31, %v208_v31 }
 0x12d   :  { %v214_v33 = vsel %vm189_vm1, %v210_v32, 0.0 }
 0x12e   :  { %215 = vadd.xlane.f32.xlu2 %v214_v33 }
 0x199   :  { %v213_v34 = vpop.xlane.xlu2 %212 }
 0x19a   :  { %v219_v35 = vmul.f32 %v213_v34, %v204_v23 }
 0x19c   :  { %v221_v36 = vadd.f32 1e-05, %v219_v35 }
 0x19e   :  { %294 = vrsqrt.f32 %v221_v36  ;;  %vm229_vm4 = vweird.f32 %v221_v36 }
 0x1a1   :  { %v216_v37 = vpop.xlane.xlu2 %215 }
 0x1a2   :  { %v220_v38 = vmul.f32 %v216_v37, %v204_v23 }
 0x1a4   :  { %v295_v39 = vpop.eup %294  ;;  %v222_v40 = vadd.f32 1e-05, %v220_v38 }
 0x1a5   :  { %v224_v41 = vmul.f32 %v295_v39, %v221_v36  ;;  %vm230_vm3 = vweird.f32 %v295_v39 }
 0x1a6   :  { %296 = vrsqrt.f32 %v222_v40  ;;  %vm231_vm5 = vmor %vm229_vm4, %vm230_vm3  ;;  %vm239_vm7 = vweird.f32 %v222_v40 }
 0x1a7   :  { %v225_v42 = vmul.f32 %v295_v39, %v224_v41 }
 0x1a9   :  { %v226_v43 = vmul.f32 0.5, %v225_v42 }
 0x1ab   :  { %v227_v44 = vsub.f32 1.5, %v226_v43 }
 0x1ac   :  { %v297_v45 = vpop.eup %296 }
 0x1ad   :  { %v234_v46 = vmul.f32 %v297_v45, %v222_v40  ;;  %v228_v47 = vmul.f32 %v295_v39, %v227_v44  ;;  %vm240_vm6 = vweird.f32 %v297_v45 }
 0x1ae   :  { %vm241_vm8 = vmor %vm239_vm7, %vm240_vm6 }
 0x1af   :  { %v235_v49 = vmul.f32 %v297_v45, %v234_v46  ;;  %v232_v50 = vsel %vm231_vm5, %v295_v39, %v228_v47 }
 0x1b0   :  { %v245_v51 = vmul.f32 %v243_v48, %v232_v50 }
 0x1b1   :  { %v236_v52 = vmul.f32 0.5, %v235_v49 }
 0x1b2   :  { %255 = vperm.xlu0 %289, %v245_v51   ;;  %v249_v54 = vmul.f32 %v245_v51, %v205_v25 }
 0x1b3   :  { %v237_v55 = vsub.f32 1.5, %v236_v52 }
 0x1b4   :  { %v251_v56 = vsub.f32 %v247_v53, %v249_v54 }
 0x1b5   :  { %v238_v57 = vmul.f32 %v297_v45, %v237_v55 }
 0x1b6   :  { %267 = vperm.xlu2 %291, %v251_v56  }
 0x1b7   :  { %v242_v59 = vsel %vm241_vm8, %v297_v45, %v238_v57 }
 0x1b8   :  { %v246_v60 = vmul.f32 %v244_v58, %v242_v59 }
 0x1ba   :  { %260 = vperm.xlu1 %290, %v246_v60   ;;  %v250_v62 = vmul.f32 %v246_v60, %v206_v30 }
 0x1bc   :  { %v252_v63 = vsub.f32 %v248_v61, %v250_v62 }
 0x1be   :  { %272 = vperm.xlu0 %289, %v252_v63  }
 0x210   :  { %v268_v2 = vpop.permute.xlu2 %267 }
 0x224   :  { %v256_v0 = vpop.permute.xlu0 %255 }
 0x225   :  { %v263_v1 = vmul.f32 %v256_v0, %v512_v8 }
 0x227   :  { %v275_v3 = vadd.f32 %v268_v2, %v263_v1 }
 0x229   :  { %v277_v4 = vmax.f32 %v275_v3, 0.0 }
 0x22b   :  { %279 = vst.msk [vmem:[%s551_s5] sm:$0xff] %vm189_vm1, %v277_v4 }
 0x22c   :  { %v261_v5 = vpop.permute.xlu1 %260 }
 0x22d   :  { %v264_v6 = vmul.f32 %v261_v5, %v516_v15 }
 0x230   :  { %v273_v7 = vpop.permute.xlu0 %272 }
 0x231   :  { %v276_v9 = vadd.f32 %v273_v7, %v264_v6 }
 0x233   :  { %v278_v10 = vmax.f32 %v276_v9, 0.0 }
 0x235   :  { %280 = vst.msk [vmem:[%s551_s5 + $0x8] sm:$0xff] %vm189_vm1, %v278_v10 }

// kernel: vae_forward.11
= control target key start
LH: loop header
LB: loop body
LE: loop exit
PB: predicated region body
PF: predicated region fallthrough
CT: control target
= control target key end

     0   :  { %v300_v3 = vmov 0   ;;  %vm60_vm0 = vcmask 130048   ;;  %s451_s0 = inlined_call_operand.vmem [shape: f32[144,8], index: 0, kind: input, shape index: {}]   ;;  %s452_s1 = inlined_call_operand.vmem [shape: f32[16,144], index: 1, kind: input, shape index: {}]   ;;  %s453_s2 = inlined_call_operand.vmem [shape: f32[16,1], index: 2, kind: input, shape index: {}]   ;;  %s454_s3 = inlined_call_operand.vmem [shape: f32[16,1], index: 3, kind: input, shape index: {}]   ;;  %s455_s4 = inlined_call_operand.vmem [shape: f32[16,1], index: 4, kind: input, shape index: {}]   ;;  %s456_s5 = inlined_call_operand.vmem [shape: f32[8,8], index: 5, kind: input, shape index: {}]   ;;  %s457_s6 = inlined_call_operand.vmem [shape: f32[8,8], index: 6, kind: output, shape index: {0}]   ;;  %s458_s7 = inlined_call_operand.hbm [shape: f32[1,1], index: 7, kind: output, shape index: {1}]  }
   0x1   :  { %v45_v0 = vld [vmem:[%s451_s0 + $0x78] sm:$0xff]  ;;  %v44_v1 = vld [vmem:[%s451_s0 + $0x70] sm:$0xff]  ;;  %v43_v2 = vld [vmem:[%s451_s0 + $0x68] sm:$0xff]  ;;  %261 = vset.pattern.permute.xlu0 %v300_v3  ;;  %262 = vset.pattern.permute.xlu1 %v300_v3 }
   0x2   :  { %67 = vmatpush.msra.mxu0 %v45_v0  ;;  %242 = vmatpush.msra.mxu2 %v45_v0  ;;  %v42_v4 = vld [vmem:[%s451_s0 + $0x60] sm:$0xff]  ;;  %v49_v5 = vld [vmem:[%s453_s2 + $0x8] sm:$0xff]  ;;  %v41_v7 = vld [vmem:[%s451_s0 + $0x58] sm:$0xff] }
   0x3   :  { %263 = vset.pattern.permute.xlu2 %v300_v3  ;;  %v47_v6 = vld [vmem:[%s451_s0 + $0x88] sm:$0xff]  ;;  %57 = vperm.xlu0 %261, %v49_v5   ;;  %v46_v8 = vld [vmem:[%s451_s0 + $0x80] sm:$0xff]  ;;  %v40_v10 = vld [vmem:[%s451_s0 + $0x50] sm:$0xff] }
   0x4   :  { %68 = vmatpush.msra.mxu0 %v44_v1  ;;  %243 = vmatpush.msra.mxu2 %v44_v1  ;;  %v27_v9 = vld [vmem:[%s452_s1 + $0x8] sm:$0xff] }
   0x5   :  { %104 = vmatpush.msra.mxu1 %v47_v6 }
   0x6   :  { %69 = vmatpush.msra.mxu0 %v43_v2  ;;  %244 = vmatpush.msra.mxu2 %v43_v2 }
   0x7   :  { %105 = vmatpush.msra.mxu1 %v46_v8 }
   0x8   :  { %70 = vmatpush.msra.mxu0 %v42_v4  ;;  %245 = vmatpush.msra.mxu2 %v42_v4 }
   0x9   :  { %13 = vsyncpa [#allocation3], 0  ;;  %v39_v11 = vld [vmem:[%s451_s0 + $0x48] sm:$0xff]  ;;  %239 = vmatmul.msk.f32.vlgmr.msra.gmra.mxu1 %vm60_vm0, %v27_v9  ;;  %v48_v12 = vld [vmem:[%s453_s2] sm:$0xff]  ;;  %vm113_vm1 = vcmask 64512   ;;  %v301_v39 = vmov 8.0  }
   0xa   :  { %71 = vmatpush.msra.mxu0 %v41_v7  ;;  %246 = vmatpush.msra.mxu2 %v41_v7  ;;  %v38_v13 = vld [vmem:[%s451_s0 + $0x40] sm:$0xff]  ;;  %v37_v14 = vld [vmem:[%s451_s0 + $0x38] sm:$0xff]  ;;  %v36_v16 = vld [vmem:[%s451_s0 + $0x30] sm:$0xff]  ;;  %264 = vrcp.f32 %v301_v39  ;;  %s228_s12 = sshll.u32 %s458_s7, 4  ;;  %vm210_vm9 = vcmask 0   ;;  %s229_s12 = int_to_ptr.hbm [resolvable:$true] %s228_s12 }
   0xb   :  { %52 = vperm.xlu0 %261, %v48_v12   ;;  %v29_v15 = vld [vmem:[%s452_s1 + $0x18] sm:$0xff]  ;;  %v35_v17 = vld [vmem:[%s451_s0 + $0x28] sm:$0xff]  ;;  %v34_v19 = vld [vmem:[%s451_s0 + $0x20] sm:$0xff] }
   0xc   :  { %72 = vmatpush.msra.mxu0 %v40_v10  ;;  %247 = vmatpush.msra.mxu2 %v40_v10  ;;  %v166_v18 = vld [vmem:[%s454_s3 + $0x8] sm:$0xff]  ;;  %v33_v20 = vld [vmem:[%s451_s0 + $0x18] sm:$0xff]  ;;  %v32_v21 = vld [vmem:[%s451_s0 + $0x10] sm:$0xff] }
   0xd   :  { %v31_v22 = vld [vmem:[%s451_s0 + $0x8] sm:$0xff]  ;;  %v179_v23 = vld [vmem:[%s455_s4] sm:$0xff]  ;;  %v28_v26 = vld [vmem:[%s452_s1 + $0x10] sm:$0xff] }
   0xe   :  { %73 = vmatpush.msra.mxu0 %v39_v11  ;;  %248 = vmatpush.msra.mxu2 %v39_v11  ;;  %v30_v24 = vld [vmem:[%s451_s0] sm:$0xff]  ;;  %v180_v42 = vld [vmem:[%s455_s4 + $0x8] sm:$0xff] }
   0xf   :  { %v26_v25 = vld [vmem:[%s452_s1] sm:$0xff] }
  0x10   :  { %74 = vmatpush.msra.mxu0 %v38_v13  ;;  %249 = vmatpush.msra.mxu2 %v38_v13  ;;  %v265_v40 = vpop.eup %264  ;;  %v165_v57 = vld [vmem:[%s454_s3] sm:$0xff] }
  0x11   :  { %240 = vmatmul.msk.f32.gmra.mxu1 %vm60_vm0, %v29_v15  ;;  %v121_v41 = vmul.f32 8.0, %v265_v40  ;;  %vm125_vm2 = vweird.f32 %v265_v40 }
  0x12   :  { %75 = vmatpush.msra.mxu0 %v37_v14  ;;  %250 = vmatpush.msra.mxu2 %v37_v14 }
  0x13   :  { %174 = vperm.xlu0 %261, %v166_v18   ;;  %v122_v43 = vsub.f32 1.0, %v121_v41 }
  0x14   :  { %76 = vmatpush.msra.mxu0 %v36_v16  ;;  %251 = vmatpush.msra.mxu2 %v36_v16 }
  0x15   :  { %v123_v44 = vmul.f32 %v265_v40, %v122_v43 }
  0x16   :  { %77 = vmatpush.msra.mxu0 %v35_v17  ;;  %252 = vmatpush.msra.mxu2 %v35_v17 }
  0x17   :  { %v124_v46 = vadd.f32 %v265_v40, %v123_v44 }
  0x18   :  { %78 = vmatpush.msra.mxu0 %v34_v19  ;;  %253 = vmatpush.msra.mxu2 %v34_v19 }
  0x19   :  { %v428_v47 = vsel %vm125_vm2, %v265_v40, %v124_v46 }
  0x1a   :  { %79 = vmatpush.msra.mxu0 %v33_v20  ;;  %254 = vmatpush.msra.mxu2 %v33_v20 }
  0x1b   :  { %183 = vperm.xlu0 %261, %v179_v23  }
  0x1c   :  { %80 = vmatpush.msra.mxu0 %v32_v21  ;;  %255 = vmatpush.msra.mxu2 %v32_v21 }
  0x1e   :  { %81 = vmatpush.msra.mxu0 %v31_v22  ;;  %256 = vmatpush.msra.mxu2 %v31_v22 }
  0x20   :  { %82 = vmatpush.msra.mxu0 %v30_v24  ;;  %257 = vmatpush.msra.mxu2 %v30_v24 }
  0x21   :  { %83 = vmatmul.f32.vlgmr.msra.gmra.mxu0 %v26_v25  ;;  %86 = vmatmul.f32.vlgmr.msra.gmra.mxu2 %v28_v26 }
  0x75   :  { %v58_v28 = vpop.permute.xlu0 %57 }
  0x7d   :  { %v53_v34 = vpop.permute.xlu0 %52 }
  0x85   :  { %v175_v12 = vpop.permute.xlu0 %174 }
  0x86   :  { %v107_v27 = vpop.f32.mrf.mxu1 }
  0x8d   :  { %v184_v24 = vpop.permute.xlu0 %183 }
  0x8e   :  { %v110_v30 = vpop.f32.mrf.mxu1 }
  0x9e   :  { %v84_v32 = vpop.f32.mrf.mxu0 }
  0x9f   :  { %v85_v35 = vadd.f32 %v84_v32, %v53_v34 }
  0xa1   :  { %v108_v37 = vadd.f32 %v107_v27, %v85_v35 }
  0xa3   :  { %v114_v38 = vsel %vm113_vm1, %v108_v37, 0.0 }
  0xa4   :  { %v87_v29 = vpop.f32.mrf.mxu2 }
  0xa5   :  { %v88_v31 = vadd.f32 %v87_v29, %v58_v28  ;;  %v215_v29 = vld [vmem:[%s456_s5] sm:$0xff]  ;;  %s302_s5 = smov [#allocation2]  }
  0xa6   :  { %s226_s2 = sshll.u32 %s302_s5, 4  ;;  %s227_s2 = int_to_ptr.vmem [resolvable:$true] %s226_s2 }
  0xa7   :  { %v111_v33 = vadd.f32 %v110_v30, %v88_v31 }
  0xa9   :  { %v117_v36 = vsel %vm113_vm1, %v111_v33, 0.0 }
  0xaa   :  { %118 = vadd.xlane.f32.xlu1 %v117_v36 }
  0xb2   :  { %115 = vadd.xlane.f32.xlu1 %v114_v38 }
  0xcb   :  { %188 = vperm.xlu1 %262, %v180_v42  }
 0x11d   :  { %v119_v45 = vpop.xlane.xlu1 %118 }
 0x11e   :  { %v128_v50 = vmul.f32 %v428_v47, %v119_v45 }
 0x120   :  { %v130_v53 = vsub.f32 %v111_v33, %v128_v50 }
 0x122   :  { %v132_v55 = vmul.f32 %v130_v53, %v130_v53 }
 0x124   :  { %v136_v56 = vsel %vm113_vm1, %v132_v55, 0.0 }
 0x125   :  { %v116_v48 = vpop.xlane.xlu1 %115 }
 0x126   :  { %v127_v49 = vmul.f32 %v428_v47, %v116_v48 }
 0x128   :  { %v129_v51 = vsub.f32 %v108_v37, %v127_v49 }
 0x12a   :  { %v131_v52 = vmul.f32 %v129_v51, %v129_v51 }
 0x12c   :  { %v133_v54 = vsel %vm113_vm1, %v131_v52, 0.0 }
 0x12d   :  { %134 = vadd.xlane.f32.xlu2 %v133_v54 }
 0x135   :  { %137 = vadd.xlane.f32.xlu2 %v136_v56 }
 0x13d   :  { %v189_v17 = vpop.permute.xlu1 %188 }
 0x14d   :  { %169 = vperm.xlu2 %263, %v165_v57  }
 0x1a0   :  { %v135_v58 = vpop.xlane.xlu2 %134 }
 0x1a1   :  { %v139_v59 = vmul.f32 %v135_v58, %v428_v47 }
 0x1a3   :  { %v141_v60 = vadd.f32 1e-05, %v139_v59 }
 0x1a5   :  { %266 = vrsqrt.f32 %v141_v60  ;;  %vm149_vm5 = vweird.f32 %v141_v60 }
 0x1a8   :  { %v138_v61 = vpop.xlane.xlu2 %137 }
 0x1a9   :  { %v140_v62 = vmul.f32 %v138_v61, %v428_v47 }
 0x1ab   :  { %v267_v63 = vpop.eup %266  ;;  %v142_v0 = vadd.f32 1e-05, %v140_v62 }
 0x1ac   :  { %v144_v1 = vmul.f32 %v267_v63, %v141_v60  ;;  %vm150_vm3 = vweird.f32 %v267_v63 }
 0x1ad   :  { %268 = vrsqrt.f32 %v142_v0  ;;  %vm159_vm6 = vweird.f32 %v142_v0  ;;  %vm151_vm7 = vmor %vm149_vm5, %vm150_vm3 }
 0x1ae   :  { %v145_v2 = vmul.f32 %v267_v63, %v144_v1 }
 0x1b0   :  { %v146_v3 = vmul.f32 0.5, %v145_v2  ;;  %v170_v18 = vpop.permute.xlu2 %169 }
 0x1b2   :  { %v147_v6 = vsub.f32 1.5, %v146_v3 }
 0x1b3   :  { %v269_v4 = vpop.eup %268 }
 0x1b4   :  { %v154_v5 = vmul.f32 %v269_v4, %v142_v0  ;;  %v148_v9 = vmul.f32 %v267_v63, %v147_v6  ;;  %vm160_vm4 = vweird.f32 %v269_v4 }
 0x1b5   :  { %vm161_vm8 = vmor %vm159_vm6, %vm160_vm4 }
 0x1b6   :  { %v155_v7 = vmul.f32 %v269_v4, %v154_v5  ;;  %v152_v13 = vsel %vm151_vm7, %v267_v63, %v148_v9 }
 0x1b7   :  { %v163_v16 = vmul.f32 %v152_v13, %v129_v51 }
 0x1b8   :  { %v156_v8 = vmul.f32 0.5, %v155_v7 }
 0x1b9   :  { %v177_v21 = vmul.f32 %v170_v18, %v163_v16 }
 0x1ba   :  { %v157_v10 = vsub.f32 1.5, %v156_v8 }
 0x1bb   :  { %v191_v26 = vadd.f32 %v184_v24, %v177_v21 }
 0x1bc   :  { %v158_v11 = vmul.f32 %v269_v4, %v157_v10 }
 0x1bd   :  { %v195_v27 = vmul.f32 %v191_v26, %v191_v26 }
 0x1be   :  { %v162_v14 = vsel %vm161_vm8, %v269_v4, %v158_v11 }
 0x1bf   :  { %v164_v15 = vmul.f32 %v162_v14, %v130_v53 }
 0x1c1   :  { %v178_v19 = vmul.f32 %v175_v12, %v164_v15 }
 0x1c3   :  { %v192_v20 = vadd.f32 %v189_v17, %v178_v19 }
 0x1c5   :  { %v193_v22 = vmul.f32 1.442695, %v192_v20  ;;  %v212_v23 = vmul.f32 0.5, %v192_v20 }
 0x1c7   :  { %270 = vpow2.f32 %v193_v22  ;;  %v213_v25 = vmul.f32 1.442695, %v212_v23 }
 0x1c9   :  { %272 = vpow2.f32 %v213_v25 }
 0x1cd   :  { %v271_v28 = vpop.eup %270 }
 0x1ce   :  { %v196_v30 = vadd.f32 %v271_v28, %v195_v27 }
 0x1cf   :  { %v273_v31 = vpop.eup %272 }
 0x1d0   :  { %v216_v32 = vmul.f32 %v273_v31, %v215_v29  ;;  %v241_v33 = vadd.f32 -1.0, %v196_v30 }
 0x1d2   :  { %v217_v34 = vadd.f32 %v216_v32, %v191_v26  ;;  %v198_v35 = vsub.f32 %v241_v33, %v192_v20 }
 0x1d4   :  { %218 = vst.msk [vmem:[%s457_s6] sm:$0xff] %vm113_vm1, %v217_v34  ;;  %v199_v36 = vmul.f32 0.5, %v198_v35 }
 0x1d6   :  { %v200_v37 = vsel %vm113_vm1, %v199_v36, 0.0 }
 0x1d7   :  { %201 = vadd.xlane.f32.xlu0 %v200_v37 }
 0x24a   :  { %v202_v38 = vpop.xlane.xlu0 %201 }
 0x24b   :  { %v203_v39 = vrot.slane %v202_v38, 4 }
 0x24d   :  { %v204_v40 = vadd.f32 %v203_v39, %v202_v38 }
 0x24f   :  { %v205_v41 = vrot.slane %v204_v40, 2 }
 0x251   :  { %v206_v42 = vadd.f32 %v205_v41, %v204_v40 }
 0x253   :  { %v207_v43 = vrot.slane %v206_v42, 1 }
 0x255   :  { %v208_v44 = vadd.f32 %v207_v43, %v206_v42 }
 0x257   :  { %v209_v45 = vmul.f32 %v208_v44, %v428_v47 }
 0x259   :  { %211 = vst.msk [vmem:[#allocation2] sm:$0x1] %vm210_vm9, %v209_v45 }
 0x25a   :  { %231 = dma.vmem_to_hbm [thread:$0]  %s227_s2, 16, %s229_s12, [#allocation3]  }
 0x25b   :  { %298 = dma.done.wait [#allocation3], 16  }
 0x25c   :  { %299 = vsyncadd [#allocation3], 4294967280 }
 0x25d   :  { %238 = vsyncpa [#allocation3], 1 }

// kernel: vae_forward.12
= control target key start
LH: loop header
LB: loop body
LE: loop exit
PB: predicated region body
PF: predicated region fallthrough
CT: control target
= control target key end

     0   :  { %v191_v2 = vmov 0   ;;  %vm43_vm0 = vcmask 588800   ;;  %vm73_vm1 = vcmask 261120   ;;  %v192_v22 = vmov 32.0   ;;  %s296_s0 = inlined_call_operand.vmem [shape: f32[1,72,32], index: 0, kind: input, shape index: {}]   ;;  %s297_s2 = inlined_call_operand.vmem [shape: f32[16,1], index: 2, kind: input, shape index: {}]   ;;  %s298_s1 = inlined_call_operand.vmem [shape: f32[1,16,72], index: 1, kind: input, shape index: {}]   ;;  %s299_s3 = inlined_call_operand.vmem [shape: f32[16,1], index: 3, kind: input, shape index: {}]   ;;  %s300_s4 = inlined_call_operand.vmem [shape: f32[16,1], index: 4, kind: input, shape index: {}]   ;;  %s301_s5 = inlined_call_operand.vmem [shape: f32[1,16,32], index: 5, kind: output, shape index: {}]  }
   0x1   :  { %v30_v0 = vld [vmem:[%s296_s0 + $0x40] sm:$0xff]  ;;  %v29_v1 = vld [vmem:[%s296_s0 + $0x38] sm:$0xff]  ;;  %182 = vset.pattern.permute.xlu0 %v191_v2  ;;  %184 = vset.pattern.permute.xlu2 %v191_v2  ;;  %v28_v3 = vld [vmem:[%s296_s0 + $0x30] sm:$0xff]  ;;  %185 = vrcp.f32 %v192_v22 }
   0x2   :  { %57 = vmatpush.msra.mxu0 %v30_v0  ;;  %171 = vmatpush.msra.mxu1 %v30_v0  ;;  %v31_v4 = vld [vmem:[%s297_s2] sm:$0xff]  ;;  %v27_v5 = vld [vmem:[%s296_s0 + $0x28] sm:$0xff]  ;;  %v25_v7 = vld [vmem:[%s296_s0 + $0x18] sm:$0xff] }
   0x3   :  { %183 = vset.pattern.permute.xlu1 %v191_v2  ;;  %35 = vperm.xlu0 %182, %v31_v4   ;;  %v26_v6 = vld [vmem:[%s296_s0 + $0x20] sm:$0xff]  ;;  %v32_v8 = vld [vmem:[%s297_s2 + $0x8] sm:$0xff]  ;;  %v24_v9 = vld [vmem:[%s296_s0 + $0x10] sm:$0xff] }
   0x4   :  { %58 = vmatpush.msra.mxu0 %v29_v1  ;;  %172 = vmatpush.msra.mxu1 %v29_v1  ;;  %v23_v10 = vld [vmem:[%s296_s0 + $0x8] sm:$0xff]  ;;  %v22_v11 = vld [vmem:[%s296_s0] sm:$0xff] }
   0x5   :  { %v20_v12 = vld [vmem:[%s298_s1] sm:$0xff]  ;;  %v21_v13 = vld [vmem:[%s298_s1 + $0x8] sm:$0xff] }
   0x6   :  { %59 = vmatpush.msra.mxu0 %v28_v3  ;;  %173 = vmatpush.msra.mxu1 %v28_v3  ;;  %v127_v53 = vld [vmem:[%s299_s3] sm:$0xff]  ;;  %v128_v63 = vld [vmem:[%s299_s3 + $0x8] sm:$0xff] }
   0x7   :  { %v186_v23 = vpop.eup %185  ;;  %v131_v58 = vld [vmem:[%s300_s4] sm:$0xff]  ;;  %v132_v2 = vld [vmem:[%s300_s4 + $0x8] sm:$0xff] }
   0x8   :  { %60 = vmatpush.msra.mxu0 %v27_v5  ;;  %174 = vmatpush.msra.mxu1 %v27_v5  ;;  %v83_v24 = vmul.f32 32.0, %v186_v23  ;;  %vm87_vm2 = vweird.f32 %v186_v23 }
   0xa   :  { %61 = vmatpush.msra.mxu0 %v26_v6  ;;  %175 = vmatpush.msra.mxu1 %v26_v6  ;;  %v84_v25 = vsub.f32 1.0, %v83_v24 }
   0xb   :  { %40 = vperm.xlu0 %182, %v32_v8  }
   0xc   :  { %62 = vmatpush.msra.mxu0 %v25_v7  ;;  %176 = vmatpush.msra.mxu1 %v25_v7  ;;  %v85_v26 = vmul.f32 %v186_v23, %v84_v25 }
   0xe   :  { %63 = vmatpush.msra.mxu0 %v24_v9  ;;  %177 = vmatpush.msra.mxu1 %v24_v9  ;;  %v86_v27 = vadd.f32 %v186_v23, %v85_v26 }
  0x10   :  { %64 = vmatpush.msra.mxu0 %v23_v10  ;;  %178 = vmatpush.msra.mxu1 %v23_v10  ;;  %v88_v28 = vsel %vm87_vm2, %v186_v23, %v86_v27 }
  0x12   :  { %65 = vmatpush.msra.mxu0 %v22_v11  ;;  %179 = vmatpush.msra.mxu1 %v22_v11 }
  0x13   :  { %169 = vmatmul.msk.f32.vlgmr.msra.gmra.mxu0 %vm43_vm0, %v20_v12  ;;  %170 = vmatmul.msk.f32.vlgmr.msra.gmra.mxu1 %vm43_vm0, %v21_v13 }
  0x75   :  { %v36_v14 = vpop.permute.xlu0 %35 }
  0x7d   :  { %v41_v18 = vpop.permute.xlu0 %40 }
  0x90   :  { %v67_v15 = vpop.f32.mrf.mxu0  ;;  %v70_v19 = vpop.f32.mrf.mxu1 }
  0x91   :  { %v262_v16 = vadd.f32 %v67_v15, %v36_v14  ;;  %v266_v20 = vadd.f32 %v70_v19, %v41_v18 }
  0x93   :  { %v74_v17 = vsel %vm73_vm1, %v262_v16, 0.0  ;;  %v77_v21 = vsel %vm73_vm1, %v266_v20, 0.0 }
  0x94   :  { %75 = vadd.xlane.f32.xlu1 %v74_v17 }
  0x9c   :  { %78 = vadd.xlane.f32.xlu1 %v77_v21 }
 0x107   :  { %v76_v29 = vpop.xlane.xlu1 %75 }
 0x108   :  { %v89_v30 = vmul.f32 %v88_v28, %v76_v29 }
 0x10a   :  { %v91_v31 = vsub.f32 %v262_v16, %v89_v30 }
 0x10c   :  { %v93_v32 = vmul.f32 %v91_v31, %v91_v31 }
 0x10e   :  { %v95_v33 = vsel %vm73_vm1, %v93_v32, 0.0 }
 0x10f   :  { %96 = vadd.xlane.f32.xlu2 %v95_v33  ;;  %v79_v34 = vpop.xlane.xlu1 %78 }
 0x110   :  { %v90_v35 = vmul.f32 %v88_v28, %v79_v34 }
 0x112   :  { %v92_v36 = vsub.f32 %v266_v20, %v90_v35 }
 0x114   :  { %v94_v37 = vmul.f32 %v92_v36, %v92_v36 }
 0x116   :  { %v98_v38 = vsel %vm73_vm1, %v94_v37, 0.0 }
 0x117   :  { %99 = vadd.xlane.f32.xlu2 %v98_v38 }
 0x182   :  { %v97_v39 = vpop.xlane.xlu2 %96 }
 0x183   :  { %v103_v40 = vmul.f32 %v97_v39, %v88_v28 }
 0x185   :  { %v105_v41 = vadd.f32 1e-05, %v103_v40 }
 0x187   :  { %187 = vrsqrt.f32 %v105_v41  ;;  %vm113_vm4 = vweird.f32 %v105_v41 }
 0x18a   :  { %v100_v42 = vpop.xlane.xlu2 %99 }
 0x18b   :  { %v104_v43 = vmul.f32 %v100_v42, %v88_v28 }
 0x18d   :  { %v188_v44 = vpop.eup %187  ;;  %v106_v45 = vadd.f32 1e-05, %v104_v43 }
 0x18e   :  { %v108_v46 = vmul.f32 %v188_v44, %v105_v41  ;;  %vm114_vm3 = vweird.f32 %v188_v44 }
 0x18f   :  { %189 = vrsqrt.f32 %v106_v45  ;;  %vm115_vm5 = vmor %vm113_vm4, %vm114_vm3  ;;  %vm123_vm7 = vweird.f32 %v106_v45 }
 0x190   :  { %v109_v47 = vmul.f32 %v188_v44, %v108_v46 }
 0x192   :  { %v110_v48 = vmul.f32 0.5, %v109_v47 }
 0x194   :  { %v111_v49 = vsub.f32 1.5, %v110_v48 }
 0x195   :  { %v190_v50 = vpop.eup %189 }
 0x196   :  { %v118_v51 = vmul.f32 %v190_v50, %v106_v45  ;;  %v112_v52 = vmul.f32 %v188_v44, %v111_v49  ;;  %vm124_vm6 = vweird.f32 %v190_v50 }
 0x197   :  { %vm125_vm8 = vmor %vm123_vm7, %vm124_vm6 }
 0x198   :  { %v119_v54 = vmul.f32 %v190_v50, %v118_v51  ;;  %v116_v55 = vsel %vm115_vm5, %v188_v44, %v112_v52 }
 0x199   :  { %v129_v56 = vmul.f32 %v127_v53, %v116_v55 }
 0x19a   :  { %v120_v57 = vmul.f32 0.5, %v119_v54 }
 0x19b   :  { %139 = vperm.xlu0 %182, %v129_v56   ;;  %v133_v59 = vmul.f32 %v129_v56, %v89_v30 }
 0x19c   :  { %v121_v60 = vsub.f32 1.5, %v120_v57 }
 0x19d   :  { %v135_v61 = vsub.f32 %v131_v58, %v133_v59 }
 0x19e   :  { %v122_v62 = vmul.f32 %v190_v50, %v121_v60 }
 0x19f   :  { %151 = vperm.xlu2 %184, %v135_v61  }
 0x1a0   :  { %v126_v0 = vsel %vm125_vm8, %v190_v50, %v122_v62 }
 0x1a1   :  { %v130_v1 = vmul.f32 %v128_v63, %v126_v0 }
 0x1a3   :  { %144 = vperm.xlu1 %183, %v130_v1   ;;  %v134_v3 = vmul.f32 %v130_v1, %v90_v35 }
 0x1a5   :  { %v136_v4 = vsub.f32 %v132_v2, %v134_v3 }
 0x1a7   :  { %156 = vperm.xlu0 %182, %v136_v4  }
 0x1f9   :  { %v152_v7 = vpop.permute.xlu2 %151 }
 0x20d   :  { %v140_v5 = vpop.permute.xlu0 %139 }
 0x20e   :  { %v147_v6 = vmul.f32 %v140_v5, %v262_v16 }
 0x210   :  { %v159_v8 = vadd.f32 %v152_v7, %v147_v6 }
 0x212   :  { %v161_v9 = vmax.f32 %v159_v8, 0.0 }
 0x214   :  { %163 = vst.msk [vmem:[%s301_s5] sm:$0xff] %vm73_vm1, %v161_v9 }
 0x215   :  { %v145_v10 = vpop.permute.xlu1 %144 }
 0x216   :  { %v148_v11 = vmul.f32 %v145_v10, %v266_v20 }
 0x219   :  { %v157_v12 = vpop.permute.xlu0 %156 }
 0x21a   :  { %v160_v13 = vadd.f32 %v157_v12, %v148_v11 }
 0x21c   :  { %v162_v14 = vmax.f32 %v160_v13, 0.0 }
 0x21e   :  { %164 = vst.msk [vmem:[%s301_s5 + $0x8] sm:$0xff] %vm73_vm1, %v162_v14 }

// kernel: vae_forward.13
= control target key start
LH: loop header
LB: loop body
LE: loop exit
PB: predicated region body
PF: predicated region fallthrough
CT: control target
= control target key end

     0   :  { %v293_v11 = vmov 0   ;;  %vm90_vm0 = vcmask 130048   ;;  %s535_s0 = inlined_call_operand.vmem [shape: f32[1,400,128], index: 0, kind: input, shape index: {}]   ;;  %s536_s1 = inlined_call_operand.vmem [shape: f32[1,16,400], index: 1, kind: input, shape index: {}]   ;;  %s537_s2 = inlined_call_operand.vmem [shape: f32[16,1], index: 2, kind: input, shape index: {}]   ;;  %s538_s3 = inlined_call_operand.vmem [shape: f32[16,1], index: 3, kind: input, shape index: {}]   ;;  %s539_s4 = inlined_call_operand.vmem [shape: f32[16,1], index: 4, kind: input, shape index: {}]   ;;  %s540_s5 = inlined_call_operand.vmem [shape: f32[1,16,128], index: 5, kind: output, shape index: {}]  }
   0x1   :  { %v43_v0 = vld [vmem:[%s535_s0 + $0x78] sm:$0xff]  ;;  %v42_v2 = vld [vmem:[%s535_s0 + $0x70] sm:$0xff]  ;;  %v41_v5 = vld [vmem:[%s535_s0 + $0x68] sm:$0xff]  ;;  %284 = vset.pattern.permute.xlu0 %v293_v11  ;;  %286 = vset.pattern.permute.xlu2 %v293_v11 }
   0x2   :  { %v75_v1 = vld [vmem:[%s535_s0 + $0x178] sm:$0xff]  ;;  %97 = vmatpush.msra.mxu0 %v43_v0  ;;  %v74_v4 = vld [vmem:[%s535_s0 + $0x170] sm:$0xff]  ;;  %v73_v7 = vld [vmem:[%s535_s0 + $0x168] sm:$0xff]  ;;  %285 = vset.pattern.permute.xlu1 %v293_v11 }
   0x3   :  { %143 = vmatpush.msra.mxu2 %v75_v1  ;;  %v59_v3 = vld [vmem:[%s535_s0 + $0xf8] sm:$0xff]  ;;  %v58_v6 = vld [vmem:[%s535_s0 + $0xf0] sm:$0xff]  ;;  %v57_v8 = vld [vmem:[%s535_s0 + $0xe8] sm:$0xff] }
   0x4   :  { %120 = vmatpush.msra.mxu1 %v59_v3  ;;  %98 = vmatpush.msra.mxu0 %v42_v2  ;;  %v40_v9 = vld [vmem:[%s535_s0 + $0x60] sm:$0xff]  ;;  %v39_v13 = vld [vmem:[%s535_s0 + $0x58] sm:$0xff]  ;;  %v38_v16 = vld [vmem:[%s535_s0 + $0x50] sm:$0xff] }
   0x5   :  { %144 = vmatpush.msra.mxu2 %v74_v4  ;;  %v72_v10 = vld [vmem:[%s535_s0 + $0x160] sm:$0xff]  ;;  %v71_v14 = vld [vmem:[%s535_s0 + $0x158] sm:$0xff]  ;;  %v70_v17 = vld [vmem:[%s535_s0 + $0x150] sm:$0xff] }
   0x6   :  { %121 = vmatpush.msra.mxu1 %v58_v6  ;;  %99 = vmatpush.msra.mxu0 %v41_v5  ;;  %v56_v12 = vld [vmem:[%s535_s0 + $0xe0] sm:$0xff]  ;;  %v55_v15 = vld [vmem:[%s535_s0 + $0xd8] sm:$0xff]  ;;  %v54_v18 = vld [vmem:[%s535_s0 + $0xd0] sm:$0xff] }
   0x7   :  { %145 = vmatpush.msra.mxu2 %v73_v7  ;;  %v37_v19 = vld [vmem:[%s535_s0 + $0x48] sm:$0xff]  ;;  %v36_v22 = vld [vmem:[%s535_s0 + $0x40] sm:$0xff]  ;;  %v35_v25 = vld [vmem:[%s535_s0 + $0x38] sm:$0xff] }
   0x8   :  { %122 = vmatpush.msra.mxu1 %v57_v8  ;;  %100 = vmatpush.msra.mxu0 %v40_v9  ;;  %v69_v20 = vld [vmem:[%s535_s0 + $0x148] sm:$0xff]  ;;  %v68_v23 = vld [vmem:[%s535_s0 + $0x140] sm:$0xff]  ;;  %v67_v26 = vld [vmem:[%s535_s0 + $0x138] sm:$0xff] }
   0x9   :  { %146 = vmatpush.msra.mxu2 %v72_v10  ;;  %v53_v21 = vld [vmem:[%s535_s0 + $0xc8] sm:$0xff]  ;;  %v52_v24 = vld [vmem:[%s535_s0 + $0xc0] sm:$0xff]  ;;  %v51_v27 = vld [vmem:[%s535_s0 + $0xb8] sm:$0xff] }
   0xa   :  { %123 = vmatpush.msra.mxu1 %v56_v12  ;;  %101 = vmatpush.msra.mxu0 %v39_v13  ;;  %v77_v28 = vld [vmem:[%s535_s0 + $0x188] sm:$0xff]  ;;  %v34_v29 = vld [vmem:[%s535_s0 + $0x30] sm:$0xff]  ;;  %v76_v32 = vld [vmem:[%s535_s0 + $0x180] sm:$0xff] }
   0xb   :  { %147 = vmatpush.msra.mxu2 %v71_v14  ;;  %v66_v30 = vld [vmem:[%s535_s0 + $0x130] sm:$0xff]  ;;  %180 = vmatpush.msra.mxu3 %v77_v28  ;;  %v23_v33 = vld [vmem:[%s536_s1 + $0x18] sm:$0xff]  ;;  %v33_v34 = vld [vmem:[%s535_s0 + $0x28] sm:$0xff] }
   0xc   :  { %124 = vmatpush.msra.mxu1 %v55_v15  ;;  %102 = vmatpush.msra.mxu0 %v38_v16  ;;  %v50_v31 = vld [vmem:[%s535_s0 + $0xb0] sm:$0xff]  ;;  %v65_v35 = vld [vmem:[%s535_s0 + $0x128] sm:$0xff]  ;;  %v78_v37 = vld [vmem:[%s537_s2] sm:$0xff]  ;;  %v294_v15 = vmov 128.0  }
   0xd   :  { %148 = vmatpush.msra.mxu2 %v70_v17  ;;  %181 = vmatpush.msra.mxu3 %v76_v32  ;;  %v49_v36 = vld [vmem:[%s535_s0 + $0xa8] sm:$0xff]  ;;  %v32_v38 = vld [vmem:[%s535_s0 + $0x20] sm:$0xff]  ;;  %v31_v41 = vld [vmem:[%s535_s0 + $0x18] sm:$0xff]  ;;  %287 = vrcp.f32 %v294_v15 }
   0xe   :  { %125 = vmatpush.msra.mxu1 %v54_v18  ;;  %103 = vmatpush.msra.mxu0 %v37_v19  ;;  %v64_v39 = vld [vmem:[%s535_s0 + $0x120] sm:$0xff]  ;;  %v63_v42 = vld [vmem:[%s535_s0 + $0x118] sm:$0xff]  ;;  %v30_v44 = vld [vmem:[%s535_s0 + $0x10] sm:$0xff] }
   0xf   :  { %149 = vmatpush.msra.mxu2 %v69_v20  ;;  %280 = vmatmul.msk.f32.vlgmr.msra.gmra.mxu3 %vm90_vm0, %v23_v33  ;;  %v48_v40 = vld [vmem:[%s535_s0 + $0xa0] sm:$0xff]  ;;  %v47_v43 = vld [vmem:[%s535_s0 + $0x98] sm:$0xff]  ;;  %v62_v45 = vld [vmem:[%s535_s0 + $0x110] sm:$0xff] }
  0x10   :  { %126 = vmatpush.msra.mxu1 %v53_v21  ;;  %104 = vmatpush.msra.mxu0 %v36_v22  ;;  %v46_v46 = vld [vmem:[%s535_s0 + $0x90] sm:$0xff]  ;;  %v27_v47 = vld [vmem:[%s536_s1 + $0x38] sm:$0xff]  ;;  %v29_v48 = vld [vmem:[%s535_s0 + $0x8] sm:$0xff] }
  0x11   :  { %150 = vmatpush.msra.mxu2 %v68_v23  ;;  %82 = vperm.xlu0 %284, %v78_v37   ;;  %v61_v49 = vld [vmem:[%s535_s0 + $0x108] sm:$0xff]  ;;  %v28_v52 = vld [vmem:[%s535_s0] sm:$0xff]  ;;  %v22_v55 = vld [vmem:[%s536_s1 + $0x10] sm:$0xff] }
  0x12   :  { %127 = vmatpush.msra.mxu1 %v52_v24  ;;  %105 = vmatpush.msra.mxu0 %v35_v25  ;;  %v45_v50 = vld [vmem:[%s535_s0 + $0x88] sm:$0xff]  ;;  %v60_v53 = vld [vmem:[%s535_s0 + $0x100] sm:$0xff]  ;;  %v26_v59 = vld [vmem:[%s536_s1 + $0x30] sm:$0xff] }
  0x13   :  { %151 = vmatpush.msra.mxu2 %v67_v26  ;;  %v79_v51 = vld [vmem:[%s537_s2 + $0x8] sm:$0xff]  ;;  %v20_v54 = vld [vmem:[%s536_s1] sm:$0xff]  ;;  %v288_v16 = vpop.eup %287 }
  0x14   :  { %128 = vmatpush.msra.mxu1 %v51_v27  ;;  %106 = vmatpush.msra.mxu0 %v34_v29  ;;  %v44_v56 = vld [vmem:[%s535_s0 + $0x80] sm:$0xff]  ;;  %v21_v57 = vld [vmem:[%s536_s1 + $0x8] sm:$0xff]  ;;  %v196_v17 = vmul.f32 128.0, %v288_v16  ;;  %vm200_vm1 = vweird.f32 %v288_v16 }
  0x15   :  { %152 = vmatpush.msra.mxu2 %v66_v30  ;;  %v24_v58 = vld [vmem:[%s536_s1 + $0x20] sm:$0xff]  ;;  %v25_v60 = vld [vmem:[%s536_s1 + $0x28] sm:$0xff] }
  0x16   :  { %129 = vmatpush.msra.mxu1 %v50_v31  ;;  %107 = vmatpush.msra.mxu0 %v33_v34  ;;  %v197_v18 = vsub.f32 1.0, %v196_v17 }
  0x17   :  { %153 = vmatpush.msra.mxu2 %v65_v35  ;;  %281 = vmatmul.msk.f32.gmra.mxu3 %vm90_vm0, %v27_v47 }
  0x18   :  { %130 = vmatpush.msra.mxu1 %v49_v36  ;;  %108 = vmatpush.msra.mxu0 %v32_v38  ;;  %v198_v19 = vmul.f32 %v288_v16, %v197_v18 }
  0x19   :  { %154 = vmatpush.msra.mxu2 %v64_v39  ;;  %87 = vperm.xlu0 %284, %v79_v51  }
  0x1a   :  { %131 = vmatpush.msra.mxu1 %v48_v40  ;;  %109 = vmatpush.msra.mxu0 %v31_v41  ;;  %v199_v20 = vadd.f32 %v288_v16, %v198_v19 }
  0x1b   :  { %155 = vmatpush.msra.mxu2 %v63_v42 }
  0x1c   :  { %132 = vmatpush.msra.mxu1 %v47_v43  ;;  %110 = vmatpush.msra.mxu0 %v30_v44  ;;  %v201_v21 = vsel %vm200_vm1, %v288_v16, %v199_v20  ;;  %v238_v44 = vld [vmem:[%s538_s3] sm:$0xff] }
  0x1d   :  { %156 = vmatpush.msra.mxu2 %v62_v45 }
  0x1e   :  { %133 = vmatpush.msra.mxu1 %v46_v46  ;;  %111 = vmatpush.msra.mxu0 %v29_v48 }
  0x1f   :  { %157 = vmatpush.msra.mxu2 %v61_v49  ;;  %v242_v49 = vld [vmem:[%s539_s4] sm:$0xff] }
  0x20   :  { %134 = vmatpush.msra.mxu1 %v45_v50  ;;  %112 = vmatpush.msra.mxu0 %v28_v52 }
  0x21   :  { %158 = vmatpush.msra.mxu2 %v60_v53  ;;  %113 = vmatmul.f32.vlgmr.msra.gmra.mxu0 %v20_v54  ;;  %v239_v54 = vld [vmem:[%s538_s3 + $0x8] sm:$0xff] }
  0x22   :  { %159 = vmatmul.f32.vlgmr.msra.gmra.mxu2 %v22_v55  ;;  %135 = vmatpush.msra.mxu1 %v44_v56 }
  0x23   :  { %136 = vmatmul.f32.vlgmr.msra.gmra.mxu1 %v21_v57  ;;  %v243_v57 = vld [vmem:[%s539_s4 + $0x8] sm:$0xff] }
  0x29   :  { %116 = vmatmul.f32.gmra.mxu0 %v24_v58 }
  0x2a   :  { %162 = vmatmul.f32.gmra.mxu2 %v26_v59 }
  0x2b   :  { %139 = vmatmul.f32.gmra.mxu1 %v25_v60 }
  0x83   :  { %v83_v61 = vpop.permute.xlu0 %82 }
  0x8b   :  { %v88_v5 = vpop.permute.xlu0 %87 }
  0x92   :  { %v183_v2 = vpop.f32.mrf.mxu3 }
  0x9a   :  { %v186_v12 = vpop.f32.mrf.mxu3 }
  0x9e   :  { %v114_v62 = vpop.f32.mrf.mxu0 }
  0x9f   :  { %v115_v63 = vadd.f32 %v114_v62, %v83_v61 }
  0xa0   :  { %v137_v0 = vpop.f32.mrf.mxu1 }
  0xa1   :  { %v138_v1 = vadd.f32 %v137_v0, %v115_v63 }
  0xa5   :  { %v160_v3 = vpop.f32.mrf.mxu2 }
  0xa6   :  { %v161_v4 = vadd.f32 %v160_v3, %v138_v1  ;;  %v117_v6 = vpop.f32.mrf.mxu0 }
  0xa7   :  { %v118_v7 = vadd.f32 %v117_v6, %v88_v5 }
  0xa8   :  { %v507_v8 = vadd.f32 %v183_v2, %v161_v4  ;;  %v140_v9 = vpop.f32.mrf.mxu1 }
  0xa9   :  { %v141_v10 = vadd.f32 %v140_v9, %v118_v7 }
  0xaa   :  { %189 = vadd.xlane.f32.xlu1 %v507_v8 }
  0xad   :  { %v163_v11 = vpop.f32.mrf.mxu2 }
  0xae   :  { %v164_v13 = vadd.f32 %v163_v11, %v141_v10 }
  0xb0   :  { %v510_v14 = vadd.f32 %v186_v12, %v164_v13 }
  0xb2   :  { %191 = vadd.xlane.f32.xlu1 %v510_v14 }
 0x11d   :  { %v190_v22 = vpop.xlane.xlu1 %189 }
 0x11e   :  { %v202_v23 = vmul.f32 %v201_v21, %v190_v22 }
 0x120   :  { %v204_v24 = vsub.f32 %v507_v8, %v202_v23 }
 0x122   :  { %v206_v25 = vmul.f32 %v204_v24, %v204_v24 }
 0x124   :  { %208 = vadd.xlane.f32.xlu2 %v206_v25 }
 0x125   :  { %v192_v26 = vpop.xlane.xlu1 %191 }
 0x126   :  { %v203_v27 = vmul.f32 %v201_v21, %v192_v26 }
 0x128   :  { %v205_v28 = vsub.f32 %v510_v14, %v203_v27 }
 0x12a   :  { %v207_v29 = vmul.f32 %v205_v28, %v205_v28 }
 0x12c   :  { %210 = vadd.xlane.f32.xlu2 %v207_v29 }
 0x197   :  { %v209_v30 = vpop.xlane.xlu2 %208 }
 0x198   :  { %v214_v31 = vmul.f32 %v209_v30, %v201_v21 }
 0x19a   :  { %v216_v32 = vadd.f32 1e-05, %v214_v31 }
 0x19c   :  { %289 = vrsqrt.f32 %v216_v32  ;;  %vm224_vm3 = vweird.f32 %v216_v32 }
 0x19f   :  { %v211_v33 = vpop.xlane.xlu2 %210 }
 0x1a0   :  { %v215_v34 = vmul.f32 %v211_v33, %v201_v21 }
 0x1a2   :  { %v290_v35 = vpop.eup %289  ;;  %v217_v36 = vadd.f32 1e-05, %v215_v34 }
 0x1a3   :  { %v219_v37 = vmul.f32 %v290_v35, %v216_v32  ;;  %vm225_vm2 = vweird.f32 %v290_v35 }
 0x1a4   :  { %291 = vrsqrt.f32 %v217_v36  ;;  %vm226_vm4 = vmor %vm224_vm3, %vm225_vm2  ;;  %vm234_vm6 = vweird.f32 %v217_v36 }
 0x1a5   :  { %v220_v38 = vmul.f32 %v290_v35, %v219_v37 }
 0x1a7   :  { %v221_v39 = vmul.f32 0.5, %v220_v38 }
 0x1a9   :  { %v222_v40 = vsub.f32 1.5, %v221_v39 }
 0x1aa   :  { %v292_v41 = vpop.eup %291 }
 0x1ab   :  { %v229_v42 = vmul.f32 %v292_v41, %v217_v36  ;;  %v223_v43 = vmul.f32 %v290_v35, %v222_v40  ;;  %vm235_vm5 = vweird.f32 %v292_v41 }
 0x1ac   :  { %vm236_vm7 = vmor %vm234_vm6, %vm235_vm5 }
 0x1ad   :  { %v230_v45 = vmul.f32 %v292_v41, %v229_v42  ;;  %v227_v46 = vsel %vm226_vm4, %v290_v35, %v223_v43 }
 0x1ae   :  { %v240_v47 = vmul.f32 %v238_v44, %v227_v46 }
 0x1af   :  { %v231_v48 = vmul.f32 0.5, %v230_v45 }
 0x1b0   :  { %250 = vperm.xlu0 %284, %v240_v47   ;;  %v244_v50 = vmul.f32 %v240_v47, %v202_v23 }
 0x1b1   :  { %v232_v51 = vsub.f32 1.5, %v231_v48 }
 0x1b2   :  { %v246_v52 = vsub.f32 %v242_v49, %v244_v50 }
 0x1b3   :  { %v233_v53 = vmul.f32 %v292_v41, %v232_v51 }
 0x1b4   :  { %262 = vperm.xlu2 %286, %v246_v52  }
 0x1b5   :  { %v237_v55 = vsel %vm236_vm7, %v292_v41, %v233_v53 }
 0x1b6   :  { %v241_v56 = vmul.f32 %v239_v54, %v237_v55 }
 0x1b8   :  { %255 = vperm.xlu1 %285, %v241_v56   ;;  %v245_v58 = vmul.f32 %v241_v56, %v203_v27 }
 0x1ba   :  { %v247_v59 = vsub.f32 %v243_v57, %v245_v58 }
 0x1bc   :  { %267 = vperm.xlu0 %284, %v247_v59  }
 0x20e   :  { %v263_v62 = vpop.permute.xlu2 %262 }
 0x222   :  { %v251_v60 = vpop.permute.xlu0 %250 }
 0x223   :  { %v258_v61 = vmul.f32 %v251_v60, %v507_v8 }
 0x225   :  { %v270_v63 = vadd.f32 %v263_v62, %v258_v61 }
 0x227   :  { %v272_v0 = vmax.f32 %v270_v63, 0.0 }
 0x229   :  { %274 = vst [vmem:[%s540_s5] sm:$0xff] %v272_v0 }
 0x22a   :  { %v256_v1 = vpop.permute.xlu1 %255 }
 0x22b   :  { %v259_v2 = vmul.f32 %v256_v1, %v510_v14 }
 0x22e   :  { %v268_v3 = vpop.permute.xlu0 %267 }
 0x22f   :  { %v271_v4 = vadd.f32 %v268_v3, %v259_v2 }
 0x231   :  { %v273_v5 = vmax.f32 %v271_v4, 0.0 }
 0x233   :  { %275 = vst [vmem:[%s540_s5 + $0x8] sm:$0xff] %v273_v5 }

// kernel: vae_forward.14
= control target key start
LH: loop header
LB: loop body
LE: loop exit
PB: predicated region body
PF: predicated region fallthrough
CT: control target
= control target key end

     0   :  { %v416_v3 = vmov 0   ;;  %vm42_vm0 = vcmask 523264   ;;  %v417_v61 = vmov 512.0   ;;  %s675_s0 = inlined_call_operand.vmem [shape: f32[4,64,128], index: 0, kind: input, shape index: {}]   ;;  %s676_s1 = inlined_call_operand.vmem [shape: f32[4,16,64], index: 1, kind: input, shape index: {}]   ;;  %s677_s2 = inlined_call_operand.vmem [shape: f32[16,1], index: 2, kind: input, shape index: {}]   ;;  %s678_s3 = inlined_call_operand.vmem [shape: f32[16,1], index: 3, kind: input, shape index: {}]   ;;  %s679_s4 = inlined_call_operand.vmem [shape: f32[16,1], index: 4, kind: input, shape index: {}]   ;;  %s680_s5 = inlined_call_operand.vmem [shape: f32[4,16,128], index: 5, kind: output, shape index: {}]  }
   0x1   :  { %v29_v0 = vld [vmem:[%s675_s0 + $0x38] sm:$0xff]  ;;  %407 = vset.pattern.permute.xlu0 %v416_v3  ;;  %408 = vset.pattern.permute.xlu2 %v416_v3  ;;  %v28_v5 = vld [vmem:[%s675_s0 + $0x30] sm:$0xff]  ;;  %v27_v9 = vld [vmem:[%s675_s0 + $0x28] sm:$0xff]  ;;  %410 = vrcp.f32 %v417_v61 }
   0x2   :  { %v372_v1 = vld [vmem:[%s675_s0 + $0x78] sm:$0xff]  ;;  %57 = vmatpush.msra.mxu0 %v29_v0  ;;  %v371_v6 = vld [vmem:[%s675_s0 + $0x70] sm:$0xff]  ;;  %v370_v10 = vld [vmem:[%s675_s0 + $0x68] sm:$0xff]  ;;  %409 = vset.pattern.permute.xlu1 %v416_v3 }
   0x3   :  { %v384_v2 = vld [vmem:[%s675_s0 + $0xb8] sm:$0xff]  ;;  %98 = vmatpush.msra.mxu1 %v372_v1  ;;  %v383_v7 = vld [vmem:[%s675_s0 + $0xb0] sm:$0xff]  ;;  %v382_v11 = vld [vmem:[%s675_s0 + $0xa8] sm:$0xff] }
   0x4   :  { %v396_v4 = vld [vmem:[%s675_s0 + $0xf8] sm:$0xff]  ;;  %139 = vmatpush.msra.mxu2 %v384_v2  ;;  %v395_v8 = vld [vmem:[%s675_s0 + $0xf0] sm:$0xff]  ;;  %58 = vmatpush.msra.mxu0 %v28_v5  ;;  %v394_v12 = vld [vmem:[%s675_s0 + $0xe8] sm:$0xff] }
   0x5   :  { %180 = vmatpush.msra.mxu3 %v396_v4  ;;  %99 = vmatpush.msra.mxu1 %v371_v6  ;;  %v26_v13 = vld [vmem:[%s675_s0 + $0x20] sm:$0xff]  ;;  %v25_v17 = vld [vmem:[%s675_s0 + $0x18] sm:$0xff]  ;;  %v24_v21 = vld [vmem:[%s675_s0 + $0x10] sm:$0xff] }
   0x6   :  { %140 = vmatpush.msra.mxu2 %v383_v7  ;;  %v369_v14 = vld [vmem:[%s675_s0 + $0x60] sm:$0xff]  ;;  %59 = vmatpush.msra.mxu0 %v27_v9  ;;  %v368_v18 = vld [vmem:[%s675_s0 + $0x58] sm:$0xff]  ;;  %v367_v22 = vld [vmem:[%s675_s0 + $0x50] sm:$0xff] }
   0x7   :  { %181 = vmatpush.msra.mxu3 %v395_v8  ;;  %100 = vmatpush.msra.mxu1 %v370_v10  ;;  %v381_v15 = vld [vmem:[%s675_s0 + $0xa0] sm:$0xff]  ;;  %v380_v19 = vld [vmem:[%s675_s0 + $0x98] sm:$0xff]  ;;  %v379_v23 = vld [vmem:[%s675_s0 + $0x90] sm:$0xff]  ;;  %v411_v62 = vpop.eup %410 }
   0x8   :  { %v393_v16 = vld [vmem:[%s675_s0 + $0xe0] sm:$0xff]  ;;  %141 = vmatpush.msra.mxu2 %v382_v11  ;;  %60 = vmatpush.msra.mxu0 %v26_v13  ;;  %v392_v20 = vld [vmem:[%s675_s0 + $0xd8] sm:$0xff]  ;;  %v391_v24 = vld [vmem:[%s675_s0 + $0xd0] sm:$0xff]  ;;  %v220_v1 = vmul.f32 512.0, %v411_v62  ;;  %vm224_vm1 = vweird.f32 %v411_v62 }
   0x9   :  { %182 = vmatpush.msra.mxu3 %v394_v12  ;;  %101 = vmatpush.msra.mxu1 %v369_v14  ;;  %v23_v25 = vld [vmem:[%s675_s0 + $0x8] sm:$0xff]  ;;  %v22_v29 = vld [vmem:[%s675_s0] sm:$0xff]  ;;  %v363_v34 = vld [vmem:[%s676_s1 + $0x10] sm:$0xff] }
   0xa   :  { %142 = vmatpush.msra.mxu2 %v381_v15  ;;  %61 = vmatpush.msra.mxu0 %v25_v17  ;;  %v366_v26 = vld [vmem:[%s675_s0 + $0x48] sm:$0xff]  ;;  %v365_v30 = vld [vmem:[%s675_s0 + $0x40] sm:$0xff]  ;;  %v387_v36 = vld [vmem:[%s676_s1 + $0x30] sm:$0xff]  ;;  %v221_v2 = vsub.f32 1.0, %v220_v1 }
   0xb   :  { %183 = vmatpush.msra.mxu3 %v393_v16  ;;  %102 = vmatpush.msra.mxu1 %v368_v18  ;;  %v378_v27 = vld [vmem:[%s675_s0 + $0x88] sm:$0xff]  ;;  %v377_v31 = vld [vmem:[%s675_s0 + $0x80] sm:$0xff]  ;;  %v364_v39 = vld [vmem:[%s676_s1 + $0x18] sm:$0xff] }
   0xc   :  { %143 = vmatpush.msra.mxu2 %v380_v19  ;;  %62 = vmatpush.msra.mxu0 %v24_v21  ;;  %v390_v28 = vld [vmem:[%s675_s0 + $0xc8] sm:$0xff]  ;;  %v389_v32 = vld [vmem:[%s675_s0 + $0xc0] sm:$0xff]  ;;  %v388_v41 = vld [vmem:[%s676_s1 + $0x38] sm:$0xff]  ;;  %v222_v5 = vmul.f32 %v411_v62, %v221_v2 }
   0xd   :  { %184 = vmatpush.msra.mxu3 %v392_v20  ;;  %103 = vmatpush.msra.mxu1 %v367_v22  ;;  %v20_v33 = vld [vmem:[%s676_s1] sm:$0xff]  ;;  %v21_v38 = vld [vmem:[%s676_s1 + $0x8] sm:$0xff] }
   0xe   :  { %144 = vmatpush.msra.mxu2 %v379_v23  ;;  %63 = vmatpush.msra.mxu0 %v23_v25  ;;  %v375_v35 = vld [vmem:[%s676_s1 + $0x20] sm:$0xff]  ;;  %v376_v40 = vld [vmem:[%s676_s1 + $0x28] sm:$0xff]  ;;  %v223_v7 = vadd.f32 %v411_v62, %v222_v5 }
   0xf   :  { %185 = vmatpush.msra.mxu3 %v391_v24  ;;  %104 = vmatpush.msra.mxu1 %v366_v26  ;;  %v30_v37 = vld [vmem:[%s677_s2] sm:$0xff]  ;;  %v31_v42 = vld [vmem:[%s677_s2 + $0x8] sm:$0xff] }
  0x10   :  { %145 = vmatpush.msra.mxu2 %v378_v27  ;;  %64 = vmatpush.msra.mxu0 %v22_v29  ;;  %v225_v10 = vsel %vm224_vm1, %v411_v62, %v223_v7 }
  0x11   :  { %186 = vmatpush.msra.mxu3 %v390_v28  ;;  %105 = vmatpush.msra.mxu1 %v365_v30 }
  0x12   :  { %146 = vmatpush.msra.mxu2 %v377_v31  ;;  %361 = vmatmul.msk.f32.vlgmr.msra.gmra.mxu0 %vm42_vm0, %v20_v33 }
  0x13   :  { %187 = vmatpush.msra.mxu3 %v389_v32  ;;  %373 = vmatmul.msk.f32.vlgmr.msra.gmra.mxu1 %vm42_vm0, %v363_v34 }
  0x14   :  { %385 = vmatmul.msk.f32.vlgmr.msra.gmra.mxu2 %vm42_vm0, %v375_v35  ;;  %397 = vmatmul.msk.f32.vlgmr.msra.gmra.mxu3 %vm42_vm0, %v387_v36 }
  0x15   :  { %34 = vperm.xlu0 %407, %v30_v37  }
  0x1a   :  { %362 = vmatmul.msk.f32.gmra.mxu0 %vm42_vm0, %v21_v38 }
  0x1b   :  { %374 = vmatmul.msk.f32.gmra.mxu1 %vm42_vm0, %v364_v39 }
  0x1c   :  { %386 = vmatmul.msk.f32.gmra.mxu2 %vm42_vm0, %v376_v40  ;;  %398 = vmatmul.msk.f32.gmra.mxu3 %vm42_vm0, %v388_v41 }
  0x1d   :  { %39 = vperm.xlu0 %407, %v31_v42  }
  0x87   :  { %v35_v43 = vpop.permute.xlu0 %34 }
  0x8f   :  { %v66_v44 = vpop.f32.mrf.mxu0  ;;  %v40_v48 = vpop.permute.xlu0 %39 }
  0x90   :  { %v107_v45 = vpop.f32.mrf.mxu1  ;;  %v585_v46 = vadd.f32 %v66_v44, %v35_v43 }
  0x91   :  { %v587_v47 = vadd.f32 %v107_v45, %v35_v43 }
  0x92   :  { %195 = vadd.xlane.f32.xlu1 %v585_v46 }
  0x93   :  { %199 = vadd.xlane.f32.xlu2 %v587_v47 }
  0x97   :  { %v148_v49 = vpop.f32.mrf.mxu2  ;;  %v69_v51 = vpop.f32.mrf.mxu0 }
  0x98   :  { %v591_v50 = vadd.f32 %v148_v49, %v35_v43  ;;  %v110_v52 = vpop.f32.mrf.mxu1  ;;  %v593_v53 = vadd.f32 %v69_v51, %v40_v48  ;;  %v189_v55 = vpop.f32.mrf.mxu3 }
  0x99   :  { %v595_v54 = vadd.f32 %v110_v52, %v40_v48  ;;  %v600_v57 = vadd.f32 %v189_v55, %v35_v43 }
  0x9a   :  { %203 = vadd.xlane.f32.xlu0 %v591_v50  ;;  %197 = vadd.xlane.f32.xlu1 %v593_v53 }
  0x9b   :  { %201 = vadd.xlane.f32.xlu2 %v595_v54 }
  0x9f   :  { %v151_v56 = vpop.f32.mrf.mxu2 }
  0xa0   :  { %v602_v58 = vadd.f32 %v151_v56, %v40_v48  ;;  %v192_v59 = vpop.f32.mrf.mxu3 }
  0xa1   :  { %v606_v60 = vadd.f32 %v192_v59, %v40_v48 }
  0xa2   :  { %205 = vadd.xlane.f32.xlu1 %v602_v58 }
  0xa3   :  { %207 = vadd.xlane.f32.xlu2 %v600_v57 }
  0xaa   :  { %209 = vadd.xlane.f32.xlu1 %v606_v60 }
 0x105   :  { %v196_v0 = vpop.xlane.xlu1 %195 }
 0x106   :  { %v200_v63 = vpop.xlane.xlu2 %199 }
 0x107   :  { %v213_v8 = vadd.f32 %v200_v63, %v196_v0 }
 0x10d   :  { %v198_v4 = vpop.xlane.xlu1 %197  ;;  %v204_v6 = vpop.xlane.xlu0 %203 }
 0x10e   :  { %v202_v3 = vpop.xlane.xlu2 %201  ;;  %v215_v9 = vadd.f32 %v213_v8, %v204_v6  ;;  %v292_v6 = vld [vmem:[%s678_s3] sm:$0xff] }
 0x10f   :  { %v214_v15 = vadd.f32 %v202_v3, %v198_v4 }
 0x115   :  { %v206_v12 = vpop.xlane.xlu1 %205 }
 0x116   :  { %v208_v11 = vpop.xlane.xlu2 %207  ;;  %v216_v17 = vadd.f32 %v214_v15, %v206_v12 }
 0x117   :  { %v217_v13 = vadd.f32 %v215_v9, %v208_v11  ;;  %v296_v11 = vld [vmem:[%s679_s4] sm:$0xff] }
 0x119   :  { %v609_v14 = vmul.f32 %v225_v10, %v217_v13 }
 0x11b   :  { %v228_v16 = vsub.f32 %v585_v46, %v609_v14  ;;  %v236_v22 = vsub.f32 %v587_v47, %v609_v14  ;;  %v244_v26 = vsub.f32 %v591_v50, %v609_v14  ;;  %v252_v30 = vsub.f32 %v600_v57, %v609_v14 }
 0x11d   :  { %v230_v18 = vmul.f32 %v228_v16, %v228_v16  ;;  %v210_v19 = vpop.xlane.xlu1 %209  ;;  %v238_v24 = vmul.f32 %v236_v22, %v236_v22  ;;  %v246_v28 = vmul.f32 %v244_v26, %v244_v26  ;;  %v254_v32 = vmul.f32 %v252_v30, %v252_v30 }
 0x11e   :  { %v218_v20 = vadd.f32 %v216_v17, %v210_v19  ;;  %v293_v17 = vld [vmem:[%s678_s3 + $0x8] sm:$0xff] }
 0x11f   :  { %232 = vadd.xlane.f32.xlu2 %v230_v18 }
 0x120   :  { %v613_v21 = vmul.f32 %v225_v10, %v218_v20 }
 0x122   :  { %v229_v23 = vsub.f32 %v593_v53, %v613_v21  ;;  %v237_v27 = vsub.f32 %v595_v54, %v613_v21  ;;  %v245_v31 = vsub.f32 %v602_v58, %v613_v21  ;;  %v253_v34 = vsub.f32 %v606_v60, %v613_v21 }
 0x124   :  { %v231_v25 = vmul.f32 %v229_v23, %v229_v23  ;;  %v239_v29 = vmul.f32 %v237_v27, %v237_v27  ;;  %v247_v33 = vmul.f32 %v245_v31, %v245_v31  ;;  %v255_v35 = vmul.f32 %v253_v34, %v253_v34 }
 0x126   :  { %234 = vadd.xlane.f32.xlu1 %v231_v25 }
 0x127   :  { %240 = vadd.xlane.f32.xlu2 %v238_v24 }
 0x12e   :  { %242 = vadd.xlane.f32.xlu1 %v239_v29 }
 0x12f   :  { %248 = vadd.xlane.f32.xlu2 %v246_v28 }
 0x136   :  { %250 = vadd.xlane.f32.xlu1 %v247_v33 }
 0x137   :  { %256 = vadd.xlane.f32.xlu2 %v254_v32 }
 0x13e   :  { %258 = vadd.xlane.f32.xlu1 %v255_v35 }
 0x192   :  { %v233_v36 = vpop.xlane.xlu2 %232 }
 0x199   :  { %v235_v38 = vpop.xlane.xlu1 %234 }
 0x19a   :  { %v241_v37 = vpop.xlane.xlu2 %240 }
 0x19b   :  { %v262_v41 = vadd.f32 %v241_v37, %v233_v36 }
 0x1a1   :  { %v243_v40 = vpop.xlane.xlu1 %242 }
 0x1a2   :  { %v249_v39 = vpop.xlane.xlu2 %248  ;;  %v263_v49 = vadd.f32 %v243_v40, %v235_v38 }
 0x1a3   :  { %v264_v42 = vadd.f32 %v262_v41, %v249_v39 }
 0x1a9   :  { %v251_v44 = vpop.xlane.xlu1 %250 }
 0x1aa   :  { %v257_v43 = vpop.xlane.xlu2 %256  ;;  %v265_v52 = vadd.f32 %v263_v49, %v251_v44 }
 0x1ab   :  { %v266_v45 = vadd.f32 %v264_v42, %v257_v43 }
 0x1ad   :  { %v268_v48 = vmul.f32 %v266_v45, %v225_v10 }
 0x1af   :  { %v270_v51 = vadd.f32 1e-05, %v268_v48 }
 0x1b1   :  { %412 = vrsqrt.f32 %v270_v51  ;;  %v259_v55 = vpop.xlane.xlu1 %258  ;;  %vm278_vm3 = vweird.f32 %v270_v51 }
 0x1b2   :  { %v267_v56 = vadd.f32 %v265_v52, %v259_v55 }
 0x1b4   :  { %v269_v59 = vmul.f32 %v267_v56, %v225_v10 }
 0x1b6   :  { %v271_v62 = vadd.f32 1e-05, %v269_v59 }
 0x1b7   :  { %v413_v61 = vpop.eup %412 }
 0x1b8   :  { %v273_v63 = vmul.f32 %v413_v61, %v270_v51  ;;  %414 = vrsqrt.f32 %v271_v62  ;;  %vm279_vm2 = vweird.f32 %v413_v61  ;;  %vm288_vm6 = vweird.f32 %v271_v62 }
 0x1b9   :  { %vm280_vm4 = vmor %vm278_vm3, %vm279_vm2 }
 0x1ba   :  { %v274_v0 = vmul.f32 %v413_v61, %v273_v63 }
 0x1bc   :  { %v275_v1 = vmul.f32 0.5, %v274_v0 }
 0x1be   :  { %v276_v2 = vsub.f32 1.5, %v275_v1  ;;  %v415_v3 = vpop.eup %414 }
 0x1bf   :  { %v283_v4 = vmul.f32 %v415_v3, %v271_v62  ;;  %vm289_vm5 = vweird.f32 %v415_v3 }
 0x1c0   :  { %v277_v5 = vmul.f32 %v413_v61, %v276_v2  ;;  %vm290_vm7 = vmor %vm288_vm6, %vm289_vm5 }
 0x1c1   :  { %v284_v7 = vmul.f32 %v415_v3, %v283_v4 }
 0x1c2   :  { %v281_v8 = vsel %vm280_vm4, %v413_v61, %v277_v5 }
 0x1c3   :  { %v294_v9 = vmul.f32 %v292_v6, %v281_v8  ;;  %v285_v10 = vmul.f32 0.5, %v284_v7 }
 0x1c5   :  { %304 = vperm.xlu2 %408, %v294_v9   ;;  %v298_v12 = vmul.f32 %v294_v9, %v609_v14  ;;  %v286_v13 = vsub.f32 1.5, %v285_v10  ;;  %v297_v14 = vld [vmem:[%s679_s4 + $0x8] sm:$0xff] }
 0x1c7   :  { %v300_v15 = vsub.f32 %v296_v11, %v298_v12  ;;  %v287_v16 = vmul.f32 %v415_v3, %v286_v13 }
 0x1c9   :  { %316 = vperm.xlu1 %409, %v300_v15   ;;  %v291_v18 = vsel %vm290_vm7, %v415_v3, %v287_v16 }
 0x1ca   :  { %v295_v19 = vmul.f32 %v293_v17, %v291_v18 }
 0x1cc   :  { %309 = vperm.xlu0 %407, %v295_v19   ;;  %v299_v20 = vmul.f32 %v295_v19, %v613_v21 }
 0x1ce   :  { %v301_v22 = vsub.f32 %v297_v14, %v299_v20 }
 0x1d4   :  { %321 = vperm.xlu0 %407, %v301_v22  }
 0x21f   :  { %v305_v23 = vpop.permute.xlu2 %304 }
 0x220   :  { %v312_v24 = vmul.f32 %v305_v23, %v585_v46  ;;  %v330_v25 = vmul.f32 %v305_v23, %v587_v47  ;;  %v339_v26 = vmul.f32 %v305_v23, %v591_v50  ;;  %v348_v27 = vmul.f32 %v305_v23, %v600_v57 }
 0x23b   :  { %v317_v28 = vpop.permute.xlu1 %316 }
 0x23c   :  { %v324_v29 = vadd.f32 %v317_v28, %v312_v24  ;;  %v332_v30 = vadd.f32 %v330_v25, %v317_v28  ;;  %v341_v31 = vadd.f32 %v339_v26, %v317_v28  ;;  %v350_v21 = vadd.f32 %v348_v27, %v317_v28 }
 0x23e   :  { %v326_v32 = vmax.f32 %v324_v29, 0.0  ;;  %v334_v33 = vmax.f32 %v332_v30, 0.0  ;;  %v343_v34 = vmax.f32 %v341_v31, 0.0  ;;  %v352_v35 = vmax.f32 %v350_v21, 0.0  ;;  %v310_v36 = vpop.permute.xlu0 %309 }
 0x23f   :  { %v313_v46 = vmul.f32 %v310_v36, %v593_v53  ;;  %v331_v47 = vmul.f32 %v310_v36, %v595_v54  ;;  %v340_v50 = vmul.f32 %v310_v36, %v602_v58  ;;  %v349_v57 = vmul.f32 %v310_v36, %v606_v60 }
 0x240   :  { %328 = vst [vmem:[%s680_s5] sm:$0xff] %v326_v32 }
 0x241   :  { %399 = vst [vmem:[%s680_s5 + $0x10] sm:$0xff] %v334_v33 }
 0x242   :  { %401 = vst [vmem:[%s680_s5 + $0x20] sm:$0xff] %v343_v34 }
 0x243   :  { %403 = vst [vmem:[%s680_s5 + $0x30] sm:$0xff] %v352_v35 }
 0x246   :  { %v322_v37 = vpop.permute.xlu0 %321 }
 0x247   :  { %v325_v38 = vadd.f32 %v322_v37, %v313_v46  ;;  %v333_v39 = vadd.f32 %v331_v47, %v322_v37  ;;  %v342_v40 = vadd.f32 %v340_v50, %v322_v37  ;;  %v351_v41 = vadd.f32 %v349_v57, %v322_v37 }
 0x249   :  { %v327_v42 = vmax.f32 %v325_v38, 0.0  ;;  %v335_v43 = vmax.f32 %v333_v39, 0.0  ;;  %v344_v44 = vmax.f32 %v342_v40, 0.0  ;;  %v353_v45 = vmax.f32 %v351_v41, 0.0 }
 0x24b   :  { %329 = vst [vmem:[%s680_s5 + $0x8] sm:$0xff] %v327_v42 }
 0x24c   :  { %400 = vst [vmem:[%s680_s5 + $0x18] sm:$0xff] %v335_v43 }
 0x24d   :  { %402 = vst [vmem:[%s680_s5 + $0x28] sm:$0xff] %v344_v44 }
 0x24e   :  { %404 = vst [vmem:[%s680_s5 + $0x38] sm:$0xff] %v353_v45 }

// kernel: vae_forward.15
= control target key start
LH: loop header
LB: loop body
LE: loop exit
PB: predicated region body
PF: predicated region fallthrough
CT: control target
= control target key end

     0   :  { %s460_s12 = smov 0   ;;  %s522_s0 = inlined_call_operand.vmem [shape: f32[4,64,512], index: 0, kind: input, shape index: {}]   ;;  %s523_s1 = inlined_call_operand.vmem [shape: f32[4,3,64], index: 1, kind: input, shape index: {}]   ;;  %s524_s2 = inlined_call_operand.vmem [shape: f32[3,1], index: 2, kind: input, shape index: {}]   ;;  %s525_s3 = inlined_call_operand.vmem [shape: f32[4,3,512], index: 3, kind: output, shape index: {}]  }
   0x1 LB: > { %s395_s13 = sadd.s32 4294967295, %s437_s12   ;;  %p399_p0 = scmp.ge.s32.totalorder %s437_s12, 1  ;;  %s437_s12 = sphi %s460_s12, %s13_s12  }
   0x2   : > { %p146_p1 = scmp.lt.s32.totalorder %s437_s12, 5 }
   0x4   : > { %p147_p2 = pnand %p399_p0, %p146_p1 }
   0x5   : > { %p174_p3 = scmp.lt.s32.totalorder (!%p147_p2), %s395_s13, 3 }
   0x6   : > { %150 = sbr.rel (%p147_p2) target bundleno = 175 (0xaf), region = 32 }
   0xb   : > { %v221_v0 = vld [vmem:[%s524_s2] sm:$0x7]  ;;  %v439_v1 = vmov 0   ;;  %s527_s13 = smov (!%p174_p3, %s395_s13), 3  ;;  %vm227_vm0 = vcmask 523264   ;;  %vm321_vm1 = vcmask 1043456  }
   0xc   : > { %422 = vset.pattern.permute.xlu0 %v439_v1  ;;  %s411_s16 = sshll.u32 %s527_s13, 8  ;;  %s402_s20 = sshll.u32 %s527_s13, 2 }
   0xd   : > { %224 = vperm.xlu0 %422, %v221_v0   ;;  %s477_s19 = scalar_lea.vmem %s522_s0, %s411_s16  ;;  %s182_s23 = scalar_lea.vmem %s523_s1, %s402_s20 }
   0xe   : > { %v219_v2 = vld [vmem:[%s477_s19 + $0xf0] sm:$0xff]  ;;  %v220_v3 = vld [vmem:[%s477_s19 + $0xf8] sm:$0xff]  ;;  %v218_v6 = vld [vmem:[%s477_s19 + $0xe8] sm:$0xff]  ;;  %s412_s24 = sshll.u32 %s527_s13, 4 }
   0xf   : > { %v215_v4 = vld [vmem:[%s477_s19 + $0xd0] sm:$0xff]  ;;  %279 = vmatpush.msra.mxu2 %v219_v2  ;;  %299 = vmatpush.msra.mxu3 %v220_v3  ;;  %v216_v5 = vld [vmem:[%s477_s19 + $0xd8] sm:$0xff]  ;;  %v217_v9 = vld [vmem:[%s477_s19 + $0xe0] sm:$0xff]  ;;  %s187_s27 = scalar_lea.vmem %s525_s3, %s412_s24 }
  0x10   : > { %v211_v7 = vld [vmem:[%s477_s19 + $0xb0] sm:$0xff]  ;;  %259 = vmatpush.msra.mxu1 %v218_v6  ;;  %v212_v8 = vld [vmem:[%s477_s19 + $0xb8] sm:$0xff]  ;;  %v214_v10 = vld [vmem:[%s477_s19 + $0xc8] sm:$0xff]  ;;  %239 = vmatpush.msra.mxu0 %v217_v9 }
  0x11   : > { %280 = vmatpush.msra.mxu2 %v215_v4  ;;  %300 = vmatpush.msra.mxu3 %v216_v5  ;;  %v213_v11 = vld [vmem:[%s477_s19 + $0xc0] sm:$0xff]  ;;  %v207_v12 = vld [vmem:[%s477_s19 + $0x90] sm:$0xff]  ;;  %v208_v13 = vld [vmem:[%s477_s19 + $0x98] sm:$0xff] }
  0x12   : > { %260 = vmatpush.msra.mxu1 %v214_v10  ;;  %v210_v14 = vld [vmem:[%s477_s19 + $0xa8] sm:$0xff]  ;;  %v209_v15 = vld [vmem:[%s477_s19 + $0xa0] sm:$0xff]  ;;  %240 = vmatpush.msra.mxu0 %v213_v11  ;;  %v203_v17 = vld [vmem:[%s477_s19 + $0x70] sm:$0xff] }
  0x13   : > { %281 = vmatpush.msra.mxu2 %v211_v7  ;;  %301 = vmatpush.msra.mxu3 %v212_v8  ;;  %v206_v16 = vld [vmem:[%s477_s19 + $0x88] sm:$0xff]  ;;  %v204_v18 = vld [vmem:[%s477_s19 + $0x78] sm:$0xff]  ;;  %v205_v19 = vld [vmem:[%s477_s19 + $0x80] sm:$0xff] }
  0x14   : > { %261 = vmatpush.msra.mxu1 %v210_v14  ;;  %v202_v20 = vld [vmem:[%s477_s19 + $0x68] sm:$0xff]  ;;  %241 = vmatpush.msra.mxu0 %v209_v15  ;;  %v199_v21 = vld [vmem:[%s477_s19 + $0x50] sm:$0xff]  ;;  %v200_v22 = vld [vmem:[%s477_s19 + $0x58] sm:$0xff] }
  0x15   : > { %282 = vmatpush.msra.mxu2 %v207_v12  ;;  %302 = vmatpush.msra.mxu3 %v208_v13  ;;  %v201_v23 = vld [vmem:[%s477_s19 + $0x60] sm:$0xff]  ;;  %v198_v24 = vld [vmem:[%s477_s19 + $0x48] sm:$0xff]  ;;  %v195_v25 = vld [vmem:[%s477_s19 + $0x30] sm:$0xff] }
  0x16   : > { %262 = vmatpush.msra.mxu1 %v206_v16  ;;  %242 = vmatpush.msra.mxu0 %v205_v19  ;;  %v196_v26 = vld [vmem:[%s477_s19 + $0x38] sm:$0xff]  ;;  %v197_v27 = vld [vmem:[%s477_s19 + $0x40] sm:$0xff]  ;;  %v194_v28 = vld [vmem:[%s477_s19 + $0x28] sm:$0xff] }
  0x17   : > { %283 = vmatpush.msra.mxu2 %v203_v17  ;;  %303 = vmatpush.msra.mxu3 %v204_v18  ;;  %v191_v29 = vld [vmem:[%s477_s19 + $0x10] sm:$0xff]  ;;  %v192_v30 = vld [vmem:[%s477_s19 + $0x18] sm:$0xff]  ;;  %v188_v31 = vld [vmem:[%s182_s23] sm:$0x7] }
  0x18   : > { %263 = vmatpush.msra.mxu1 %v202_v20  ;;  %243 = vmatpush.msra.mxu0 %v201_v23  ;;  %v193_v32 = vld [vmem:[%s477_s19 + $0x20] sm:$0xff]  ;;  %v190_v33 = vld [vmem:[%s477_s19 + $0x8] sm:$0xff] }
  0x19   : > { %284 = vmatpush.msra.mxu2 %v199_v21  ;;  %304 = vmatpush.msra.mxu3 %v200_v22  ;;  %v189_v34 = vld [vmem:[%s477_s19] sm:$0xff] }
  0x1a   : > { %264 = vmatpush.msra.mxu1 %v198_v24  ;;  %244 = vmatpush.msra.mxu0 %v197_v27 }
  0x1b   : > { %285 = vmatpush.msra.mxu2 %v195_v25  ;;  %305 = vmatpush.msra.mxu3 %v196_v26 }
  0x1c   : > { %265 = vmatpush.msra.mxu1 %v194_v28  ;;  %245 = vmatpush.msra.mxu0 %v193_v32 }
  0x1d   : > { %286 = vmatpush.msra.mxu2 %v191_v29  ;;  %306 = vmatpush.msra.mxu3 %v192_v30 }
  0x1e   : > { %407 = vmatmul.msk.f32.vlgmr.msra.gmra.mxu2 %vm227_vm0, %v188_v31  ;;  %408 = vmatmul.msk.f32.vlgmr.msra.gmra.mxu3 %vm227_vm0, %v188_v31 }
  0x1f   : > { %266 = vmatpush.msra.mxu1 %v190_v33  ;;  %246 = vmatpush.msra.mxu0 %v189_v34 }
  0x20   : > { %406 = vmatmul.msk.f32.vlgmr.msra.gmra.mxu1 %vm227_vm0, %v188_v31  ;;  %405 = vmatmul.msk.f32.vlgmr.msra.gmra.mxu0 %vm227_vm0, %v188_v31 }
  0x7f   : > { %v225_v35 = vpop.permute.xlu0 %224 }
  0x9d   : > { %v268_v36 = vpop.f32.mrf.mxu1  ;;  %v248_v38 = vpop.f32.mrf.mxu0 }
  0x9e   : > { %v269_v37 = vadd.f32 %v268_v36, %v225_v35  ;;  %v249_v39 = vadd.f32 %v248_v38, %v225_v35 }
  0xa0   : > { %423 = vtanh.f32 %v269_v37 }
  0xa1   : > { %v288_v40 = vpop.f32.mrf.mxu2  ;;  %v308_v41 = vpop.f32.mrf.mxu3  ;;  %425 = vtanh.f32 %v249_v39 }
  0xa2   : > { %v309_v42 = vadd.f32 %v308_v41, %v225_v35  ;;  %v289_v43 = vadd.f32 %v288_v40, %v225_v35 }
  0xa4   : > { %427 = vtanh.f32 %v309_v42 }
  0xa5   : > { %429 = vtanh.f32 %v289_v43 }
  0xa6   : > { %v424_v44 = vpop.eup %423 }
  0xa7   : > { %v319_v45 = vrot.slane %v424_v44, 4  ;;  %v426_v46 = vpop.eup %425 }
  0xa9   : > { %v322_v47 = vsel %vm321_vm1, %v426_v46, %v319_v45 }
  0xaa   : > { %326 = vst [vmem:[%s187_s27] sm:$0x77] %v322_v47  ;;  %v428_v48 = vpop.eup %427 }
  0xab   : > { %v320_v49 = vrot.slane %v428_v48, 4  ;;  %v430_v50 = vpop.eup %429 }
  0xad   : > { %v323_v51 = vsel %vm321_vm1, %v430_v50, %v320_v49 }
  0xae   : > { %327 = vst [vmem:[%s187_s27 + $0x8] sm:$0x77] %v323_v51 }
  0xaf PF: > { %s13_s12 = sadd.s32 1, %s437_s12  }
  0xb0   : > { %p10_p4 = scmp.ge.s32.totalorder %s13_s12, 6  }
  0xb2   :  { %12 = sbr.rel (!%p10_p4) target bundleno = 1 (0x1), region = 65 }

</bundles_post_ra>
